<compile_context>
chip_gen: v6e
topology: v6e:2x2x1
jax: 0.10.0
libtpu: 0.0.40
codegen_flags: <defaults>
</compile_context>

<pallas_src>
import math
import functools

import jax
import jax.numpy as jnp
from jax import lax
from jax.experimental import pallas as pl
from jax.experimental.pallas import tpu as pltpu

# bf16 streaming / MXU inputs; all matmuls accumulate f32 (preferred_element_type).
_ACT_DTYPE = jnp.bfloat16
_VMEM_LIMIT = 64 * 1024 * 1024       # explicit budget; fits v7x's 64 MiB physical VMEM

_TM_MATMUL = 512
_TN_MATMUL = 512
_TM_NORM = 512
_TQ_ATTN = 256                       # >=256 fills the 256-wide MXU on v6e/v7x
_TK_ATTN = 256


def _pick_tile(dim, target, align):
    """Largest tile <= target that divides `dim` and is a multiple of `align`.
    Falls back to the full dim (an untiled block is always layout-legal)."""
    if dim <= target:
        return dim
    t = (target // align) * align
    while t >= align:
        if dim % t == 0:
            return t
        t -= align
    return dim


def _cparams(*semantics):
    return pltpu.CompilerParams(dimension_semantics=semantics,
                                vmem_limit_bytes=_VMEM_LIMIT)


# ----------------------------- Pallas kernels ------------------------------

def _linear_kernel(x_ref, w_ref, b_ref, o_ref):
    acc = jnp.dot(x_ref[...], w_ref[...], preferred_element_type=jnp.float32)
    o_ref[...] = (acc + b_ref[...]).astype(o_ref.dtype)


def linear(x2d, w, b, out_dtype=None):
    """(M, K) @ (K, N) + (N,) -> (M, N).  Grid is (N-tiles, M-tiles): the weight
    column axis is OUTER so each (K, TN) weight tile stays resident in VMEM while
    row tiles stream (critical for the vocab projection)."""
    out_dtype = _ACT_DTYPE if out_dtype is None else out_dtype
    M, K = x2d.shape
    N = w.shape[1]
    TM = _pick_tile(M, _TM_MATMUL, 8)
    TN = _pick_tile(N, _TN_MATMUL, 128)
    return pl.pallas_call(
        _linear_kernel,
        out_shape=jax.ShapeDtypeStruct((M, N), out_dtype),
        grid=(N // TN, M // TM),
        in_specs=[pl.BlockSpec((TM, K), lambda j, i: (i, 0)),
                  pl.BlockSpec((K, TN), lambda j, i: (0, j)),
                  pl.BlockSpec((1, TN), lambda j, i: (0, j))],
        out_specs=pl.BlockSpec((TM, TN), lambda j, i: (i, j)),
        compiler_params=_cparams("parallel", "parallel"),
    )(x2d, w, b.reshape(1, N))


def _make_split_linear_kernel(n_out):
    def kernel(x_ref, w_ref, b_ref, *o_refs):
        acc = jnp.dot(x_ref[...], w_ref[...],
                      preferred_element_type=jnp.float32) + b_ref[...]
        d = o_refs[0].shape[-1]
        for idx in range(n_out):
            o_refs[idx][...] = acc[:, idx * d:(idx + 1) * d].astype(o_refs[idx].dtype)
    return kernel


def split_linear(x2d, w, b, n_out):
    """Fused projection x @ [w_0|w_1|...] emitting n_out separate (M, D) outputs
    from ONE pallas_call (no XLA slice/reshape HBM round-trips afterwards)."""
    M, K = x2d.shape
    N = w.shape[1]
    D = N // n_out
    TM = _pick_tile(M, _TM_MATMUL, 8)
    return pl.pallas_call(
        _make_split_linear_kernel(n_out),
        out_shape=tuple(jax.ShapeDtypeStruct((M, D), _ACT_DTYPE) for _ in range(n_out)),
        grid=(M // TM,),
        in_specs=[pl.BlockSpec((TM, K), lambda i: (i, 0)),
                  pl.BlockSpec((K, N), lambda i: (0, 0)),
                  pl.BlockSpec((1, N), lambda i: (0, 0))],
        out_specs=tuple(pl.BlockSpec((TM, D), lambda i: (i, 0)) for _ in range(n_out)),
        compiler_params=_cparams("parallel"),
    )(x2d, w, b.reshape(1, N))


def _ffn_kernel(x_ref, w1_ref, b1_ref, w2_ref, b2_ref, o_ref):
    h = jnp.dot(x_ref[...], w1_ref[...],
                preferred_element_type=jnp.float32) + b1_ref[...]
    h = jnp.maximum(h, 0.0)                                     # ReLU
    o_ref[...] = (jnp.dot(h.astype(w2_ref.dtype), w2_ref[...],
                          preferred_element_type=jnp.float32)
                  + b2_ref[...]).astype(o_ref.dtype)


def ffn(x2d, w1, b1, w2, b2):
    """Position-wise feed-forward relu(x@w1+b1)@w2+b2, fused and row-tiled."""
    M, K = x2d.shape
    H = w1.shape[1]
    N = w2.shape[1]
    TM = _pick_tile(M, _TM_MATMUL, 8)
    # TODO(synk): for very large H on v7x add a grid axis over H with an f32 accumulator.
    return pl.pallas_call(
        _ffn_kernel,
        out_shape=jax.ShapeDtypeStruct((M, N), _ACT_DTYPE),
        grid=(M // TM,),
        in_specs=[pl.BlockSpec((TM, K), lambda i: (i, 0)),
                  pl.BlockSpec((K, H), lambda i: (0, 0)),
                  pl.BlockSpec((1, H), lambda i: (0, 0)),
                  pl.BlockSpec((H, N), lambda i: (0, 0)),
                  pl.BlockSpec((1, N), lambda i: (0, 0))],
        out_specs=pl.BlockSpec((TM, N), lambda i: (i, 0)),
        compiler_params=_cparams("parallel"),
    )(x2d, w1, b1.reshape(1, H), w2, b2.reshape(1, N))


def _add_layernorm_kernel(a_ref, r_ref, g_ref, b_ref, o_ref, *, eps):
    x = a_ref[...].astype(jnp.float32) + r_ref[...].astype(jnp.float32)
    mu = jnp.mean(x, axis=-1, keepdims=True)
    var = jnp.mean(jnp.square(x - mu), axis=-1, keepdims=True)
    o_ref[...] = ((x - mu) * lax.rsqrt(var + eps) * g_ref[...]
                  + b_ref[...]).astype(o_ref.dtype)


def add_layer_norm(a2d, r2d, gamma, beta, eps=1e-12):
    """LayerNorm(a + r) * gamma + beta, row-tiled with the residual add fused."""
    M, D = a2d.shape
    TM = _pick_tile(M, _TM_NORM, 8)
    return pl.pallas_call(
        functools.partial(_add_layernorm_kernel, eps=eps),
        out_shape=jax.ShapeDtypeStruct((M, D), _ACT_DTYPE),
        grid=(M // TM,),
        in_specs=[pl.BlockSpec((TM, D), lambda i: (i, 0)),
                  pl.BlockSpec((TM, D), lambda i: (i, 0)),
                  pl.BlockSpec((1, D), lambda i: (0, 0)),
                  pl.BlockSpec((1, D), lambda i: (0, 0))],
        out_specs=pl.BlockSpec((TM, D), lambda i: (i, 0)),
        compiler_params=_cparams("parallel"),
    )(a2d, r2d, gamma.reshape(1, D), beta.reshape(1, D))


def _flash_mha_kernel(q_ref, k_ref, v_ref, qv_ref, kv_ref, wo_ref, bo_ref,
                      o_ref, m_sc, l_sc, acc_sc, *, n_head, scale, causal, tq, tk):
    """One (batch, q-tile) per outer grid point; online softmax over the Sk-tile
    axis.  All heads handled per step; output projection is a single K=D matmul."""
    ki = pl.program_id(2)
    nk = pl.num_programs(2)

    @pl.when(ki == 0)
    def _():
        m_sc[...] = jnp.full(m_sc.shape, -jnp.inf, dtype=m_sc.dtype)
        l_sc[...] = jnp.zeros(l_sc.shape, dtype=l_sc.dtype)
        acc_sc[...] = jnp.zeros(acc_sc.shape, dtype=acc_sc.dtype)

    q = q_ref[0]                                   # (TQ, D) bf16
    k = k_ref[0]                                   # (TK, D) bf16
    v = v_ref[0]                                   # (TK, D) bf16

    # Pad (+ causal) mask generated on the VPU from tiny validity vectors —
    # the (B,1,Sq,Sk) mask never touches HBM.
    valid = (qv_ref[0] > 0.5) & (kv_ref[0] > 0.5)  # (TQ,1) & (1,TK) -> (TQ,TK)
    if causal:
        row = pl.program_id(1) * tq + lax.broadcasted_iota(jnp.int32, (tq, tk), 0)
        col = ki * tk + lax.broadcasted_iota(jnp.int32, (tq, tk), 1)
        valid = valid & (row >= col)

    D = q.shape[-1]
    dk = D // n_head
    for h in range(n_head):                        # unrolled over heads
        cs = slice(h * dk, (h + 1) * dk)
        # q_h @ k_h^T without materializing a transpose.
        s = lax.dot_general(q[:, cs], k[:, cs], (((1,), (1,)), ((), ())),
                            preferred_element_type=jnp.float32) * scale
        # masked_fill(mask==0, -1e9); fully-padded rows give uniform attention,
        # matching the PyTorch reference.
        s = jnp.where(valid, s, -1e9)
        m_old = m_sc[h]                            # (TQ, 1)
        m_new = jnp.maximum(m_old, jnp.max(s, axis=-1, keepdims=True))
        alpha = jnp.exp(m_old - m_new)
        p = jnp.exp(s - m_new)
        l_sc[h] = alpha * l_sc[h] + jnp.sum(p, axis=-1, keepdims=True)
        acc_sc[:, cs] = alpha * acc_sc[:, cs] + jnp.dot(
            p.astype(v.dtype), v[:, cs], preferred_element_type=jnp.float32)
        m_sc[h] = m_new

    @pl.when(ki == nk - 1)
    def _():
        # Per-head normalization (exact division — no approx reciprocal), then a
        # single (TQ, D) @ (D, D) output projection that fills the MXU depth.
        for h in range(n_head):
            cs = slice(h * dk, (h + 1) * dk)
            acc_sc[:, cs] = acc_sc[:, cs] / l_sc[h]
        ctx = acc_sc[...].astype(wo_ref.dtype)
        o_ref[0] = (jnp.dot(ctx, wo_ref[...], preferred_element_type=jnp.float32)
                    + bo_ref[...]).astype(o_ref.dtype)


def flash_mha(q, k, v, q_valid, k_valid, wo, bo, n_head, causal):
    """q: (B,Sq,D), k/v: (B,Sk,D), q_valid: (B,Sq,1), k_valid: (B,1,Sk) -> (B,Sq,D)."""
    B, Sq, D = q.shape
    Sk = k.shape[1]
    dk = D // n_head
    scale = 1.0 / math.sqrt(dk)
    TQ = _pick_tile(Sq, _TQ_ATTN, 8)
    TK = _pick_tile(Sk, _TK_ATTN, 128)
    return pl.pallas_call(
        functools.partial(_flash_mha_kernel, n_head=n_head, scale=scale,
                          causal=causal, tq=TQ, tk=TK),
        out_shape=jax.ShapeDtypeStruct((B, Sq, D), _ACT_DTYPE),
        grid=(B, Sq // TQ, Sk // TK),
        in_specs=[pl.BlockSpec((1, TQ, D), lambda b, qi, ki: (b, qi, 0)),
                  pl.BlockSpec((1, TK, D), lambda b, qi, ki: (b, ki, 0)),
                  pl.BlockSpec((1, TK, D), lambda b, qi, ki: (b, ki, 0)),
                  pl.BlockSpec((1, TQ, 1), lambda b, qi, ki: (b, qi, 0)),
                  pl.BlockSpec((1, 1, TK), lambda b, qi, ki: (b, 0, ki)),
                  pl.BlockSpec((D, D), lambda b, qi, ki: (0, 0)),
                  pl.BlockSpec((1, D), lambda b, qi, ki: (0, 0))],
        out_specs=pl.BlockSpec((1, TQ, D), lambda b, qi, ki: (b, qi, 0)),
        scratch_shapes=[pltpu.VMEM((n_head, TQ, 1), jnp.float32),   # running max m
                        pltpu.VMEM((n_head, TQ, 1), jnp.float32),   # running sum l
                        pltpu.VMEM((TQ, D), jnp.float32)],          # context acc
        compiler_params=_cparams("parallel", "parallel", "arbitrary"),
    )(q, k, v, q_valid, k_valid, wo, bo.reshape(1, D))


# --------------------------- model glue (plain JAX) -------------------------

def multi_head_attention(x_q, x_kv, q_valid, k_valid, p, n_head, causal):
    B, Sq, D = x_q.shape
    Sk = x_kv.shape[1]
    if "w_qkv" in p:                      # self-attention: fused QKV, 3 outputs
        q2, k2, v2 = split_linear(x_q.reshape(B * Sq, D), p["w_qkv"], p["b_qkv"], 3)
        q = q2.reshape(B, Sq, D)
        k = k2.reshape(B, Sq, D)
        v = v2.reshape(B, Sq, D)
    else:                                 # cross-attention: Q + fused KV (2 outputs)
        q = linear(x_q.reshape(B * Sq, D), p["wq"], p["bq"]).reshape(B, Sq, D)
        k2, v2 = split_linear(x_kv.reshape(B * Sk, D), p["w_kv"], p["b_kv"], 2)
        k = k2.reshape(B, Sk, D)
        v = v2.reshape(B, Sk, D)
    return flash_mha(q, k, v, q_valid, k_valid, p["wo"], p["bo"], n_head, causal)


def sinusoidal_pos_encoding(max_len, d_model):
    pos = jnp.arange(max_len, dtype=jnp.float32)[:, None]
    i2 = jnp.arange(0, d_model, 2, dtype=jnp.float32)
    div = jnp.power(10000.0, i2 / d_model)
    pe = jnp.zeros((max_len, d_model), jnp.float32)
    pe = pe.at[:, 0::2].set(jnp.sin(pos / div))
    pe = pe.at[:, 1::2].set(jnp.cos(pos / div))
    return pe


def transformer_embedding(ids, tok_emb, pos_emb):
    B, S = ids.shape
    # TODO(synk): dropout omitted (inference / eval semantics -> identity).
    return (jnp.take(tok_emb, ids, axis=0) + pos_emb[:S][None, :, :]).astype(_ACT_DTYPE)


def encoder_forward(p, ids, qv, kv, cfg):
    B, S = ids.shape
    D = cfg["d_model"]
    x = transformer_embedding(ids, p["tok_emb"], p["pos_emb"])
    for lp in p["layers"]:
        a = multi_head_attention(x, x, qv, kv, lp["attn"], cfg["n_head"], causal=False)
        x = add_layer_norm(a.reshape(B * S, D), x.reshape(B * S, D),
                           lp["ln1_g"], lp["ln1_b"]).reshape(B, S, D)
        f = ffn(x.reshape(B * S, D), lp["ffn_w1"], lp["ffn_b1"],
                lp["ffn_w2"], lp["ffn_b2"]).reshape(B, S, D)
        x = add_layer_norm(f.reshape(B * S, D), x.reshape(B * S, D),
                           lp["ln2_g"], lp["ln2_b"]).reshape(B, S, D)
    return x


def decoder_forward(p, ids, enc, trg_qv, trg_kv, src_kv, cfg):
    B, S = ids.shape
    D = cfg["d_model"]
    x = transformer_embedding(ids, p["tok_emb"], p["pos_emb"])
    for lp in p["layers"]:
        a = multi_head_attention(x, x, trg_qv, trg_kv, lp["self_attn"],
                                 cfg["n_head"], causal=True)
        x = add_layer_norm(a.reshape(B * S, D), x.reshape(B * S, D),
                           lp["ln1_g"], lp["ln1_b"]).reshape(B, S, D)
        c = multi_head_attention(x, enc, trg_qv, src_kv, lp["cross_attn"],
                                 cfg["n_head"], causal=False)
        x = add_layer_norm(c.reshape(B * S, D), x.reshape(B * S, D),
                           lp["ln2_g"], lp["ln2_b"]).reshape(B, S, D)
        f = ffn(x.reshape(B * S, D), lp["ffn_w1"], lp["ffn_b1"],
                lp["ffn_w2"], lp["ffn_b2"]).reshape(B, S, D)
        x = add_layer_norm(f.reshape(B * S, D), x.reshape(B * S, D),
                           lp["ln3_g"], lp["ln3_b"]).reshape(B, S, D)
    logits = linear(x.reshape(B * S, D), p["fc_w"], p["fc_b"], out_dtype=jnp.float32)
    return logits.reshape(B, S, cfg["dec_voc_size"])


def _validity(ids, pad_idx):
    """(B,S) int ids -> ((B,S,1), (B,1,S)) float validity vectors (1=keep, 0=pad)."""
    v = (ids != pad_idx).astype(jnp.float32)
    return v[:, :, None], v[:, None, :]


def transformer_forward(params, src, trg, cfg):
    # Intended mask semantics of the reference (its mask-call arities are buggy):
    #   src_mask = pad(src,src); trg_mask = pad(trg,trg)&causal; src_trg_mask = pad(trg,src)
    src_qv, src_kv = _validity(src, cfg["src_pad_idx"])
    trg_qv, trg_kv = _validity(trg, cfg["trg_pad_idx"])
    enc = encoder_forward(params["encoder"], src, src_qv, src_kv, cfg)
    return decoder_forward(params["decoder"], trg, enc, trg_qv, trg_kv, src_kv, cfg)


# ----------------------------- parameter init -------------------------------

def init_params(key, cfg):
    D, H = cfg["d_model"], cfg["ffn_hidden"]
    keys = iter(jax.random.split(key, 4096))

    def dense(fan_in, fan_out):
        w = jax.random.normal(next(keys), (fan_in, fan_out), jnp.float32) * 0.02
        return w.astype(_ACT_DTYPE)                 # weights streamed as bf16

    def self_attn_params():
        return {"w_qkv": dense(D, 3 * D), "b_qkv": jnp.zeros((3 * D,), jnp.float32),
                "wo": dense(D, D), "bo": jnp.zeros((D,), jnp.float32)}

    def cross_attn_params():
        return {"wq": dense(D, D), "bq": jnp.zeros((D,), jnp.float32),
                "w_kv": dense(D, 2 * D), "b_kv": jnp.zeros((2 * D,), jnp.float32),
                "wo": dense(D, D), "bo": jnp.zeros((D,), jnp.float32)}

    def ffn_ln(extra_ln):
        p = {"ffn_w1": dense(D, H), "ffn_b1": jnp.zeros((H,), jnp.float32),
             "ffn_w2": dense(H, D), "ffn_b2": jnp.zeros((D,), jnp.float32)}
        for name in extra_ln:
            p[name + "_g"] = jnp.ones((D,), jnp.float32)
            p[name + "_b"] = jnp.zeros((D,), jnp.float32)
        return p

    pos_emb = sinusoidal_pos_encoding(cfg["max_len"], D).astype(_ACT_DTYPE)

    enc_layers = []
    for _ in range(cfg["n_layer"]):
        lp = {"attn": self_attn_params()}
        lp.update(ffn_ln(["ln1", "ln2"]))
        enc_layers.append(lp)
    encoder = {"tok_emb": dense(cfg["enc_voc_size"], D),
               "pos_emb": pos_emb, "layers": enc_layers}

    dec_layers = []
    for _ in range(cfg["n_layer"]):
        lp = {"self_attn": self_attn_params(), "cross_attn": cross_attn_params()}
        lp.update(ffn_ln(["ln1", "ln2", "ln3"]))
        dec_layers.append(lp)
    decoder = {"tok_emb": dense(cfg["dec_voc_size"], D),
               "pos_emb": pos_emb, "layers": dec_layers,
               "fc_w": dense(D, cfg["dec_voc_size"]),
               "fc_b": jnp.zeros((cfg["dec_voc_size"],), jnp.float32)}

    return {"encoder": encoder, "decoder": decoder}


# --------------------------------- main --------------------------------------

if __name__ == "__main__":
    cfg = dict(src_pad_idx=0, trg_pad_idx=0,
               enc_voc_size=16, dec_voc_size=16,
               max_len=16, d_model=32, n_head=4,
               ffn_hidden=64, n_layer=2, drop_prob=0.1)

    key = jax.random.PRNGKey(0)
    k_param, k_src, k_trg = jax.random.split(key, 3)
    params = init_params(k_param, cfg)

    B, S_src, S_trg = 2, 8, 8
    src = jax.random.randint(k_src, (B, S_src), 1, cfg["enc_voc_size"], jnp.int32)
    trg = jax.random.randint(k_trg, (B, S_trg), 1, cfg["dec_voc_size"], jnp.int32)
    # force some padding so pad masks are non-trivial
    src = src.at[:, -2:].set(cfg["src_pad_idx"])
    trg = trg.at[:, -1:].set(cfg["trg_pad_idx"])

    fwd = jax.jit(functools.partial(transformer_forward, cfg=cfg))
    out = jax.block_until_ready(fwd(params, src, trg))
    assert out.shape == (B, S_trg, cfg["dec_voc_size"])
    assert bool(jnp.all(jnp.isfinite(out)))
    print("KERNEL_OK")
</pallas_src>

<mosaic_0001>
module attributes {stable_mosaic.version = 11 : i64} {
  func.func @kernel(%arg0: i32, %arg1: memref<16x32xbf16, #tpu.memory_space<vmem>>, %arg2: memref<32x96xbf16, #tpu.memory_space<vmem>>, %arg3: memref<1x96xf32, #tpu.memory_space<vmem>>, %arg4: memref<16x32xbf16, #tpu.memory_space<vmem>>, %arg5: memref<16x32xbf16, #tpu.memory_space<vmem>>, %arg6: memref<16x32xbf16, #tpu.memory_space<vmem>>) attributes {dimension_semantics = [#tpu.dimension_semantics<parallel>], iteration_bounds = array<i64: 1>, scalar_prefetch = 0 : i64, scratch_operands = 0 : i64, tpu.core_type = #tpu.core_type<tc>, window_params = [{transform_indices = @transform_0, window_bounds = array<i64: 16, 32>}, {pipeline_mode = #tpu.pipeline_mode<synchronous>, transform_indices = @transform_1, window_bounds = array<i64: 32, 96>}, {pipeline_mode = #tpu.pipeline_mode<synchronous>, transform_indices = @transform_2, window_bounds = array<i64: 1, 96>}, {transform_indices = @transform_3, window_bounds = array<i64: 16, 32>}, {transform_indices = @transform_4, window_bounds = array<i64: 16, 32>}, {transform_indices = @transform_5, window_bounds = array<i64: 16, 32>}]} {
    %c0 = arith.constant 0 : index
    %c0_0 = arith.constant 0 : index
    %0 = vector.load %arg1[%c0, %c0_0] : memref<16x32xbf16, #tpu.memory_space<vmem>>, vector<16x32xbf16>
    %c0_1 = arith.constant 0 : index
    %c0_2 = arith.constant 0 : index
    %1 = vector.load %arg2[%c0_1, %c0_2] : memref<32x96xbf16, #tpu.memory_space<vmem>>, vector<32x96xbf16>
    %cst = arith.constant dense<0.000000e+00> : vector<16x96xf32>
    %2 = tpu.matmul %0, %1, %cst {dimension_numbers = #tpu.dot_dimension_numbers<[1], [0], [0], [1], [0, 0, 1, 1], [], []>} : vector<16x32xbf16>, vector<32x96xbf16>, vector<16x96xf32> -> vector<16x96xf32>
    %c0_3 = arith.constant 0 : index
    %c0_4 = arith.constant 0 : index
    %3 = vector.load %arg3[%c0_3, %c0_4] : memref<1x96xf32, #tpu.memory_space<vmem>>, vector<1x96xf32>
    %4 = vector.broadcast %3 : vector<1x96xf32> to vector<16x96xf32>
    %5 = arith.addf %2, %4 : vector<16x96xf32>
    %6 = vector.extract_strided_slice %5 {offsets = [0, 0], sizes = [16, 32], strides = [1, 1]} : vector<16x96xf32> to vector<16x32xf32>
    %7 = arith.truncf %6 : vector<16x32xf32> to vector<16x32xbf16>
    %c0_5 = arith.constant 0 : index
    %c0_6 = arith.constant 0 : index
    %8 = vector.load %arg4[%c0_5, %c0_6] : memref<16x32xbf16, #tpu.memory_space<vmem>>, vector<16x32xbf16>
    tpu.vector_store %arg4[%c0_5, %c0_6], %7 {strides = array<i32>} : memref<16x32xbf16, #tpu.memory_space<vmem>>, vector<16x32xbf16>,
    %9 = vector.extract_strided_slice %5 {offsets = [0, 32], sizes = [16, 32], strides = [1, 1]} : vector<16x96xf32> to vector<16x32xf32>
    %10 = arith.truncf %9 : vector<16x32xf32> to vector<16x32xbf16>
    %c0_7 = arith.constant 0 : index
    %c0_8 = arith.constant 0 : index
    %11 = vector.load %arg5[%c0_7, %c0_8] : memref<16x32xbf16, #tpu.memory_space<vmem>>, vector<16x32xbf16>
    tpu.vector_store %arg5[%c0_7, %c0_8], %10 {strides = array<i32>} : memref<16x32xbf16, #tpu.memory_space<vmem>>, vector<16x32xbf16>,
    %12 = vector.extract_strided_slice %5 {offsets = [0, 64], sizes = [16, 32], strides = [1, 1]} : vector<16x96xf32> to vector<16x32xf32>
    %13 = arith.truncf %12 : vector<16x32xf32> to vector<16x32xbf16>
    %c0_9 = arith.constant 0 : index
    %c0_10 = arith.constant 0 : index
    %14 = vector.load %arg6[%c0_9, %c0_10] : memref<16x32xbf16, #tpu.memory_space<vmem>>, vector<16x32xbf16>
    tpu.vector_store %arg6[%c0_9, %c0_10], %13 {strides = array<i32>} : memref<16x32xbf16, #tpu.memory_space<vmem>>, vector<16x32xbf16>,
    return
  }
  func.func @transform_0(%arg0: i32) -> (i32, i32) {
    %c0_i32 = arith.constant 0 : i32
    %c0_i32_0 = arith.constant 0 : i32
    return %arg0, %c0_i32 : i32, i32
  }
  func.func @transform_1(%arg0: i32) -> (i32, i32) {
    %c0_i32 = arith.constant 0 : i32
    %c0_i32_0 = arith.constant 0 : i32
    %c0_i32_1 = arith.constant 0 : i32
    return %c0_i32, %c0_i32_0 : i32, i32
  }
  func.func @transform_2(%arg0: i32) -> (i32, i32) {
    %c0_i32 = arith.constant 0 : i32
    %c0_i32_0 = arith.constant 0 : i32
    %c0_i32_1 = arith.constant 0 : i32
    return %c0_i32, %c0_i32_0 : i32, i32
  }
  func.func @transform_3(%arg0: i32) -> (i32, i32) {
    %c0_i32 = arith.constant 0 : i32
    %c0_i32_0 = arith.constant 0 : i32
    return %arg0, %c0_i32 : i32, i32
  }
  func.func @transform_4(%arg0: i32) -> (i32, i32) {
    %c0_i32 = arith.constant 0 : i32
    %c0_i32_0 = arith.constant 0 : i32
    return %arg0, %c0_i32 : i32, i32
  }
  func.func @transform_5(%arg0: i32) -> (i32, i32) {
    %c0_i32 = arith.constant 0 : i32
    %c0_i32_0 = arith.constant 0 : i32
    return %arg0, %c0_i32 : i32, i32
  }
}

module attributes {stable_mosaic.version = 11 : i64} {
  func.func @_flash_mha_kernel(%arg0: i32, %arg1: i32, %arg2: i32, %arg3: memref<1x8x32xbf16, #tpu.memory_space<vmem>>, %arg4: memref<1x8x32xbf16, #tpu.memory_space<vmem>>, %arg5: memref<1x8x32xbf16, #tpu.memory_space<vmem>>, %arg6: memref<1x8x1xf32, #tpu.memory_space<vmem>>, %arg7: memref<1x1x8xf32, #tpu.memory_space<vmem>>, %arg8: memref<32x32xbf16, #tpu.memory_space<vmem>>, %arg9: memref<1x32xf32, #tpu.memory_space<vmem>>, %arg10: memref<1x8x32xbf16, #tpu.memory_space<vmem>>, %arg11: memref<4x8x1xf32, #tpu.memory_space<vmem>>, %arg12: memref<4x8x1xf32, #tpu.memory_space<vmem>>, %arg13: memref<8x32xf32, #tpu.memory_space<vmem>>) attributes {dimension_semantics = [#tpu.dimension_semantics<parallel>, #tpu.dimension_semantics<parallel>, #tpu.dimension_semantics<arbitrary>], iteration_bounds = array<i64: 2, 1, 1>, scalar_prefetch = 0 : i64, scratch_operands = 3 : i64, tpu.core_type = #tpu.core_type<tc>, window_params = [{transform_indices = @transform_0, window_bounds = array<i64: 1, 8, 32>}, {transform_indices = @transform_1, window_bounds = array<i64: 1, 8, 32>}, {transform_indices = @transform_2, window_bounds = array<i64: 1, 8, 32>}, {transform_indices = @transform_3, window_bounds = array<i64: 1, 8, 1>}, {transform_indices = @transform_4, window_bounds = array<i64: 1, 1, 8>}, {pipeline_mode = #tpu.pipeline_mode<synchronous>, transform_indices = @transform_5, window_bounds = array<i64: 32, 32>}, {pipeline_mode = #tpu.pipeline_mode<synchronous>, transform_indices = @transform_6, window_bounds = array<i64: 1, 32>}, {transform_indices = @transform_7, window_bounds = array<i64: 1, 8, 32>}]} {
    %c0_i32 = arith.constant 0 : i32
    %0 = arith.cmpi eq, %arg2, %c0_i32 : i32
    %1 = arith.extui %0 : i1 to i32
    %c0_i32_0 = arith.constant 0 : i32
    %2 = arith.cmpi ne, %1, %c0_i32_0 : i32
    scf.if %2 {
      %cst_100 = arith.constant 0xFF800000 : f32
      %171 = vector.broadcast %cst_100 : f32 to vector<4x8x1xf32>
      %c0_101 = arith.constant 0 : index
      %c0_102 = arith.constant 0 : index
      %c0_103 = arith.constant 0 : index
      %172 = vector.load %arg11[%c0_101, %c0_102, %c0_103] : memref<4x8x1xf32, #tpu.memory_space<vmem>>, vector<4x8x1xf32>
      tpu.vector_store %arg11[%c0_101, %c0_102, %c0_103], %171 {strides = array<i32>} : memref<4x8x1xf32, #tpu.memory_space<vmem>>, vector<4x8x1xf32>,
      %cst_104 = arith.constant 0.000000e+00 : f32
      %173 = vector.broadcast %cst_104 : f32 to vector<4x8x1xf32>
      %c0_105 = arith.constant 0 : index
      %c0_106 = arith.constant 0 : index
      %c0_107 = arith.constant 0 : index
      %174 = vector.load %arg12[%c0_105, %c0_106, %c0_107] : memref<4x8x1xf32, #tpu.memory_space<vmem>>, vector<4x8x1xf32>
      tpu.vector_store %arg12[%c0_105, %c0_106, %c0_107], %173 {strides = array<i32>} : memref<4x8x1xf32, #tpu.memory_space<vmem>>, vector<4x8x1xf32>,
      %cst_108 = arith.constant 0.000000e+00 : f32
      %175 = vector.broadcast %cst_108 : f32 to vector<8x32xf32>
      %c0_109 = arith.constant 0 : index
      %c0_110 = arith.constant 0 : index
      %176 = vector.load %arg13[%c0_109, %c0_110] : memref<8x32xf32, #tpu.memory_space<vmem>>, vector<8x32xf32>
      tpu.vector_store %arg13[%c0_109, %c0_110], %175 {strides = array<i32>} : memref<8x32xf32, #tpu.memory_space<vmem>>, vector<8x32xf32>,
    } else {
    }
    %c0 = arith.constant 0 : index
    %c0_1 = arith.constant 0 : index
    %c0_2 = arith.constant 0 : index
    %3 = vector.load %arg3[%c0, %c0_1, %c0_2] : memref<1x8x32xbf16, #tpu.memory_space<vmem>>, vector<1x8x32xbf16>
    %4 = vector.shape_cast %3 : vector<1x8x32xbf16> to vector<8x32xbf16>
    %c0_3 = arith.constant 0 : index
    %c0_4 = arith.constant 0 : index
    %c0_5 = arith.constant 0 : index
    %5 = vector.load %arg4[%c0_3, %c0_4, %c0_5] : memref<1x8x32xbf16, #tpu.memory_space<vmem>>, vector<1x8x32xbf16>
    %6 = vector.shape_cast %5 : vector<1x8x32xbf16> to vector<8x32xbf16>
    %c0_6 = arith.constant 0 : index
    %c0_7 = arith.constant 0 : index
    %c0_8 = arith.constant 0 : index
    %7 = vector.load %arg5[%c0_6, %c0_7, %c0_8] : memref<1x8x32xbf16, #tpu.memory_space<vmem>>, vector<1x8x32xbf16>
    %8 = vector.shape_cast %7 : vector<1x8x32xbf16> to vector<8x32xbf16>
    %c0_9 = arith.constant 0 : index
    %c0_10 = arith.constant 0 : index
    %c0_11 = arith.constant 0 : index
    %9 = vector.load %arg6[%c0_9, %c0_10, %c0_11] : memref<1x8x1xf32, #tpu.memory_space<vmem>>, vector<1x8x1xf32>
    %10 = vector.shape_cast %9 : vector<1x8x1xf32> to vector<8x1xf32>
    %cst = arith.constant 5.000000e-01 : f32
    %11 = vector.broadcast %cst : f32 to vector<8x1xf32>
    %12 = arith.cmpf ogt, %10, %11 : vector<8x1xf32>
    %c0_12 = arith.constant 0 : index
    %c0_13 = arith.constant 0 : index
    %c0_14 = arith.constant 0 : index
    %13 = vector.load %arg7[%c0_12, %c0_13, %c0_14] : memref<1x1x8xf32, #tpu.memory_space<vmem>>, vector<1x1x8xf32>
    %14 = vector.shape_cast %13 : vector<1x1x8xf32> to vector<1x8xf32>
    %cst_15 = arith.constant 5.000000e-01 : f32
    %15 = vector.broadcast %cst_15 : f32 to vector<1x8xf32>
    %16 = arith.cmpf ogt, %14, %15 : vector<1x8xf32>
    %17 = vector.broadcast %12 : vector<8x1xi1> to vector<8x8xi1>
    %18 = vector.broadcast %16 : vector<1x8xi1> to vector<8x8xi1>
    %19 = arith.andi %17, %18 : vector<8x8xi1>
    %20 = vector.extract_strided_slice %4 {offsets = [0, 0], sizes = [8, 8], strides = [1, 1]} : vector<8x32xbf16> to vector<8x8xbf16>
    %21 = vector.extract_strided_slice %6 {offsets = [0, 0], sizes = [8, 8], strides = [1, 1]} : vector<8x32xbf16> to vector<8x8xbf16>
    %cst_16 = arith.constant dense<0.000000e+00> : vector<8x8xf32>
    %22 = tpu.matmul %20, %21, %cst_16 {dimension_numbers = #tpu.dot_dimension_numbers<[1], [1], [0], [0], [0, 0, 1, 0], [], []>} : vector<8x8xbf16>, vector<8x8xbf16>, vector<8x8xf32> -> vector<8x8xf32>
    %cst_17 = arith.constant 0.353553385 : f32
    %23 = vector.broadcast %cst_17 : f32 to vector<8x8xf32>
    %24 = arith.mulf %22, %23 : vector<8x8xf32>
    %cst_18 = arith.constant -1.000000e+09 : f32
    %25 = vector.broadcast %cst_18 : f32 to vector<8x8xf32>
    %26 = arith.select %19, %24, %25 : vector<8x8xi1>, vector<8x8xf32>
    %c0_19 = arith.constant 0 : index
    %c0_20 = arith.constant 0 : index
    %c0_21 = arith.constant 0 : index
    %27 = vector.load %arg11[%c0_19, %c0_20, %c0_21] : memref<4x8x1xf32, #tpu.memory_space<vmem>>, vector<1x8x1xf32>
    %28 = vector.shape_cast %27 : vector<1x8x1xf32> to vector<8x1xf32>
    %cst_22 = arith.constant dense<0xFF800000> : vector<8xf32>
    %29 = vector.multi_reduction <maximumf>, %26, %cst_22 [1] : vector<8x8xf32> to vector<8xf32>
    %30 = vector.shape_cast %29 : vector<8xf32> to vector<8x1xf32>
    %31 = arith.maximumf %28, %30 : vector<8x1xf32>
    %32 = arith.subf %28, %31 : vector<8x1xf32>
    %33 = math.exp %32 : vector<8x1xf32>
    %34 = vector.broadcast %31 : vector<8x1xf32> to vector<8x8xf32>
    %35 = arith.subf %26, %34 : vector<8x8xf32>
    %36 = math.exp %35 : vector<8x8xf32>
    %c0_23 = arith.constant 0 : index
    %c0_24 = arith.constant 0 : index
    %c0_25 = arith.constant 0 : index
    %37 = vector.load %arg12[%c0_23, %c0_24, %c0_25] : memref<4x8x1xf32, #tpu.memory_space<vmem>>, vector<1x8x1xf32>
    %38 = vector.shape_cast %37 : vector<1x8x1xf32> to vector<8x1xf32>
    %39 = arith.mulf %33, %38 : vector<8x1xf32>
    %cst_26 = arith.constant dense<0.000000e+00> : vector<8xf32>
    %40 = vector.multi_reduction <add>, %36, %cst_26 [1] : vector<8x8xf32> to vector<8xf32>
    %41 = vector.shape_cast %40 : vector<8xf32> to vector<8x1xf32>
    %42 = arith.addf %39, %41 : vector<8x1xf32>
    %c0_27 = arith.constant 0 : index
    %c0_28 = arith.constant 0 : index
    %c0_29 = arith.constant 0 : index
    %43 = vector.load %arg12[%c0_27, %c0_28, %c0_29] : memref<4x8x1xf32, #tpu.memory_space<vmem>>, vector<1x8x1xf32>
    %44 = vector.shape_cast %43 : vector<1x8x1xf32> to vector<8x1xf32>
    %45 = vector.shape_cast %42 : vector<8x1xf32> to vector<1x8x1xf32>
    tpu.vector_store %arg12[%c0_27, %c0_28, %c0_29], %45 {strides = array<i32>} : memref<4x8x1xf32, #tpu.memory_space<vmem>>, vector<1x8x1xf32>,
    %c0_30 = arith.constant 0 : index
    %c0_31 = arith.constant 0 : index
    %46 = vector.load %arg13[%c0_30, %c0_31] : memref<8x32xf32, #tpu.memory_space<vmem>>, vector<8x8xf32>
    %47 = vector.broadcast %33 : vector<8x1xf32> to vector<8x8xf32>
    %48 = arith.mulf %47, %46 : vector<8x8xf32>
    %49 = arith.truncf %36 : vector<8x8xf32> to vector<8x8xbf16>
    %50 = vector.extract_strided_slice %8 {offsets = [0, 0], sizes = [8, 8], strides = [1, 1]} : vector<8x32xbf16> to vector<8x8xbf16>
    %cst_32 = arith.constant dense<0.000000e+00> : vector<8x8xf32>
    %51 = tpu.matmul %49, %50, %cst_32 {dimension_numbers = #tpu.dot_dimension_numbers<[1], [0], [0], [1], [0, 0, 1, 1], [], []>} : vector<8x8xbf16>, vector<8x8xbf16>, vector<8x8xf32> -> vector<8x8xf32>
    %52 = arith.addf %48, %51 : vector<8x8xf32>
    %c0_33 = arith.constant 0 : index
    %c0_34 = arith.constant 0 : index
    %53 = vector.load %arg13[%c0_33, %c0_34] : memref<8x32xf32, #tpu.memory_space<vmem>>, vector<8x8xf32>
    tpu.vector_store %arg13[%c0_33, %c0_34], %52 {strides = array<i32>} : memref<8x32xf32, #tpu.memory_space<vmem>>, vector<8x8xf32>,
    %c0_35 = arith.constant 0 : index
    %c0_36 = arith.constant 0 : index
    %c0_37 = arith.constant 0 : index
    %54 = vector.load %arg11[%c0_35, %c0_36, %c0_37] : memref<4x8x1xf32, #tpu.memory_space<vmem>>, vector<1x8x1xf32>
    %55 = vector.shape_cast %54 : vector<1x8x1xf32> to vector<8x1xf32>
    %56 = vector.shape_cast %31 : vector<8x1xf32> to vector<1x8x1xf32>
    tpu.vector_store %arg11[%c0_35, %c0_36, %c0_37], %56 {strides = array<i32>} : memref<4x8x1xf32, #tpu.memory_space<vmem>>, vector<1x8x1xf32>,
    %57 = vector.extract_strided_slice %4 {offsets = [0, 8], sizes = [8, 8], strides = [1, 1]} : vector<8x32xbf16> to vector<8x8xbf16>
    %58 = vector.extract_strided_slice %6 {offsets = [0, 8], sizes = [8, 8], strides = [1, 1]} : vector<8x32xbf16> to vector<8x8xbf16>
    %cst_38 = arith.constant dense<0.000000e+00> : vector<8x8xf32>
    %59 = tpu.matmul %57, %58, %cst_38 {dimension_numbers = #tpu.dot_dimension_numbers<[1], [1], [0], [0], [0, 0, 1, 0], [], []>} : vector<8x8xbf16>, vector<8x8xbf16>, vector<8x8xf32> -> vector<8x8xf32>
    %cst_39 = arith.constant 0.353553385 : f32
    %60 = vector.broadcast %cst_39 : f32 to vector<8x8xf32>
    %61 = arith.mulf %59, %60 : vector<8x8xf32>
    %cst_40 = arith.constant -1.000000e+09 : f32
    %62 = vector.broadcast %cst_40 : f32 to vector<8x8xf32>
    %63 = arith.select %19, %61, %62 : vector<8x8xi1>, vector<8x8xf32>
    %c1 = arith.constant 1 : index
    %c0_41 = arith.constant 0 : index
    %c0_42 = arith.constant 0 : index
    %64 = vector.load %arg11[%c1, %c0_41, %c0_42] : memref<4x8x1xf32, #tpu.memory_space<vmem>>, vector<1x8x1xf32>
    %65 = vector.shape_cast %64 : vector<1x8x1xf32> to vector<8x1xf32>
    %cst_43 = arith.constant dense<0xFF800000> : vector<8xf32>
    %66 = vector.multi_reduction <maximumf>, %63, %cst_43 [1] : vector<8x8xf32> to vector<8xf32>
    %67 = vector.shape_cast %66 : vector<8xf32> to vector<8x1xf32>
    %68 = arith.maximumf %65, %67 : vector<8x1xf32>
    %69 = arith.subf %65, %68 : vector<8x1xf32>
    %70 = math.exp %69 : vector<8x1xf32>
    %71 = vector.broadcast %68 : vector<8x1xf32> to vector<8x8xf32>
    %72 = arith.subf %63, %71 : vector<8x8xf32>
    %73 = math.exp %72 : vector<8x8xf32>
    %c1_44 = arith.constant 1 : index
    %c0_45 = arith.constant 0 : index
    %c0_46 = arith.constant 0 : index
    %74 = vector.load %arg12[%c1_44, %c0_45, %c0_46] : memref<4x8x1xf32, #tpu.memory_space<vmem>>, vector<1x8x1xf32>
    %75 = vector.shape_cast %74 : vector<1x8x1xf32> to vector<8x1xf32>
    %76 = arith.mulf %70, %75 : vector<8x1xf32>
    %cst_47 = arith.constant dense<0.000000e+00> : vector<8xf32>
    %77 = vector.multi_reduction <add>, %73, %cst_47 [1] : vector<8x8xf32> to vector<8xf32>
    %78 = vector.shape_cast %77 : vector<8xf32> to vector<8x1xf32>
    %79 = arith.addf %76, %78 : vector<8x1xf32>
    %c1_48 = arith.constant 1 : index
    %c0_49 = arith.constant 0 : index
    %c0_50 = arith.constant 0 : index
    %80 = vector.load %arg12[%c1_48, %c0_49, %c0_50] : memref<4x8x1xf32, #tpu.memory_space<vmem>>, vector<1x8x1xf32>
    %81 = vector.shape_cast %80 : vector<1x8x1xf32> to vector<8x1xf32>
    %82 = vector.shape_cast %79 : vector<8x1xf32> to vector<1x8x1xf32>
    tpu.vector_store %arg12[%c1_48, %c0_49, %c0_50], %82 {strides = array<i32>} : memref<4x8x1xf32, #tpu.memory_space<vmem>>, vector<1x8x1xf32>,
    %c0_51 = arith.constant 0 : index
    %c8 = arith.constant 8 : index
    %83 = vector.load %arg13[%c0_51, %c8] : memref<8x32xf32, #tpu.memory_space<vmem>>, vector<8x8xf32>
    %84 = vector.broadcast %70 : vector<8x1xf32> to vector<8x8xf32>
    %85 = arith.mulf %84, %83 : vector<8x8xf32>
    %86 = arith.truncf %73 : vector<8x8xf32> to vector<8x8xbf16>
    %87 = vector.extract_strided_slice %8 {offsets = [0, 8], sizes = [8, 8], strides = [1, 1]} : vector<8x32xbf16> to vector<8x8xbf16>
    %cst_52 = arith.constant dense<0.000000e+00> : vector<8x8xf32>
    %88 = tpu.matmul %86, %87, %cst_52 {dimension_numbers = #tpu.dot_dimension_numbers<[1], [0], [0], [1], [0, 0, 1, 1], [], []>} : vector<8x8xbf16>, vector<8x8xbf16>, vector<8x8xf32> -> vector<8x8xf32>
    %89 = arith.addf %85, %88 : vector<8x8xf32>
    %c0_53 = arith.constant 0 : index
    %c8_54 = arith.constant 8 : index
    %90 = vector.load %arg13[%c0_53, %c8_54] : memref<8x32xf32, #tpu.memory_space<vmem>>, vector<8x8xf32>
    tpu.vector_store %arg13[%c0_53, %c8_54], %89 {strides = array<i32>} : memref<8x32xf32, #tpu.memory_space<vmem>>, vector<8x8xf32>,
    %c1_55 = arith.constant 1 : index
    %c0_56 = arith.constant 0 : index
    %c0_57 = arith.constant 0 : index
    %91 = vector.load %arg11[%c1_55, %c0_56, %c0_57] : memref<4x8x1xf32, #tpu.memory_space<vmem>>, vector<1x8x1xf32>
    %92 = vector.shape_cast %91 : vector<1x8x1xf32> to vector<8x1xf32>
    %93 = vector.shape_cast %68 : vector<8x1xf32> to vector<1x8x1xf32>
    tpu.vector_store %arg11[%c1_55, %c0_56, %c0_57], %93 {strides = array<i32>} : memref<4x8x1xf32, #tpu.memory_space<vmem>>, vector<1x8x1xf32>,
    %94 = vector.extract_strided_slice %4 {offsets = [0, 16], sizes = [8, 8], strides = [1, 1]} : vector<8x32xbf16> to vector<8x8xbf16>
    %95 = vector.extract_strided_slice %6 {offsets = [0, 16], sizes = [8, 8], strides = [1, 1]} : vector<8x32xbf16> to vector<8x8xbf16>
    %cst_58 = arith.constant dense<0.000000e+00> : vector<8x8xf32>
    %96 = tpu.matmul %94, %95, %cst_58 {dimension_numbers = #tpu.dot_dimension_numbers<[1], [1], [0], [0], [0, 0, 1, 0], [], []>} : vector<8x8xbf16>, vector<8x8xbf16>, vector<8x8xf32> -> vector<8x8xf32>
    %cst_59 = arith.constant 0.353553385 : f32
    %97 = vector.broadcast %cst_59 : f32 to vector<8x8xf32>
    %98 = arith.mulf %96, %97 : vector<8x8xf32>
    %cst_60 = arith.constant -1.000000e+09 : f32
    %99 = vector.broadcast %cst_60 : f32 to vector<8x8xf32>
    %100 = arith.select %19, %98, %99 : vector<8x8xi1>, vector<8x8xf32>
    %c2 = arith.constant 2 : index
    %c0_61 = arith.constant 0 : index
    %c0_62 = arith.constant 0 : index
    %101 = vector.load %arg11[%c2, %c0_61, %c0_62] : memref<4x8x1xf32, #tpu.memory_space<vmem>>, vector<1x8x1xf32>
    %102 = vector.shape_cast %101 : vector<1x8x1xf32> to vector<8x1xf32>
    %cst_63 = arith.constant dense<0xFF800000> : vector<8xf32>
    %103 = vector.multi_reduction <maximumf>, %100, %cst_63 [1] : vector<8x8xf32> to vector<8xf32>
    %104 = vector.shape_cast %103 : vector<8xf32> to vector<8x1xf32>
    %105 = arith.maximumf %102, %104 : vector<8x1xf32>
    %106 = arith.subf %102, %105 : vector<8x1xf32>
    %107 = math.exp %106 : vector<8x1xf32>
    %108 = vector.broadcast %105 : vector<8x1xf32> to vector<8x8xf32>
    %109 = arith.subf %100, %108 : vector<8x8xf32>
    %110 = math.exp %109 : vector<8x8xf32>
    %c2_64 = arith.constant 2 : index
    %c0_65 = arith.constant 0 : index
    %c0_66 = arith.constant 0 : index
    %111 = vector.load %arg12[%c2_64, %c0_65, %c0_66] : memref<4x8x1xf32, #tpu.memory_space<vmem>>, vector<1x8x1xf32>
    %112 = vector.shape_cast %111 : vector<1x8x1xf32> to vector<8x1xf32>
    %113 = arith.mulf %107, %112 : vector<8x1xf32>
    %cst_67 = arith.constant dense<0.000000e+00> : vector<8xf32>
    %114 = vector.multi_reduction <add>, %110, %cst_67 [1] : vector<8x8xf32> to vector<8xf32>
    %115 = vector.shape_cast %114 : vector<8xf32> to vector<8x1xf32>
    %116 = arith.addf %113, %115 : vector<8x1xf32>
    %c2_68 = arith.constant 2 : index
    %c0_69 = arith.constant 0 : index
    %c0_70 = arith.constant 0 : index
    %117 = vector.load %arg12[%c2_68, %c0_69, %c0_70] : memref<4x8x1xf32, #tpu.memory_space<vmem>>, vector<1x8x1xf32>
    %118 = vector.shape_cast %117 : vector<1x8x1xf32> to vector<8x1xf32>
    %119 = vector.shape_cast %116 : vector<8x1xf32> to vector<1x8x1xf32>
    tpu.vector_store %arg12[%c2_68, %c0_69, %c0_70], %119 {strides = array<i32>} : memref<4x8x1xf32, #tpu.memory_space<vmem>>, vector<1x8x1xf32>,
    %c0_71 = arith.constant 0 : index
    %c16 = arith.constant 16 : index
    %120 = vector.load %arg13[%c0_71, %c16] : memref<8x32xf32, #tpu.memory_space<vmem>>, vector<8x8xf32>
    %121 = vector.broadcast %107 : vector<8x1xf32> to vector<8x8xf32>
    %122 = arith.mulf %121, %120 : vector<8x8xf32>
    %123 = arith.truncf %110 : vector<8x8xf32> to vector<8x8xbf16>
    %124 = vector.extract_strided_slice %8 {offsets = [0, 16], sizes = [8, 8], strides = [1, 1]} : vector<8x32xbf16> to vector<8x8xbf16>
    %cst_72 = arith.constant dense<0.000000e+00> : vector<8x8xf32>
    %125 = tpu.matmul %123, %124, %cst_72 {dimension_numbers = #tpu.dot_dimension_numbers<[1], [0], [0], [1], [0, 0, 1, 1], [], []>} : vector<8x8xbf16>, vector<8x8xbf16>, vector<8x8xf32> -> vector<8x8xf32>
    %126 = arith.addf %122, %125 : vector<8x8xf32>
    %c0_73 = arith.constant 0 : index
    %c16_74 = arith.constant 16 : index
    %127 = vector.load %arg13[%c0_73, %c16_74] : memref<8x32xf32, #tpu.memory_space<vmem>>, vector<8x8xf32>
    tpu.vector_store %arg13[%c0_73, %c16_74], %126 {strides = array<i32>} : memref<8x32xf32, #tpu.memory_space<vmem>>, vector<8x8xf32>,
    %c2_75 = arith.constant 2 : index
    %c0_76 = arith.constant 0 : index
    %c0_77 = arith.constant 0 : index
    %128 = vector.load %arg11[%c2_75, %c0_76, %c0_77] : memref<4x8x1xf32, #tpu.memory_space<vmem>>, vector<1x8x1xf32>
    %129 = vector.shape_cast %128 : vector<1x8x1xf32> to vector<8x1xf32>
    %130 = vector.shape_cast %105 : vector<8x1xf32> to vector<1x8x1xf32>
    tpu.vector_store %arg11[%c2_75, %c0_76, %c0_77], %130 {strides = array<i32>} : memref<4x8x1xf32, #tpu.memory_space<vmem>>, vector<1x8x1xf32>,
    %131 = vector.extract_strided_slice %4 {offsets = [0, 24], sizes = [8, 8], strides = [1, 1]} : vector<8x32xbf16> to vector<8x8xbf16>
    %132 = vector.extract_strided_slice %6 {offsets = [0, 24], sizes = [8, 8], strides = [1, 1]} : vector<8x32xbf16> to vector<8x8xbf16>
    %cst_78 = arith.constant dense<0.000000e+00> : vector<8x8xf32>
    %133 = tpu.matmul %131, %132, %cst_78 {dimension_numbers = #tpu.dot_dimension_numbers<[1], [1], [0], [0], [0, 0, 1, 0], [], []>} : vector<8x8xbf16>, vector<8x8xbf16>, vector<8x8xf32> -> vector<8x8xf32>
    %cst_79 = arith.constant 0.353553385 : f32
    %134 = vector.broadcast %cst_79 : f32 to vector<8x8xf32>
    %135 = arith.mulf %133, %134 : vector<8x8xf32>
    %cst_80 = arith.constant -1.000000e+09 : f32
    %136 = vector.broadcast %cst_80 : f32 to vector<8x8xf32>
    %137 = arith.select %19, %135, %136 : vector<8x8xi1>, vector<8x8xf32>
    %c3 = arith.constant 3 : index
    %c0_81 = arith.constant 0 : index
    %c0_82 = arith.constant 0 : index
    %138 = vector.load %arg11[%c3, %c0_81, %c0_82] : memref<4x8x1xf32, #tpu.memory_space<vmem>>, vector<1x8x1xf32>
    %139 = vector.shape_cast %138 : vector<1x8x1xf32> to vector<8x1xf32>
    %cst_83 = arith.constant dense<0xFF800000> : vector<8xf32>
    %140 = vector.multi_reduction <maximumf>, %137, %cst_83 [1] : vector<8x8xf32> to vector<8xf32>
    %141 = vector.shape_cast %140 : vector<8xf32> to vector<8x1xf32>
    %142 = arith.maximumf %139, %141 : vector<8x1xf32>
    %143 = arith.subf %139, %142 : vector<8x1xf32>
    %144 = math.exp %143 : vector<8x1xf32>
    %145 = vector.broadcast %142 : vector<8x1xf32> to vector<8x8xf32>
    %146 = arith.subf %137, %145 : vector<8x8xf32>
    %147 = math.exp %146 : vector<8x8xf32>
    %c3_84 = arith.constant 3 : index
    %c0_85 = arith.constant 0 : index
    %c0_86 = arith.constant 0 : index
    %148 = vector.load %arg12[%c3_84, %c0_85, %c0_86] : memref<4x8x1xf32, #tpu.memory_space<vmem>>, vector<1x8x1xf32>
    %149 = vector.shape_cast %148 : vector<1x8x1xf32> to vector<8x1xf32>
    %150 = arith.mulf %144, %149 : vector<8x1xf32>
    %cst_87 = arith.constant dense<0.000000e+00> : vector<8xf32>
    %151 = vector.multi_reduction <add>, %147, %cst_87 [1] : vector<8x8xf32> to vector<8xf32>
    %152 = vector.shape_cast %151 : vector<8xf32> to vector<8x1xf32>
    %153 = arith.addf %150, %152 : vector<8x1xf32>
    %c3_88 = arith.constant 3 : index
    %c0_89 = arith.constant 0 : index
    %c0_90 = arith.constant 0 : index
    %154 = vector.load %arg12[%c3_88, %c0_89, %c0_90] : memref<4x8x1xf32, #tpu.memory_space<vmem>>, vector<1x8x1xf32>
    %155 = vector.shape_cast %154 : vector<1x8x1xf32> to vector<8x1xf32>
    %156 = vector.shape_cast %153 : vector<8x1xf32> to vector<1x8x1xf32>
    tpu.vector_store %arg12[%c3_88, %c0_89, %c0_90], %156 {strides = array<i32>} : memref<4x8x1xf32, #tpu.memory_space<vmem>>, vector<1x8x1xf32>,
    %c0_91 = arith.constant 0 : index
    %c24 = arith.constant 24 : index
    %157 = vector.load %arg13[%c0_91, %c24] : memref<8x32xf32, #tpu.memory_space<vmem>>, vector<8x8xf32>
    %158 = vector.broadcast %144 : vector<8x1xf32> to vector<8x8xf32>
    %159 = arith.mulf %158, %157 : vector<8x8xf32>
    %160 = arith.truncf %147 : vector<8x8xf32> to vector<8x8xbf16>
    %161 = vector.extract_strided_slice %8 {offsets = [0, 24], sizes = [8, 8], strides = [1, 1]} : vector<8x32xbf16> to vector<8x8xbf16>
    %cst_92 = arith.constant dense<0.000000e+00> : vector<8x8xf32>
    %162 = tpu.matmul %160, %161, %cst_92 {dimension_numbers = #tpu.dot_dimension_numbers<[1], [0], [0], [1], [0, 0, 1, 1], [], []>} : vector<8x8xbf16>, vector<8x8xbf16>, vector<8x8xf32> -> vector<8x8xf32>
    %163 = arith.addf %159, %162 : vector<8x8xf32>
    %c0_93 = arith.constant 0 : index
    %c24_94 = arith.constant 24 : index
    %164 = vector.load %arg13[%c0_93, %c24_94] : memref<8x32xf32, #tpu.memory_space<vmem>>, vector<8x8xf32>
    tpu.vector_store %arg13[%c0_93, %c24_94], %163 {strides = array<i32>} : memref<8x32xf32, #tpu.memory_space<vmem>>, vector<8x8xf32>,
    %c3_95 = arith.constant 3 : index
    %c0_96 = arith.constant 0 : index
    %c0_97 = arith.constant 0 : index
    %165 = vector.load %arg11[%c3_95, %c0_96, %c0_97] : memref<4x8x1xf32, #tpu.memory_space<vmem>>, vector<1x8x1xf32>
    %166 = vector.shape_cast %165 : vector<1x8x1xf32> to vector<8x1xf32>
    %167 = vector.shape_cast %142 : vector<8x1xf32> to vector<1x8x1xf32>
    tpu.vector_store %arg11[%c3_95, %c0_96, %c0_97], %167 {strides = array<i32>} : memref<4x8x1xf32, #tpu.memory_space<vmem>>, vector<1x8x1xf32>,
    %c0_i32_98 = arith.constant 0 : i32
    %168 = arith.cmpi eq, %arg2, %c0_i32_98 : i32
    %169 = arith.extui %168 : i1 to i32
    %c0_i32_99 = arith.constant 0 : i32
    %170 = arith.cmpi ne, %169, %c0_i32_99 : i32
    scf.if %170 {
      %c0_100 = arith.constant 0 : index
      %c0_101 = arith.constant 0 : index
      %171 = vector.load %arg13[%c0_100, %c0_101] : memref<8x32xf32, #tpu.memory_space<vmem>>, vector<8x8xf32>
      %c0_102 = arith.constant 0 : index
      %c0_103 = arith.constant 0 : index
      %c0_104 = arith.constant 0 : index
      %172 = vector.load %arg12[%c0_102, %c0_103, %c0_104] : memref<4x8x1xf32, #tpu.memory_space<vmem>>, vector<1x8x1xf32>
      %173 = vector.shape_cast %172 : vector<1x8x1xf32> to vector<8x1xf32>
      %174 = vector.broadcast %173 : vector<8x1xf32> to vector<8x8xf32>
      %175 = arith.divf %171, %174 : vector<8x8xf32>
      %c0_105 = arith.constant 0 : index
      %c0_106 = arith.constant 0 : index
      %176 = vector.load %arg13[%c0_105, %c0_106] : memref<8x32xf32, #tpu.memory_space<vmem>>, vector<8x8xf32>
      tpu.vector_store %arg13[%c0_105, %c0_106], %175 {strides = array<i32>} : memref<8x32xf32, #tpu.memory_space<vmem>>, vector<8x8xf32>,
      %c0_107 = arith.constant 0 : index
      %c8_108 = arith.constant 8 : index
      %177 = vector.load %arg13[%c0_107, %c8_108] : memref<8x32xf32, #tpu.memory_space<vmem>>, vector<8x8xf32>
      %c1_109 = arith.constant 1 : index
      %c0_110 = arith.constant 0 : index
      %c0_111 = arith.constant 0 : index
      %178 = vector.load %arg12[%c1_109, %c0_110, %c0_111] : memref<4x8x1xf32, #tpu.memory_space<vmem>>, vector<1x8x1xf32>
      %179 = vector.shape_cast %178 : vector<1x8x1xf32> to vector<8x1xf32>
      %180 = vector.broadcast %179 : vector<8x1xf32> to vector<8x8xf32>
      %181 = arith.divf %177, %180 : vector<8x8xf32>
      %c0_112 = arith.constant 0 : index
      %c8_113 = arith.constant 8 : index
      %182 = vector.load %arg13[%c0_112, %c8_113] : memref<8x32xf32, #tpu.memory_space<vmem>>, vector<8x8xf32>
      tpu.vector_store %arg13[%c0_112, %c8_113], %181 {strides = array<i32>} : memref<8x32xf32, #tpu.memory_space<vmem>>, vector<8x8xf32>,
      %c0_114 = arith.constant 0 : index
      %c16_115 = arith.constant 16 : index
      %183 = vector.load %arg13[%c0_114, %c16_115] : memref<8x32xf32, #tpu.memory_space<vmem>>, vector<8x8xf32>
      %c2_116 = arith.constant 2 : index
      %c0_117 = arith.constant 0 : index
      %c0_118 = arith.constant 0 : index
      %184 = vector.load %arg12[%c2_116, %c0_117, %c0_118] : memref<4x8x1xf32, #tpu.memory_space<vmem>>, vector<1x8x1xf32>
      %185 = vector.shape_cast %184 : vector<1x8x1xf32> to vector<8x1xf32>
      %186 = vector.broadcast %185 : vector<8x1xf32> to vector<8x8xf32>
      %187 = arith.divf %183, %186 : vector<8x8xf32>
      %c0_119 = arith.constant 0 : index
      %c16_120 = arith.constant 16 : index
      %188 = vector.load %arg13[%c0_119, %c16_120] : memref<8x32xf32, #tpu.memory_space<vmem>>, vector<8x8xf32>
      tpu.vector_store %arg13[%c0_119, %c16_120], %187 {strides = array<i32>} : memref<8x32xf32, #tpu.memory_space<vmem>>, vector<8x8xf32>,
      %c0_121 = arith.constant 0 : index
      %c24_122 = arith.constant 24 : index
      %189 = vector.load %arg13[%c0_121, %c24_122] : memref<8x32xf32, #tpu.memory_space<vmem>>, vector<8x8xf32>
      %c3_123 = arith.constant 3 : index
      %c0_124 = arith.constant 0 : index
      %c0_125 = arith.constant 0 : index
      %190 = vector.load %arg12[%c3_123, %c0_124, %c0_125] : memref<4x8x1xf32, #tpu.memory_space<vmem>>, vector<1x8x1xf32>
      %191 = vector.shape_cast %190 : vector<1x8x1xf32> to vector<8x1xf32>
      %192 = vector.broadcast %191 : vector<8x1xf32> to vector<8x8xf32>
      %193 = arith.divf %189, %192 : vector<8x8xf32>
      %c0_126 = arith.constant 0 : index
      %c24_127 = arith.constant 24 : index
      %194 = vector.load %arg13[%c0_126, %c24_127] : memref<8x32xf32, #tpu.memory_space<vmem>>, vector<8x8xf32>
      tpu.vector_store %arg13[%c0_126, %c24_127], %193 {strides = array<i32>} : memref<8x32xf32, #tpu.memory_space<vmem>>, vector<8x8xf32>,
      %c0_128 = arith.constant 0 : index
      %c0_129 = arith.constant 0 : index
      %195 = vector.load %arg13[%c0_128, %c0_129] : memref<8x32xf32, #tpu.memory_space<vmem>>, vector<8x32xf32>
      %196 = arith.truncf %195 : vector<8x32xf32> to vector<8x32xbf16>
      %c0_130 = arith.constant 0 : index
      %c0_131 = arith.constant 0 : index
      %197 = vector.load %arg8[%c0_130, %c0_131] : memref<32x32xbf16, #tpu.memory_space<vmem>>, vector<32x32xbf16>
      %cst_132 = arith.constant dense<0.000000e+00> : vector<8x32xf32>
      %198 = tpu.matmul %196, %197, %cst_132 {dimension_numbers = #tpu.dot_dimension_numbers<[1], [0], [0], [1], [0, 0, 1, 1], [], []>} : vector<8x32xbf16>, vector<32x32xbf16>, vector<8x32xf32> -> vector<8x32xf32>
      %c0_133 = arith.constant 0 : index
      %c0_134 = arith.constant 0 : index
      %199 = vector.load %arg9[%c0_133, %c0_134] : memref<1x32xf32, #tpu.memory_space<vmem>>, vector<1x32xf32>
      %200 = vector.broadcast %199 : vector<1x32xf32> to vector<8x32xf32>
      %201 = arith.addf %198, %200 : vector<8x32xf32>
      %202 = arith.truncf %201 : vector<8x32xf32> to vector<8x32xbf16>
      %c0_135 = arith.constant 0 : index
      %c0_136 = arith.constant 0 : index
      %c0_137 = arith.constant 0 : index
      %203 = vector.load %arg10[%c0_135, %c0_136, %c0_137] : memref<1x8x32xbf16, #tpu.memory_space<vmem>>, vector<1x8x32xbf16>
      %204 = vector.shape_cast %203 : vector<1x8x32xbf16> to vector<8x32xbf16>
      %205 = vector.shape_cast %202 : vector<8x32xbf16> to vector<1x8x32xbf16>
      tpu.vector_store %arg10[%c0_135, %c0_136, %c0_137], %205 {strides = array<i32>} : memref<1x8x32xbf16, #tpu.memory_space<vmem>>, vector<1x8x32xbf16>,
    } else {
    }
    return
  }
  func.func @transform_0(%arg0: i32, %arg1: i32, %arg2: i32) -> (i32, i32, i32) {
    %c0_i32 = arith.constant 0 : i32
    %c0_i32_0 = arith.constant 0 : i32
    return %arg0, %arg1, %c0_i32 : i32, i32, i32
  }
  func.func @transform_1(%arg0: i32, %arg1: i32, %arg2: i32) -> (i32, i32, i32) {
    %c0_i32 = arith.constant 0 : i32
    %c0_i32_0 = arith.constant 0 : i32
    return %arg0, %arg2, %c0_i32 : i32, i32, i32
  }
  func.func @transform_2(%arg0: i32, %arg1: i32, %arg2: i32) -> (i32, i32, i32) {
    %c0_i32 = arith.constant 0 : i32
    %c0_i32_0 = arith.constant 0 : i32
    return %arg0, %arg2, %c0_i32 : i32, i32, i32
  }
  func.func @transform_3(%arg0: i32, %arg1: i32, %arg2: i32) -> (i32, i32, i32) {
    %c0_i32 = arith.constant 0 : i32
    %c0_i32_0 = arith.constant 0 : i32
    return %arg0, %arg1, %c0_i32 : i32, i32, i32
  }
  func.func @transform_4(%arg0: i32, %arg1: i32, %arg2: i32) -> (i32, i32, i32) {
    %c0_i32 = arith.constant 0 : i32
    %c0_i32_0 = arith.constant 0 : i32
    return %arg0, %c0_i32, %arg2 : i32, i32, i32
  }
  func.func @transform_5(%arg0: i32, %arg1: i32, %arg2: i32) -> (i32, i32) {
    %c0_i32 = arith.constant 0 : i32
    %c0_i32_0 = arith.constant 0 : i32
    %c0_i32_1 = arith.constant 0 : i32
    return %c0_i32, %c0_i32_0 : i32, i32
  }
  func.func @transform_6(%arg0: i32, %arg1: i32, %arg2: i32) -> (i32, i32) {
    %c0_i32 = arith.constant 0 : i32
    %c0_i32_0 = arith.constant 0 : i32
    %c0_i32_1 = arith.constant 0 : i32
    return %c0_i32, %c0_i32_0 : i32, i32
  }
  func.func @transform_7(%arg0: i32, %arg1: i32, %arg2: i32) -> (i32, i32, i32) {
    %c0_i32 = arith.constant 0 : i32
    %c0_i32_0 = arith.constant 0 : i32
    return %arg0, %arg1, %c0_i32 : i32, i32, i32
  }
}

module attributes {stable_mosaic.version = 11 : i64} {
  func.func @_add_layernorm_kernel(%arg0: i32, %arg1: memref<16x32xbf16, #tpu.memory_space<vmem>>, %arg2: memref<16x32xbf16, #tpu.memory_space<vmem>>, %arg3: memref<1x32xf32, #tpu.memory_space<vmem>>, %arg4: memref<1x32xf32, #tpu.memory_space<vmem>>, %arg5: memref<16x32xbf16, #tpu.memory_space<vmem>>) attributes {dimension_semantics = [#tpu.dimension_semantics<parallel>], iteration_bounds = array<i64: 1>, scalar_prefetch = 0 : i64, scratch_operands = 0 : i64, tpu.core_type = #tpu.core_type<tc>, window_params = [{transform_indices = @transform_0, window_bounds = array<i64: 16, 32>}, {transform_indices = @transform_1, window_bounds = array<i64: 16, 32>}, {pipeline_mode = #tpu.pipeline_mode<synchronous>, transform_indices = @transform_2, window_bounds = array<i64: 1, 32>}, {pipeline_mode = #tpu.pipeline_mode<synchronous>, transform_indices = @transform_3, window_bounds = array<i64: 1, 32>}, {transform_indices = @transform_4, window_bounds = array<i64: 16, 32>}]} {
    %c0 = arith.constant 0 : index
    %c0_0 = arith.constant 0 : index
    %0 = vector.load %arg1[%c0, %c0_0] : memref<16x32xbf16, #tpu.memory_space<vmem>>, vector<16x32xbf16>
    %1 = arith.extf %0 : vector<16x32xbf16> to vector<16x32xf32>
    %c0_1 = arith.constant 0 : index
    %c0_2 = arith.constant 0 : index
    %2 = vector.load %arg2[%c0_1, %c0_2] : memref<16x32xbf16, #tpu.memory_space<vmem>>, vector<16x32xbf16>
    %3 = arith.extf %2 : vector<16x32xbf16> to vector<16x32xf32>
    %4 = arith.addf %1, %3 : vector<16x32xf32>
    %cst = arith.constant dense<0.000000e+00> : vector<16xf32>
    %5 = vector.multi_reduction <add>, %4, %cst [1] : vector<16x32xf32> to vector<16xf32>
    %6 = vector.shape_cast %5 : vector<16xf32> to vector<16x1xf32>
    %cst_3 = arith.constant 3.200000e+01 : f32
    %7 = vector.broadcast %cst_3 : f32 to vector<16x1xf32>
    %8 = arith.divf %6, %7 : vector<16x1xf32>
    %9 = vector.broadcast %8 : vector<16x1xf32> to vector<16x32xf32>
    %10 = arith.subf %4, %9 : vector<16x32xf32>
    %11 = arith.mulf %10, %10 : vector<16x32xf32>
    %cst_4 = arith.constant dense<0.000000e+00> : vector<16xf32>
    %12 = vector.multi_reduction <add>, %11, %cst_4 [1] : vector<16x32xf32> to vector<16xf32>
    %13 = vector.shape_cast %12 : vector<16xf32> to vector<16x1xf32>
    %cst_5 = arith.constant 3.200000e+01 : f32
    %14 = vector.broadcast %cst_5 : f32 to vector<16x1xf32>
    %15 = arith.divf %13, %14 : vector<16x1xf32>
    %16 = vector.broadcast %8 : vector<16x1xf32> to vector<16x32xf32>
    %17 = arith.subf %4, %16 : vector<16x32xf32>
    %cst_6 = arith.constant 9.99999996E-13 : f32
    %18 = vector.broadcast %cst_6 : f32 to vector<16x1xf32>
    %19 = arith.addf %15, %18 : vector<16x1xf32>
    %20 = math.rsqrt %19 : vector<16x1xf32>
    %21 = vector.broadcast %20 : vector<16x1xf32> to vector<16x32xf32>
    %22 = arith.mulf %17, %21 : vector<16x32xf32>
    %c0_7 = arith.constant 0 : index
    %c0_8 = arith.constant 0 : index
    %23 = vector.load %arg3[%c0_7, %c0_8] : memref<1x32xf32, #tpu.memory_space<vmem>>, vector<1x32xf32>
    %24 = vector.broadcast %23 : vector<1x32xf32> to vector<16x32xf32>
    %25 = arith.mulf %22, %24 : vector<16x32xf32>
    %c0_9 = arith.constant 0 : index
    %c0_10 = arith.constant 0 : index
    %26 = vector.load %arg4[%c0_9, %c0_10] : memref<1x32xf32, #tpu.memory_space<vmem>>, vector<1x32xf32>
    %27 = vector.broadcast %26 : vector<1x32xf32> to vector<16x32xf32>
    %28 = arith.addf %25, %27 : vector<16x32xf32>
    %29 = arith.truncf %28 : vector<16x32xf32> to vector<16x32xbf16>
    %c0_11 = arith.constant 0 : index
    %c0_12 = arith.constant 0 : index
    %30 = vector.load %arg5[%c0_11, %c0_12] : memref<16x32xbf16, #tpu.memory_space<vmem>>, vector<16x32xbf16>
    tpu.vector_store %arg5[%c0_11, %c0_12], %29 {strides = array<i32>} : memref<16x32xbf16, #tpu.memory_space<vmem>>, vector<16x32xbf16>,
    return
  }
  func.func @transform_0(%arg0: i32) -> (i32, i32) {
    %c0_i32 = arith.constant 0 : i32
    %c0_i32_0 = arith.constant 0 : i32
    return %arg0, %c0_i32 : i32, i32
  }
  func.func @transform_1(%arg0: i32) -> (i32, i32) {
    %c0_i32 = arith.constant 0 : i32
    %c0_i32_0 = arith.constant 0 : i32
    return %arg0, %c0_i32 : i32, i32
  }
  func.func @transform_2(%arg0: i32) -> (i32, i32) {
    %c0_i32 = arith.constant 0 : i32
    %c0_i32_0 = arith.constant 0 : i32
    %c0_i32_1 = arith.constant 0 : i32
    return %c0_i32, %c0_i32_0 : i32, i32
  }
  func.func @transform_3(%arg0: i32) -> (i32, i32) {
    %c0_i32 = arith.constant 0 : i32
    %c0_i32_0 = arith.constant 0 : i32
    %c0_i32_1 = arith.constant 0 : i32
    return %c0_i32, %c0_i32_0 : i32, i32
  }
  func.func @transform_4(%arg0: i32) -> (i32, i32) {
    %c0_i32 = arith.constant 0 : i32
    %c0_i32_0 = arith.constant 0 : i32
    return %arg0, %c0_i32 : i32, i32
  }
}

module attributes {stable_mosaic.version = 11 : i64} {
  func.func @_ffn_kernel(%arg0: i32, %arg1: memref<16x32xbf16, #tpu.memory_space<vmem>>, %arg2: memref<32x64xbf16, #tpu.memory_space<vmem>>, %arg3: memref<1x64xf32, #tpu.memory_space<vmem>>, %arg4: memref<64x32xbf16, #tpu.memory_space<vmem>>, %arg5: memref<1x32xf32, #tpu.memory_space<vmem>>, %arg6: memref<16x32xbf16, #tpu.memory_space<vmem>>) attributes {dimension_semantics = [#tpu.dimension_semantics<parallel>], iteration_bounds = array<i64: 1>, scalar_prefetch = 0 : i64, scratch_operands = 0 : i64, tpu.core_type = #tpu.core_type<tc>, window_params = [{transform_indices = @transform_0, window_bounds = array<i64: 16, 32>}, {pipeline_mode = #tpu.pipeline_mode<synchronous>, transform_indices = @transform_1, window_bounds = array<i64: 32, 64>}, {pipeline_mode = #tpu.pipeline_mode<synchronous>, transform_indices = @transform_2, window_bounds = array<i64: 1, 64>}, {pipeline_mode = #tpu.pipeline_mode<synchronous>, transform_indices = @transform_3, window_bounds = array<i64: 64, 32>}, {pipeline_mode = #tpu.pipeline_mode<synchronous>, transform_indices = @transform_4, window_bounds = array<i64: 1, 32>}, {transform_indices = @transform_5, window_bounds = array<i64: 16, 32>}]} {
    %c0 = arith.constant 0 : index
    %c0_0 = arith.constant 0 : index
    %0 = vector.load %arg1[%c0, %c0_0] : memref<16x32xbf16, #tpu.memory_space<vmem>>, vector<16x32xbf16>
    %c0_1 = arith.constant 0 : index
    %c0_2 = arith.constant 0 : index
    %1 = vector.load %arg2[%c0_1, %c0_2] : memref<32x64xbf16, #tpu.memory_space<vmem>>, vector<32x64xbf16>
    %cst = arith.constant dense<0.000000e+00> : vector<16x64xf32>
    %2 = tpu.matmul %0, %1, %cst {dimension_numbers = #tpu.dot_dimension_numbers<[1], [0], [0], [1], [0, 0, 1, 1], [], []>} : vector<16x32xbf16>, vector<32x64xbf16>, vector<16x64xf32> -> vector<16x64xf32>
    %c0_3 = arith.constant 0 : index
    %c0_4 = arith.constant 0 : index
    %3 = vector.load %arg3[%c0_3, %c0_4] : memref<1x64xf32, #tpu.memory_space<vmem>>, vector<1x64xf32>
    %4 = vector.broadcast %3 : vector<1x64xf32> to vector<16x64xf32>
    %5 = arith.addf %2, %4 : vector<16x64xf32>
    %cst_5 = arith.constant 0.000000e+00 : f32
    %6 = vector.broadcast %cst_5 : f32 to vector<16x64xf32>
    %7 = arith.maximumf %5, %6 : vector<16x64xf32>
    %8 = arith.truncf %7 : vector<16x64xf32> to vector<16x64xbf16>
    %c0_6 = arith.constant 0 : index
    %c0_7 = arith.constant 0 : index
    %9 = vector.load %arg4[%c0_6, %c0_7] : memref<64x32xbf16, #tpu.memory_space<vmem>>, vector<64x32xbf16>
    %cst_8 = arith.constant dense<0.000000e+00> : vector<16x32xf32>
    %10 = tpu.matmul %8, %9, %cst_8 {dimension_numbers = #tpu.dot_dimension_numbers<[1], [0], [0], [1], [0, 0, 1, 1], [], []>} : vector<16x64xbf16>, vector<64x32xbf16>, vector<16x32xf32> -> vector<16x32xf32>
    %c0_9 = arith.constant 0 : index
    %c0_10 = arith.constant 0 : index
    %11 = vector.load %arg5[%c0_9, %c0_10] : memref<1x32xf32, #tpu.memory_space<vmem>>, vector<1x32xf32>
    %12 = vector.broadcast %11 : vector<1x32xf32> to vector<16x32xf32>
    %13 = arith.addf %10, %12 : vector<16x32xf32>
    %14 = arith.truncf %13 : vector<16x32xf32> to vector<16x32xbf16>
    %c0_11 = arith.constant 0 : index
    %c0_12 = arith.constant 0 : index
    %15 = vector.load %arg6[%c0_11, %c0_12] : memref<16x32xbf16, #tpu.memory_space<vmem>>, vector<16x32xbf16>
    tpu.vector_store %arg6[%c0_11, %c0_12], %14 {strides = array<i32>} : memref<16x32xbf16, #tpu.memory_space<vmem>>, vector<16x32xbf16>,
    return
  }
  func.func @transform_0(%arg0: i32) -> (i32, i32) {
    %c0_i32 = arith.constant 0 : i32
    %c0_i32_0 = arith.constant 0 : i32
    return %arg0, %c0_i32 : i32, i32
  }
  func.func @transform_1(%arg0: i32) -> (i32, i32) {
    %c0_i32 = arith.constant 0 : i32
    %c0_i32_0 = arith.constant 0 : i32
    %c0_i32_1 = arith.constant 0 : i32
    return %c0_i32, %c0_i32_0 : i32, i32
  }
  func.func @transform_2(%arg0: i32) -> (i32, i32) {
    %c0_i32 = arith.constant 0 : i32
    %c0_i32_0 = arith.constant 0 : i32
    %c0_i32_1 = arith.constant 0 : i32
    return %c0_i32, %c0_i32_0 : i32, i32
  }
  func.func @transform_3(%arg0: i32) -> (i32, i32) {
    %c0_i32 = arith.constant 0 : i32
    %c0_i32_0 = arith.constant 0 : i32
    %c0_i32_1 = arith.constant 0 : i32
    return %c0_i32, %c0_i32_0 : i32, i32
  }
  func.func @transform_4(%arg0: i32) -> (i32, i32) {
    %c0_i32 = arith.constant 0 : i32
    %c0_i32_0 = arith.constant 0 : i32
    %c0_i32_1 = arith.constant 0 : i32
    return %c0_i32, %c0_i32_0 : i32, i32
  }
  func.func @transform_5(%arg0: i32) -> (i32, i32) {
    %c0_i32 = arith.constant 0 : i32
    %c0_i32_0 = arith.constant 0 : i32
    return %arg0, %c0_i32 : i32, i32
  }
}

module attributes {stable_mosaic.version = 11 : i64} {
  func.func @kernel(%arg0: i32, %arg1: memref<16x32xbf16, #tpu.memory_space<vmem>>, %arg2: memref<32x64xbf16, #tpu.memory_space<vmem>>, %arg3: memref<1x64xf32, #tpu.memory_space<vmem>>, %arg4: memref<16x32xbf16, #tpu.memory_space<vmem>>, %arg5: memref<16x32xbf16, #tpu.memory_space<vmem>>) attributes {dimension_semantics = [#tpu.dimension_semantics<parallel>], iteration_bounds = array<i64: 1>, scalar_prefetch = 0 : i64, scratch_operands = 0 : i64, tpu.core_type = #tpu.core_type<tc>, window_params = [{transform_indices = @transform_0, window_bounds = array<i64: 16, 32>}, {pipeline_mode = #tpu.pipeline_mode<synchronous>, transform_indices = @transform_1, window_bounds = array<i64: 32, 64>}, {pipeline_mode = #tpu.pipeline_mode<synchronous>, transform_indices = @transform_2, window_bounds = array<i64: 1, 64>}, {transform_indices = @transform_3, window_bounds = array<i64: 16, 32>}, {transform_indices = @transform_4, window_bounds = array<i64: 16, 32>}]} {
    %c0 = arith.constant 0 : index
    %c0_0 = arith.constant 0 : index
    %0 = vector.load %arg1[%c0, %c0_0] : memref<16x32xbf16, #tpu.memory_space<vmem>>, vector<16x32xbf16>
    %c0_1 = arith.constant 0 : index
    %c0_2 = arith.constant 0 : index
    %1 = vector.load %arg2[%c0_1, %c0_2] : memref<32x64xbf16, #tpu.memory_space<vmem>>, vector<32x64xbf16>
    %cst = arith.constant dense<0.000000e+00> : vector<16x64xf32>
    %2 = tpu.matmul %0, %1, %cst {dimension_numbers = #tpu.dot_dimension_numbers<[1], [0], [0], [1], [0, 0, 1, 1], [], []>} : vector<16x32xbf16>, vector<32x64xbf16>, vector<16x64xf32> -> vector<16x64xf32>
    %c0_3 = arith.constant 0 : index
    %c0_4 = arith.constant 0 : index
    %3 = vector.load %arg3[%c0_3, %c0_4] : memref<1x64xf32, #tpu.memory_space<vmem>>, vector<1x64xf32>
    %4 = vector.broadcast %3 : vector<1x64xf32> to vector<16x64xf32>
    %5 = arith.addf %2, %4 : vector<16x64xf32>
    %6 = vector.extract_strided_slice %5 {offsets = [0, 0], sizes = [16, 32], strides = [1, 1]} : vector<16x64xf32> to vector<16x32xf32>
    %7 = arith.truncf %6 : vector<16x32xf32> to vector<16x32xbf16>
    %c0_5 = arith.constant 0 : index
    %c0_6 = arith.constant 0 : index
    %8 = vector.load %arg4[%c0_5, %c0_6] : memref<16x32xbf16, #tpu.memory_space<vmem>>, vector<16x32xbf16>
    tpu.vector_store %arg4[%c0_5, %c0_6], %7 {strides = array<i32>} : memref<16x32xbf16, #tpu.memory_space<vmem>>, vector<16x32xbf16>,
    %9 = vector.extract_strided_slice %5 {offsets = [0, 32], sizes = [16, 32], strides = [1, 1]} : vector<16x64xf32> to vector<16x32xf32>
    %10 = arith.truncf %9 : vector<16x32xf32> to vector<16x32xbf16>
    %c0_7 = arith.constant 0 : index
    %c0_8 = arith.constant 0 : index
    %11 = vector.load %arg5[%c0_7, %c0_8] : memref<16x32xbf16, #tpu.memory_space<vmem>>, vector<16x32xbf16>
    tpu.vector_store %arg5[%c0_7, %c0_8], %10 {strides = array<i32>} : memref<16x32xbf16, #tpu.memory_space<vmem>>, vector<16x32xbf16>,
    return
  }
  func.func @transform_0(%arg0: i32) -> (i32, i32) {
    %c0_i32 = arith.constant 0 : i32
    %c0_i32_0 = arith.constant 0 : i32
    return %arg0, %c0_i32 : i32, i32
  }
  func.func @transform_1(%arg0: i32) -> (i32, i32) {
    %c0_i32 = arith.constant 0 : i32
    %c0_i32_0 = arith.constant 0 : i32
    %c0_i32_1 = arith.constant 0 : i32
    return %c0_i32, %c0_i32_0 : i32, i32
  }
  func.func @transform_2(%arg0: i32) -> (i32, i32) {
    %c0_i32 = arith.constant 0 : i32
    %c0_i32_0 = arith.constant 0 : i32
    %c0_i32_1 = arith.constant 0 : i32
    return %c0_i32, %c0_i32_0 : i32, i32
  }
  func.func @transform_3(%arg0: i32) -> (i32, i32) {
    %c0_i32 = arith.constant 0 : i32
    %c0_i32_0 = arith.constant 0 : i32
    return %arg0, %c0_i32 : i32, i32
  }
  func.func @transform_4(%arg0: i32) -> (i32, i32) {
    %c0_i32 = arith.constant 0 : i32
    %c0_i32_0 = arith.constant 0 : i32
    return %arg0, %c0_i32 : i32, i32
  }
}

module attributes {stable_mosaic.version = 11 : i64} {
  func.func @_flash_mha_kernel(%arg0: i32, %arg1: i32, %arg2: i32, %arg3: memref<1x8x32xbf16, #tpu.memory_space<vmem>>, %arg4: memref<1x8x32xbf16, #tpu.memory_space<vmem>>, %arg5: memref<1x8x32xbf16, #tpu.memory_space<vmem>>, %arg6: memref<1x8x1xf32, #tpu.memory_space<vmem>>, %arg7: memref<1x1x8xf32, #tpu.memory_space<vmem>>, %arg8: memref<32x32xbf16, #tpu.memory_space<vmem>>, %arg9: memref<1x32xf32, #tpu.memory_space<vmem>>, %arg10: memref<1x8x32xbf16, #tpu.memory_space<vmem>>, %arg11: memref<4x8x1xf32, #tpu.memory_space<vmem>>, %arg12: memref<4x8x1xf32, #tpu.memory_space<vmem>>, %arg13: memref<8x32xf32, #tpu.memory_space<vmem>>) attributes {dimension_semantics = [#tpu.dimension_semantics<parallel>, #tpu.dimension_semantics<parallel>, #tpu.dimension_semantics<arbitrary>], iteration_bounds = array<i64: 2, 1, 1>, scalar_prefetch = 0 : i64, scratch_operands = 3 : i64, tpu.core_type = #tpu.core_type<tc>, window_params = [{transform_indices = @transform_0, window_bounds = array<i64: 1, 8, 32>}, {transform_indices = @transform_1, window_bounds = array<i64: 1, 8, 32>}, {transform_indices = @transform_2, window_bounds = array<i64: 1, 8, 32>}, {transform_indices = @transform_3, window_bounds = array<i64: 1, 8, 1>}, {transform_indices = @transform_4, window_bounds = array<i64: 1, 1, 8>}, {pipeline_mode = #tpu.pipeline_mode<synchronous>, transform_indices = @transform_5, window_bounds = array<i64: 32, 32>}, {pipeline_mode = #tpu.pipeline_mode<synchronous>, transform_indices = @transform_6, window_bounds = array<i64: 1, 32>}, {transform_indices = @transform_7, window_bounds = array<i64: 1, 8, 32>}]} {
    %c0_i32 = arith.constant 0 : i32
    %0 = arith.cmpi eq, %arg2, %c0_i32 : i32
    %1 = arith.extui %0 : i1 to i32
    %c0_i32_0 = arith.constant 0 : i32
    %2 = arith.cmpi ne, %1, %c0_i32_0 : i32
    scf.if %2 {
      %cst_101 = arith.constant 0xFF800000 : f32
      %181 = vector.broadcast %cst_101 : f32 to vector<4x8x1xf32>
      %c0_102 = arith.constant 0 : index
      %c0_103 = arith.constant 0 : index
      %c0_104 = arith.constant 0 : index
      %182 = vector.load %arg11[%c0_102, %c0_103, %c0_104] : memref<4x8x1xf32, #tpu.memory_space<vmem>>, vector<4x8x1xf32>
      tpu.vector_store %arg11[%c0_102, %c0_103, %c0_104], %181 {strides = array<i32>} : memref<4x8x1xf32, #tpu.memory_space<vmem>>, vector<4x8x1xf32>,
      %cst_105 = arith.constant 0.000000e+00 : f32
      %183 = vector.broadcast %cst_105 : f32 to vector<4x8x1xf32>
      %c0_106 = arith.constant 0 : index
      %c0_107 = arith.constant 0 : index
      %c0_108 = arith.constant 0 : index
      %184 = vector.load %arg12[%c0_106, %c0_107, %c0_108] : memref<4x8x1xf32, #tpu.memory_space<vmem>>, vector<4x8x1xf32>
      tpu.vector_store %arg12[%c0_106, %c0_107, %c0_108], %183 {strides = array<i32>} : memref<4x8x1xf32, #tpu.memory_space<vmem>>, vector<4x8x1xf32>,
      %cst_109 = arith.constant 0.000000e+00 : f32
      %185 = vector.broadcast %cst_109 : f32 to vector<8x32xf32>
      %c0_110 = arith.constant 0 : index
      %c0_111 = arith.constant 0 : index
      %186 = vector.load %arg13[%c0_110, %c0_111] : memref<8x32xf32, #tpu.memory_space<vmem>>, vector<8x32xf32>
      tpu.vector_store %arg13[%c0_110, %c0_111], %185 {strides = array<i32>} : memref<8x32xf32, #tpu.memory_space<vmem>>, vector<8x32xf32>,
    } else {
    }
    %c0 = arith.constant 0 : index
    %c0_1 = arith.constant 0 : index
    %c0_2 = arith.constant 0 : index
    %3 = vector.load %arg3[%c0, %c0_1, %c0_2] : memref<1x8x32xbf16, #tpu.memory_space<vmem>>, vector<1x8x32xbf16>
    %4 = vector.shape_cast %3 : vector<1x8x32xbf16> to vector<8x32xbf16>
    %c0_3 = arith.constant 0 : index
    %c0_4 = arith.constant 0 : index
    %c0_5 = arith.constant 0 : index
    %5 = vector.load %arg4[%c0_3, %c0_4, %c0_5] : memref<1x8x32xbf16, #tpu.memory_space<vmem>>, vector<1x8x32xbf16>
    %6 = vector.shape_cast %5 : vector<1x8x32xbf16> to vector<8x32xbf16>
    %c0_6 = arith.constant 0 : index
    %c0_7 = arith.constant 0 : index
    %c0_8 = arith.constant 0 : index
    %7 = vector.load %arg5[%c0_6, %c0_7, %c0_8] : memref<1x8x32xbf16, #tpu.memory_space<vmem>>, vector<1x8x32xbf16>
    %8 = vector.shape_cast %7 : vector<1x8x32xbf16> to vector<8x32xbf16>
    %c0_9 = arith.constant 0 : index
    %c0_10 = arith.constant 0 : index
    %c0_11 = arith.constant 0 : index
    %9 = vector.load %arg6[%c0_9, %c0_10, %c0_11] : memref<1x8x1xf32, #tpu.memory_space<vmem>>, vector<1x8x1xf32>
    %10 = vector.shape_cast %9 : vector<1x8x1xf32> to vector<8x1xf32>
    %cst = arith.constant 5.000000e-01 : f32
    %11 = vector.broadcast %cst : f32 to vector<8x1xf32>
    %12 = arith.cmpf ogt, %10, %11 : vector<8x1xf32>
    %c0_12 = arith.constant 0 : index
    %c0_13 = arith.constant 0 : index
    %c0_14 = arith.constant 0 : index
    %13 = vector.load %arg7[%c0_12, %c0_13, %c0_14] : memref<1x1x8xf32, #tpu.memory_space<vmem>>, vector<1x1x8xf32>
    %14 = vector.shape_cast %13 : vector<1x1x8xf32> to vector<1x8xf32>
    %cst_15 = arith.constant 5.000000e-01 : f32
    %15 = vector.broadcast %cst_15 : f32 to vector<1x8xf32>
    %16 = arith.cmpf ogt, %14, %15 : vector<1x8xf32>
    %17 = vector.broadcast %12 : vector<8x1xi1> to vector<8x8xi1>
    %18 = vector.broadcast %16 : vector<1x8xi1> to vector<8x8xi1>
    %19 = arith.andi %17, %18 : vector<8x8xi1>
    %c8_i32 = arith.constant 8 : i32
    %20 = arith.muli %arg1, %c8_i32 : i32
    %21 = tpu.iota {dimensions = array<i32: 0>} : vector<8x8xi32>
    %22 = vector.broadcast %20 : i32 to vector<8x8xi32>
    %23 = arith.addi %22, %21 : vector<8x8xi32>
    %c8_i32_16 = arith.constant 8 : i32
    %24 = arith.muli %arg2, %c8_i32_16 : i32
    %25 = tpu.iota {dimensions = array<i32: 1>} : vector<8x8xi32>
    %26 = vector.broadcast %24 : i32 to vector<8x8xi32>
    %27 = arith.addi %26, %25 : vector<8x8xi32>
    %28 = arith.cmpi sge, %23, %27 : vector<8x8xi32>
    %29 = arith.andi %19, %28 : vector<8x8xi1>
    %30 = vector.extract_strided_slice %4 {offsets = [0, 0], sizes = [8, 8], strides = [1, 1]} : vector<8x32xbf16> to vector<8x8xbf16>
    %31 = vector.extract_strided_slice %6 {offsets = [0, 0], sizes = [8, 8], strides = [1, 1]} : vector<8x32xbf16> to vector<8x8xbf16>
    %cst_17 = arith.constant dense<0.000000e+00> : vector<8x8xf32>
    %32 = tpu.matmul %30, %31, %cst_17 {dimension_numbers = #tpu.dot_dimension_numbers<[1], [1], [0], [0], [0, 0, 1, 0], [], []>} : vector<8x8xbf16>, vector<8x8xbf16>, vector<8x8xf32> -> vector<8x8xf32>
    %cst_18 = arith.constant 0.353553385 : f32
    %33 = vector.broadcast %cst_18 : f32 to vector<8x8xf32>
    %34 = arith.mulf %32, %33 : vector<8x8xf32>
    %cst_19 = arith.constant -1.000000e+09 : f32
    %35 = vector.broadcast %cst_19 : f32 to vector<8x8xf32>
    %36 = arith.select %29, %34, %35 : vector<8x8xi1>, vector<8x8xf32>
    %c0_20 = arith.constant 0 : index
    %c0_21 = arith.constant 0 : index
    %c0_22 = arith.constant 0 : index
    %37 = vector.load %arg11[%c0_20, %c0_21, %c0_22] : memref<4x8x1xf32, #tpu.memory_space<vmem>>, vector<1x8x1xf32>
    %38 = vector.shape_cast %37 : vector<1x8x1xf32> to vector<8x1xf32>
    %cst_23 = arith.constant dense<0xFF800000> : vector<8xf32>
    %39 = vector.multi_reduction <maximumf>, %36, %cst_23 [1] : vector<8x8xf32> to vector<8xf32>
    %40 = vector.shape_cast %39 : vector<8xf32> to vector<8x1xf32>
    %41 = arith.maximumf %38, %40 : vector<8x1xf32>
    %42 = arith.subf %38, %41 : vector<8x1xf32>
    %43 = math.exp %42 : vector<8x1xf32>
    %44 = vector.broadcast %41 : vector<8x1xf32> to vector<8x8xf32>
    %45 = arith.subf %36, %44 : vector<8x8xf32>
    %46 = math.exp %45 : vector<8x8xf32>
    %c0_24 = arith.constant 0 : index
    %c0_25 = arith.constant 0 : index
    %c0_26 = arith.constant 0 : index
    %47 = vector.load %arg12[%c0_24, %c0_25, %c0_26] : memref<4x8x1xf32, #tpu.memory_space<vmem>>, vector<1x8x1xf32>
    %48 = vector.shape_cast %47 : vector<1x8x1xf32> to vector<8x1xf32>
    %49 = arith.mulf %43, %48 : vector<8x1xf32>
    %cst_27 = arith.constant dense<0.000000e+00> : vector<8xf32>
    %50 = vector.multi_reduction <add>, %46, %cst_27 [1] : vector<8x8xf32> to vector<8xf32>
    %51 = vector.shape_cast %50 : vector<8xf32> to vector<8x1xf32>
    %52 = arith.addf %49, %51 : vector<8x1xf32>
    %c0_28 = arith.constant 0 : index
    %c0_29 = arith.constant 0 : index
    %c0_30 = arith.constant 0 : index
    %53 = vector.load %arg12[%c0_28, %c0_29, %c0_30] : memref<4x8x1xf32, #tpu.memory_space<vmem>>, vector<1x8x1xf32>
    %54 = vector.shape_cast %53 : vector<1x8x1xf32> to vector<8x1xf32>
    %55 = vector.shape_cast %52 : vector<8x1xf32> to vector<1x8x1xf32>
    tpu.vector_store %arg12[%c0_28, %c0_29, %c0_30], %55 {strides = array<i32>} : memref<4x8x1xf32, #tpu.memory_space<vmem>>, vector<1x8x1xf32>,
    %c0_31 = arith.constant 0 : index
    %c0_32 = arith.constant 0 : index
    %56 = vector.load %arg13[%c0_31, %c0_32] : memref<8x32xf32, #tpu.memory_space<vmem>>, vector<8x8xf32>
    %57 = vector.broadcast %43 : vector<8x1xf32> to vector<8x8xf32>
    %58 = arith.mulf %57, %56 : vector<8x8xf32>
    %59 = arith.truncf %46 : vector<8x8xf32> to vector<8x8xbf16>
    %60 = vector.extract_strided_slice %8 {offsets = [0, 0], sizes = [8, 8], strides = [1, 1]} : vector<8x32xbf16> to vector<8x8xbf16>
    %cst_33 = arith.constant dense<0.000000e+00> : vector<8x8xf32>
    %61 = tpu.matmul %59, %60, %cst_33 {dimension_numbers = #tpu.dot_dimension_numbers<[1], [0], [0], [1], [0, 0, 1, 1], [], []>} : vector<8x8xbf16>, vector<8x8xbf16>, vector<8x8xf32> -> vector<8x8xf32>
    %62 = arith.addf %58, %61 : vector<8x8xf32>
    %c0_34 = arith.constant 0 : index
    %c0_35 = arith.constant 0 : index
    %63 = vector.load %arg13[%c0_34, %c0_35] : memref<8x32xf32, #tpu.memory_space<vmem>>, vector<8x8xf32>
    tpu.vector_store %arg13[%c0_34, %c0_35], %62 {strides = array<i32>} : memref<8x32xf32, #tpu.memory_space<vmem>>, vector<8x8xf32>,
    %c0_36 = arith.constant 0 : index
    %c0_37 = arith.constant 0 : index
    %c0_38 = arith.constant 0 : index
    %64 = vector.load %arg11[%c0_36, %c0_37, %c0_38] : memref<4x8x1xf32, #tpu.memory_space<vmem>>, vector<1x8x1xf32>
    %65 = vector.shape_cast %64 : vector<1x8x1xf32> to vector<8x1xf32>
    %66 = vector.shape_cast %41 : vector<8x1xf32> to vector<1x8x1xf32>
    tpu.vector_store %arg11[%c0_36, %c0_37, %c0_38], %66 {strides = array<i32>} : memref<4x8x1xf32, #tpu.memory_space<vmem>>, vector<1x8x1xf32>,
    %67 = vector.extract_strided_slice %4 {offsets = [0, 8], sizes = [8, 8], strides = [1, 1]} : vector<8x32xbf16> to vector<8x8xbf16>
    %68 = vector.extract_strided_slice %6 {offsets = [0, 8], sizes = [8, 8], strides = [1, 1]} : vector<8x32xbf16> to vector<8x8xbf16>
    %cst_39 = arith.constant dense<0.000000e+00> : vector<8x8xf32>
    %69 = tpu.matmul %67, %68, %cst_39 {dimension_numbers = #tpu.dot_dimension_numbers<[1], [1], [0], [0], [0, 0, 1, 0], [], []>} : vector<8x8xbf16>, vector<8x8xbf16>, vector<8x8xf32> -> vector<8x8xf32>
    %cst_40 = arith.constant 0.353553385 : f32
    %70 = vector.broadcast %cst_40 : f32 to vector<8x8xf32>
    %71 = arith.mulf %69, %70 : vector<8x8xf32>
    %cst_41 = arith.constant -1.000000e+09 : f32
    %72 = vector.broadcast %cst_41 : f32 to vector<8x8xf32>
    %73 = arith.select %29, %71, %72 : vector<8x8xi1>, vector<8x8xf32>
    %c1 = arith.constant 1 : index
    %c0_42 = arith.constant 0 : index
    %c0_43 = arith.constant 0 : index
    %74 = vector.load %arg11[%c1, %c0_42, %c0_43] : memref<4x8x1xf32, #tpu.memory_space<vmem>>, vector<1x8x1xf32>
    %75 = vector.shape_cast %74 : vector<1x8x1xf32> to vector<8x1xf32>
    %cst_44 = arith.constant dense<0xFF800000> : vector<8xf32>
    %76 = vector.multi_reduction <maximumf>, %73, %cst_44 [1] : vector<8x8xf32> to vector<8xf32>
    %77 = vector.shape_cast %76 : vector<8xf32> to vector<8x1xf32>
    %78 = arith.maximumf %75, %77 : vector<8x1xf32>
    %79 = arith.subf %75, %78 : vector<8x1xf32>
    %80 = math.exp %79 : vector<8x1xf32>
    %81 = vector.broadcast %78 : vector<8x1xf32> to vector<8x8xf32>
    %82 = arith.subf %73, %81 : vector<8x8xf32>
    %83 = math.exp %82 : vector<8x8xf32>
    %c1_45 = arith.constant 1 : index
    %c0_46 = arith.constant 0 : index
    %c0_47 = arith.constant 0 : index
    %84 = vector.load %arg12[%c1_45, %c0_46, %c0_47] : memref<4x8x1xf32, #tpu.memory_space<vmem>>, vector<1x8x1xf32>
    %85 = vector.shape_cast %84 : vector<1x8x1xf32> to vector<8x1xf32>
    %86 = arith.mulf %80, %85 : vector<8x1xf32>
    %cst_48 = arith.constant dense<0.000000e+00> : vector<8xf32>
    %87 = vector.multi_reduction <add>, %83, %cst_48 [1] : vector<8x8xf32> to vector<8xf32>
    %88 = vector.shape_cast %87 : vector<8xf32> to vector<8x1xf32>
    %89 = arith.addf %86, %88 : vector<8x1xf32>
    %c1_49 = arith.constant 1 : index
    %c0_50 = arith.constant 0 : index
    %c0_51 = arith.constant 0 : index
    %90 = vector.load %arg12[%c1_49, %c0_50, %c0_51] : memref<4x8x1xf32, #tpu.memory_space<vmem>>, vector<1x8x1xf32>
    %91 = vector.shape_cast %90 : vector<1x8x1xf32> to vector<8x1xf32>
    %92 = vector.shape_cast %89 : vector<8x1xf32> to vector<1x8x1xf32>
    tpu.vector_store %arg12[%c1_49, %c0_50, %c0_51], %92 {strides = array<i32>} : memref<4x8x1xf32, #tpu.memory_space<vmem>>, vector<1x8x1xf32>,
    %c0_52 = arith.constant 0 : index
    %c8 = arith.constant 8 : index
    %93 = vector.load %arg13[%c0_52, %c8] : memref<8x32xf32, #tpu.memory_space<vmem>>, vector<8x8xf32>
    %94 = vector.broadcast %80 : vector<8x1xf32> to vector<8x8xf32>
    %95 = arith.mulf %94, %93 : vector<8x8xf32>
    %96 = arith.truncf %83 : vector<8x8xf32> to vector<8x8xbf16>
    %97 = vector.extract_strided_slice %8 {offsets = [0, 8], sizes = [8, 8], strides = [1, 1]} : vector<8x32xbf16> to vector<8x8xbf16>
    %cst_53 = arith.constant dense<0.000000e+00> : vector<8x8xf32>
    %98 = tpu.matmul %96, %97, %cst_53 {dimension_numbers = #tpu.dot_dimension_numbers<[1], [0], [0], [1], [0, 0, 1, 1], [], []>} : vector<8x8xbf16>, vector<8x8xbf16>, vector<8x8xf32> -> vector<8x8xf32>
    %99 = arith.addf %95, %98 : vector<8x8xf32>
    %c0_54 = arith.constant 0 : index
    %c8_55 = arith.constant 8 : index
    %100 = vector.load %arg13[%c0_54, %c8_55] : memref<8x32xf32, #tpu.memory_space<vmem>>, vector<8x8xf32>
    tpu.vector_store %arg13[%c0_54, %c8_55], %99 {strides = array<i32>} : memref<8x32xf32, #tpu.memory_space<vmem>>, vector<8x8xf32>,
    %c1_56 = arith.constant 1 : index
    %c0_57 = arith.constant 0 : index
    %c0_58 = arith.constant 0 : index
    %101 = vector.load %arg11[%c1_56, %c0_57, %c0_58] : memref<4x8x1xf32, #tpu.memory_space<vmem>>, vector<1x8x1xf32>
    %102 = vector.shape_cast %101 : vector<1x8x1xf32> to vector<8x1xf32>
    %103 = vector.shape_cast %78 : vector<8x1xf32> to vector<1x8x1xf32>
    tpu.vector_store %arg11[%c1_56, %c0_57, %c0_58], %103 {strides = array<i32>} : memref<4x8x1xf32, #tpu.memory_space<vmem>>, vector<1x8x1xf32>,
    %104 = vector.extract_strided_slice %4 {offsets = [0, 16], sizes = [8, 8], strides = [1, 1]} : vector<8x32xbf16> to vector<8x8xbf16>
    %105 = vector.extract_strided_slice %6 {offsets = [0, 16], sizes = [8, 8], strides = [1, 1]} : vector<8x32xbf16> to vector<8x8xbf16>
    %cst_59 = arith.constant dense<0.000000e+00> : vector<8x8xf32>
    %106 = tpu.matmul %104, %105, %cst_59 {dimension_numbers = #tpu.dot_dimension_numbers<[1], [1], [0], [0], [0, 0, 1, 0], [], []>} : vector<8x8xbf16>, vector<8x8xbf16>, vector<8x8xf32> -> vector<8x8xf32>
    %cst_60 = arith.constant 0.353553385 : f32
    %107 = vector.broadcast %cst_60 : f32 to vector<8x8xf32>
    %108 = arith.mulf %106, %107 : vector<8x8xf32>
    %cst_61 = arith.constant -1.000000e+09 : f32
    %109 = vector.broadcast %cst_61 : f32 to vector<8x8xf32>
    %110 = arith.select %29, %108, %109 : vector<8x8xi1>, vector<8x8xf32>
    %c2 = arith.constant 2 : index
    %c0_62 = arith.constant 0 : index
    %c0_63 = arith.constant 0 : index
    %111 = vector.load %arg11[%c2, %c0_62, %c0_63] : memref<4x8x1xf32, #tpu.memory_space<vmem>>, vector<1x8x1xf32>
    %112 = vector.shape_cast %111 : vector<1x8x1xf32> to vector<8x1xf32>
    %cst_64 = arith.constant dense<0xFF800000> : vector<8xf32>
    %113 = vector.multi_reduction <maximumf>, %110, %cst_64 [1] : vector<8x8xf32> to vector<8xf32>
    %114 = vector.shape_cast %113 : vector<8xf32> to vector<8x1xf32>
    %115 = arith.maximumf %112, %114 : vector<8x1xf32>
    %116 = arith.subf %112, %115 : vector<8x1xf32>
    %117 = math.exp %116 : vector<8x1xf32>
    %118 = vector.broadcast %115 : vector<8x1xf32> to vector<8x8xf32>
    %119 = arith.subf %110, %118 : vector<8x8xf32>
    %120 = math.exp %119 : vector<8x8xf32>
    %c2_65 = arith.constant 2 : index
    %c0_66 = arith.constant 0 : index
    %c0_67 = arith.constant 0 : index
    %121 = vector.load %arg12[%c2_65, %c0_66, %c0_67] : memref<4x8x1xf32, #tpu.memory_space<vmem>>, vector<1x8x1xf32>
    %122 = vector.shape_cast %121 : vector<1x8x1xf32> to vector<8x1xf32>
    %123 = arith.mulf %117, %122 : vector<8x1xf32>
    %cst_68 = arith.constant dense<0.000000e+00> : vector<8xf32>
    %124 = vector.multi_reduction <add>, %120, %cst_68 [1] : vector<8x8xf32> to vector<8xf32>
    %125 = vector.shape_cast %124 : vector<8xf32> to vector<8x1xf32>
    %126 = arith.addf %123, %125 : vector<8x1xf32>
    %c2_69 = arith.constant 2 : index
    %c0_70 = arith.constant 0 : index
    %c0_71 = arith.constant 0 : index
    %127 = vector.load %arg12[%c2_69, %c0_70, %c0_71] : memref<4x8x1xf32, #tpu.memory_space<vmem>>, vector<1x8x1xf32>
    %128 = vector.shape_cast %127 : vector<1x8x1xf32> to vector<8x1xf32>
    %129 = vector.shape_cast %126 : vector<8x1xf32> to vector<1x8x1xf32>
    tpu.vector_store %arg12[%c2_69, %c0_70, %c0_71], %129 {strides = array<i32>} : memref<4x8x1xf32, #tpu.memory_space<vmem>>, vector<1x8x1xf32>,
    %c0_72 = arith.constant 0 : index
    %c16 = arith.constant 16 : index
    %130 = vector.load %arg13[%c0_72, %c16] : memref<8x32xf32, #tpu.memory_space<vmem>>, vector<8x8xf32>
    %131 = vector.broadcast %117 : vector<8x1xf32> to vector<8x8xf32>
    %132 = arith.mulf %131, %130 : vector<8x8xf32>
    %133 = arith.truncf %120 : vector<8x8xf32> to vector<8x8xbf16>
    %134 = vector.extract_strided_slice %8 {offsets = [0, 16], sizes = [8, 8], strides = [1, 1]} : vector<8x32xbf16> to vector<8x8xbf16>
    %cst_73 = arith.constant dense<0.000000e+00> : vector<8x8xf32>
    %135 = tpu.matmul %133, %134, %cst_73 {dimension_numbers = #tpu.dot_dimension_numbers<[1], [0], [0], [1], [0, 0, 1, 1], [], []>} : vector<8x8xbf16>, vector<8x8xbf16>, vector<8x8xf32> -> vector<8x8xf32>
    %136 = arith.addf %132, %135 : vector<8x8xf32>
    %c0_74 = arith.constant 0 : index
    %c16_75 = arith.constant 16 : index
    %137 = vector.load %arg13[%c0_74, %c16_75] : memref<8x32xf32, #tpu.memory_space<vmem>>, vector<8x8xf32>
    tpu.vector_store %arg13[%c0_74, %c16_75], %136 {strides = array<i32>} : memref<8x32xf32, #tpu.memory_space<vmem>>, vector<8x8xf32>,
    %c2_76 = arith.constant 2 : index
    %c0_77 = arith.constant 0 : index
    %c0_78 = arith.constant 0 : index
    %138 = vector.load %arg11[%c2_76, %c0_77, %c0_78] : memref<4x8x1xf32, #tpu.memory_space<vmem>>, vector<1x8x1xf32>
    %139 = vector.shape_cast %138 : vector<1x8x1xf32> to vector<8x1xf32>
    %140 = vector.shape_cast %115 : vector<8x1xf32> to vector<1x8x1xf32>
    tpu.vector_store %arg11[%c2_76, %c0_77, %c0_78], %140 {strides = array<i32>} : memref<4x8x1xf32, #tpu.memory_space<vmem>>, vector<1x8x1xf32>,
    %141 = vector.extract_strided_slice %4 {offsets = [0, 24], sizes = [8, 8], strides = [1, 1]} : vector<8x32xbf16> to vector<8x8xbf16>
    %142 = vector.extract_strided_slice %6 {offsets = [0, 24], sizes = [8, 8], strides = [1, 1]} : vector<8x32xbf16> to vector<8x8xbf16>
    %cst_79 = arith.constant dense<0.000000e+00> : vector<8x8xf32>
    %143 = tpu.matmul %141, %142, %cst_79 {dimension_numbers = #tpu.dot_dimension_numbers<[1], [1], [0], [0], [0, 0, 1, 0], [], []>} : vector<8x8xbf16>, vector<8x8xbf16>, vector<8x8xf32> -> vector<8x8xf32>
    %cst_80 = arith.constant 0.353553385 : f32
    %144 = vector.broadcast %cst_80 : f32 to vector<8x8xf32>
    %145 = arith.mulf %143, %144 : vector<8x8xf32>
    %cst_81 = arith.constant -1.000000e+09 : f32
    %146 = vector.broadcast %cst_81 : f32 to vector<8x8xf32>
    %147 = arith.select %29, %145, %146 : vector<8x8xi1>, vector<8x8xf32>
    %c3 = arith.constant 3 : index
    %c0_82 = arith.constant 0 : index
    %c0_83 = arith.constant 0 : index
    %148 = vector.load %arg11[%c3, %c0_82, %c0_83] : memref<4x8x1xf32, #tpu.memory_space<vmem>>, vector<1x8x1xf32>
    %149 = vector.shape_cast %148 : vector<1x8x1xf32> to vector<8x1xf32>
    %cst_84 = arith.constant dense<0xFF800000> : vector<8xf32>
    %150 = vector.multi_reduction <maximumf>, %147, %cst_84 [1] : vector<8x8xf32> to vector<8xf32>
    %151 = vector.shape_cast %150 : vector<8xf32> to vector<8x1xf32>
    %152 = arith.maximumf %149, %151 : vector<8x1xf32>
    %153 = arith.subf %149, %152 : vector<8x1xf32>
    %154 = math.exp %153 : vector<8x1xf32>
    %155 = vector.broadcast %152 : vector<8x1xf32> to vector<8x8xf32>
    %156 = arith.subf %147, %155 : vector<8x8xf32>
    %157 = math.exp %156 : vector<8x8xf32>
    %c3_85 = arith.constant 3 : index
    %c0_86 = arith.constant 0 : index
    %c0_87 = arith.constant 0 : index
    %158 = vector.load %arg12[%c3_85, %c0_86, %c0_87] : memref<4x8x1xf32, #tpu.memory_space<vmem>>, vector<1x8x1xf32>
    %159 = vector.shape_cast %158 : vector<1x8x1xf32> to vector<8x1xf32>
    %160 = arith.mulf %154, %159 : vector<8x1xf32>
    %cst_88 = arith.constant dense<0.000000e+00> : vector<8xf32>
    %161 = vector.multi_reduction <add>, %157, %cst_88 [1] : vector<8x8xf32> to vector<8xf32>
    %162 = vector.shape_cast %161 : vector<8xf32> to vector<8x1xf32>
    %163 = arith.addf %160, %162 : vector<8x1xf32>
    %c3_89 = arith.constant 3 : index
    %c0_90 = arith.constant 0 : index
    %c0_91 = arith.constant 0 : index
    %164 = vector.load %arg12[%c3_89, %c0_90, %c0_91] : memref<4x8x1xf32, #tpu.memory_space<vmem>>, vector<1x8x1xf32>
    %165 = vector.shape_cast %164 : vector<1x8x1xf32> to vector<8x1xf32>
    %166 = vector.shape_cast %163 : vector<8x1xf32> to vector<1x8x1xf32>
    tpu.vector_store %arg12[%c3_89, %c0_90, %c0_91], %166 {strides = array<i32>} : memref<4x8x1xf32, #tpu.memory_space<vmem>>, vector<1x8x1xf32>,
    %c0_92 = arith.constant 0 : index
    %c24 = arith.constant 24 : index
    %167 = vector.load %arg13[%c0_92, %c24] : memref<8x32xf32, #tpu.memory_space<vmem>>, vector<8x8xf32>
    %168 = vector.broadcast %154 : vector<8x1xf32> to vector<8x8xf32>
    %169 = arith.mulf %168, %167 : vector<8x8xf32>
    %170 = arith.truncf %157 : vector<8x8xf32> to vector<8x8xbf16>
    %171 = vector.extract_strided_slice %8 {offsets = [0, 24], sizes = [8, 8], strides = [1, 1]} : vector<8x32xbf16> to vector<8x8xbf16>
    %cst_93 = arith.constant dense<0.000000e+00> : vector<8x8xf32>
    %172 = tpu.matmul %170, %171, %cst_93 {dimension_numbers = #tpu.dot_dimension_numbers<[1], [0], [0], [1], [0, 0, 1, 1], [], []>} : vector<8x8xbf16>, vector<8x8xbf16>, vector<8x8xf32> -> vector<8x8xf32>
    %173 = arith.addf %169, %172 : vector<8x8xf32>
    %c0_94 = arith.constant 0 : index
    %c24_95 = arith.constant 24 : index
    %174 = vector.load %arg13[%c0_94, %c24_95] : memref<8x32xf32, #tpu.memory_space<vmem>>, vector<8x8xf32>
    tpu.vector_store %arg13[%c0_94, %c24_95], %173 {strides = array<i32>} : memref<8x32xf32, #tpu.memory_space<vmem>>, vector<8x8xf32>,
    %c3_96 = arith.constant 3 : index
    %c0_97 = arith.constant 0 : index
    %c0_98 = arith.constant 0 : index
    %175 = vector.load %arg11[%c3_96, %c0_97, %c0_98] : memref<4x8x1xf32, #tpu.memory_space<vmem>>, vector<1x8x1xf32>
    %176 = vector.shape_cast %175 : vector<1x8x1xf32> to vector<8x1xf32>
    %177 = vector.shape_cast %152 : vector<8x1xf32> to vector<1x8x1xf32>
    tpu.vector_store %arg11[%c3_96, %c0_97, %c0_98], %177 {strides = array<i32>} : memref<4x8x1xf32, #tpu.memory_space<vmem>>, vector<1x8x1xf32>,
    %c0_i32_99 = arith.constant 0 : i32
    %178 = arith.cmpi eq, %arg2, %c0_i32_99 : i32
    %179 = arith.extui %178 : i1 to i32
    %c0_i32_100 = arith.constant 0 : i32
    %180 = arith.cmpi ne, %179, %c0_i32_100 : i32
    scf.if %180 {
      %c0_101 = arith.constant 0 : index
      %c0_102 = arith.constant 0 : index
      %181 = vector.load %arg13[%c0_101, %c0_102] : memref<8x32xf32, #tpu.memory_space<vmem>>, vector<8x8xf32>
      %c0_103 = arith.constant 0 : index
      %c0_104 = arith.constant 0 : index
      %c0_105 = arith.constant 0 : index
      %182 = vector.load %arg12[%c0_103, %c0_104, %c0_105] : memref<4x8x1xf32, #tpu.memory_space<vmem>>, vector<1x8x1xf32>
      %183 = vector.shape_cast %182 : vector<1x8x1xf32> to vector<8x1xf32>
      %184 = vector.broadcast %183 : vector<8x1xf32> to vector<8x8xf32>
      %185 = arith.divf %181, %184 : vector<8x8xf32>
      %c0_106 = arith.constant 0 : index
      %c0_107 = arith.constant 0 : index
      %186 = vector.load %arg13[%c0_106, %c0_107] : memref<8x32xf32, #tpu.memory_space<vmem>>, vector<8x8xf32>
      tpu.vector_store %arg13[%c0_106, %c0_107], %185 {strides = array<i32>} : memref<8x32xf32, #tpu.memory_space<vmem>>, vector<8x8xf32>,
      %c0_108 = arith.constant 0 : index
      %c8_109 = arith.constant 8 : index
      %187 = vector.load %arg13[%c0_108, %c8_109] : memref<8x32xf32, #tpu.memory_space<vmem>>, vector<8x8xf32>
      %c1_110 = arith.constant 1 : index
      %c0_111 = arith.constant 0 : index
      %c0_112 = arith.constant 0 : index
      %188 = vector.load %arg12[%c1_110, %c0_111, %c0_112] : memref<4x8x1xf32, #tpu.memory_space<vmem>>, vector<1x8x1xf32>
      %189 = vector.shape_cast %188 : vector<1x8x1xf32> to vector<8x1xf32>
      %190 = vector.broadcast %189 : vector<8x1xf32> to vector<8x8xf32>
      %191 = arith.divf %187, %190 : vector<8x8xf32>
      %c0_113 = arith.constant 0 : index
      %c8_114 = arith.constant 8 : index
      %192 = vector.load %arg13[%c0_113, %c8_114] : memref<8x32xf32, #tpu.memory_space<vmem>>, vector<8x8xf32>
      tpu.vector_store %arg13[%c0_113, %c8_114], %191 {strides = array<i32>} : memref<8x32xf32, #tpu.memory_space<vmem>>, vector<8x8xf32>,
      %c0_115 = arith.constant 0 : index
      %c16_116 = arith.constant 16 : index
      %193 = vector.load %arg13[%c0_115, %c16_116] : memref<8x32xf32, #tpu.memory_space<vmem>>, vector<8x8xf32>
      %c2_117 = arith.constant 2 : index
      %c0_118 = arith.constant 0 : index
      %c0_119 = arith.constant 0 : index
      %194 = vector.load %arg12[%c2_117, %c0_118, %c0_119] : memref<4x8x1xf32, #tpu.memory_space<vmem>>, vector<1x8x1xf32>
      %195 = vector.shape_cast %194 : vector<1x8x1xf32> to vector<8x1xf32>
      %196 = vector.broadcast %195 : vector<8x1xf32> to vector<8x8xf32>
      %197 = arith.divf %193, %196 : vector<8x8xf32>
      %c0_120 = arith.constant 0 : index
      %c16_121 = arith.constant 16 : index
      %198 = vector.load %arg13[%c0_120, %c16_121] : memref<8x32xf32, #tpu.memory_space<vmem>>, vector<8x8xf32>
      tpu.vector_store %arg13[%c0_120, %c16_121], %197 {strides = array<i32>} : memref<8x32xf32, #tpu.memory_space<vmem>>, vector<8x8xf32>,
      %c0_122 = arith.constant 0 : index
      %c24_123 = arith.constant 24 : index
      %199 = vector.load %arg13[%c0_122, %c24_123] : memref<8x32xf32, #tpu.memory_space<vmem>>, vector<8x8xf32>
      %c3_124 = arith.constant 3 : index
      %c0_125 = arith.constant 0 : index
      %c0_126 = arith.constant 0 : index
      %200 = vector.load %arg12[%c3_124, %c0_125, %c0_126] : memref<4x8x1xf32, #tpu.memory_space<vmem>>, vector<1x8x1xf32>
      %201 = vector.shape_cast %200 : vector<1x8x1xf32> to vector<8x1xf32>
      %202 = vector.broadcast %201 : vector<8x1xf32> to vector<8x8xf32>
      %203 = arith.divf %199, %202 : vector<8x8xf32>
      %c0_127 = arith.constant 0 : index
      %c24_128 = arith.constant 24 : index
      %204 = vector.load %arg13[%c0_127, %c24_128] : memref<8x32xf32, #tpu.memory_space<vmem>>, vector<8x8xf32>
      tpu.vector_store %arg13[%c0_127, %c24_128], %203 {strides = array<i32>} : memref<8x32xf32, #tpu.memory_space<vmem>>, vector<8x8xf32>,
      %c0_129 = arith.constant 0 : index
      %c0_130 = arith.constant 0 : index
      %205 = vector.load %arg13[%c0_129, %c0_130] : memref<8x32xf32, #tpu.memory_space<vmem>>, vector<8x32xf32>
      %206 = arith.truncf %205 : vector<8x32xf32> to vector<8x32xbf16>
      %c0_131 = arith.constant 0 : index
      %c0_132 = arith.constant 0 : index
      %207 = vector.load %arg8[%c0_131, %c0_132] : memref<32x32xbf16, #tpu.memory_space<vmem>>, vector<32x32xbf16>
      %cst_133 = arith.constant dense<0.000000e+00> : vector<8x32xf32>
      %208 = tpu.matmul %206, %207, %cst_133 {dimension_numbers = #tpu.dot_dimension_numbers<[1], [0], [0], [1], [0, 0, 1, 1], [], []>} : vector<8x32xbf16>, vector<32x32xbf16>, vector<8x32xf32> -> vector<8x32xf32>
      %c0_134 = arith.constant 0 : index
      %c0_135 = arith.constant 0 : index
      %209 = vector.load %arg9[%c0_134, %c0_135] : memref<1x32xf32, #tpu.memory_space<vmem>>, vector<1x32xf32>
      %210 = vector.broadcast %209 : vector<1x32xf32> to vector<8x32xf32>
      %211 = arith.addf %208, %210 : vector<8x32xf32>
      %212 = arith.truncf %211 : vector<8x32xf32> to vector<8x32xbf16>
      %c0_136 = arith.constant 0 : index
      %c0_137 = arith.constant 0 : index
      %c0_138 = arith.constant 0 : index
      %213 = vector.load %arg10[%c0_136, %c0_137, %c0_138] : memref<1x8x32xbf16, #tpu.memory_space<vmem>>, vector<1x8x32xbf16>
      %214 = vector.shape_cast %213 : vector<1x8x32xbf16> to vector<8x32xbf16>
      %215 = vector.shape_cast %212 : vector<8x32xbf16> to vector<1x8x32xbf16>
      tpu.vector_store %arg10[%c0_136, %c0_137, %c0_138], %215 {strides = array<i32>} : memref<1x8x32xbf16, #tpu.memory_space<vmem>>, vector<1x8x32xbf16>,
    } else {
    }
    return
  }
  func.func @transform_0(%arg0: i32, %arg1: i32, %arg2: i32) -> (i32, i32, i32) {
    %c0_i32 = arith.constant 0 : i32
    %c0_i32_0 = arith.constant 0 : i32
    return %arg0, %arg1, %c0_i32 : i32, i32, i32
  }
  func.func @transform_1(%arg0: i32, %arg1: i32, %arg2: i32) -> (i32, i32, i32) {
    %c0_i32 = arith.constant 0 : i32
    %c0_i32_0 = arith.constant 0 : i32
    return %arg0, %arg2, %c0_i32 : i32, i32, i32
  }
  func.func @transform_2(%arg0: i32, %arg1: i32, %arg2: i32) -> (i32, i32, i32) {
    %c0_i32 = arith.constant 0 : i32
    %c0_i32_0 = arith.constant 0 : i32
    return %arg0, %arg2, %c0_i32 : i32, i32, i32
  }
  func.func @transform_3(%arg0: i32, %arg1: i32, %arg2: i32) -> (i32, i32, i32) {
    %c0_i32 = arith.constant 0 : i32
    %c0_i32_0 = arith.constant 0 : i32
    return %arg0, %arg1, %c0_i32 : i32, i32, i32
  }
  func.func @transform_4(%arg0: i32, %arg1: i32, %arg2: i32) -> (i32, i32, i32) {
    %c0_i32 = arith.constant 0 : i32
    %c0_i32_0 = arith.constant 0 : i32
    return %arg0, %c0_i32, %arg2 : i32, i32, i32
  }
  func.func @transform_5(%arg0: i32, %arg1: i32, %arg2: i32) -> (i32, i32) {
    %c0_i32 = arith.constant 0 : i32
    %c0_i32_0 = arith.constant 0 : i32
    %c0_i32_1 = arith.constant 0 : i32
    return %c0_i32, %c0_i32_0 : i32, i32
  }
  func.func @transform_6(%arg0: i32, %arg1: i32, %arg2: i32) -> (i32, i32) {
    %c0_i32 = arith.constant 0 : i32
    %c0_i32_0 = arith.constant 0 : i32
    %c0_i32_1 = arith.constant 0 : i32
    return %c0_i32, %c0_i32_0 : i32, i32
  }
  func.func @transform_7(%arg0: i32, %arg1: i32, %arg2: i32) -> (i32, i32, i32) {
    %c0_i32 = arith.constant 0 : i32
    %c0_i32_0 = arith.constant 0 : i32
    return %arg0, %arg1, %c0_i32 : i32, i32, i32
  }
}

module attributes {stable_mosaic.version = 11 : i64} {
  func.func @_linear_kernel(%arg0: i32, %arg1: i32, %arg2: memref<16x32xbf16, #tpu.memory_space<vmem>>, %arg3: memref<32x32xbf16, #tpu.memory_space<vmem>>, %arg4: memref<1x32xf32, #tpu.memory_space<vmem>>, %arg5: memref<16x32xbf16, #tpu.memory_space<vmem>>) attributes {dimension_semantics = [#tpu.dimension_semantics<parallel>, #tpu.dimension_semantics<parallel>], iteration_bounds = array<i64: 1, 1>, scalar_prefetch = 0 : i64, scratch_operands = 0 : i64, tpu.core_type = #tpu.core_type<tc>, window_params = [{transform_indices = @transform_0, window_bounds = array<i64: 16, 32>}, {transform_indices = @transform_1, window_bounds = array<i64: 32, 32>}, {transform_indices = @transform_2, window_bounds = array<i64: 1, 32>}, {transform_indices = @transform_3, window_bounds = array<i64: 16, 32>}]} {
    %c0 = arith.constant 0 : index
    %c0_0 = arith.constant 0 : index
    %0 = vector.load %arg2[%c0, %c0_0] : memref<16x32xbf16, #tpu.memory_space<vmem>>, vector<16x32xbf16>
    %c0_1 = arith.constant 0 : index
    %c0_2 = arith.constant 0 : index
    %1 = vector.load %arg3[%c0_1, %c0_2] : memref<32x32xbf16, #tpu.memory_space<vmem>>, vector<32x32xbf16>
    %cst = arith.constant dense<0.000000e+00> : vector<16x32xf32>
    %2 = tpu.matmul %0, %1, %cst {dimension_numbers = #tpu.dot_dimension_numbers<[1], [0], [0], [1], [0, 0, 1, 1], [], []>} : vector<16x32xbf16>, vector<32x32xbf16>, vector<16x32xf32> -> vector<16x32xf32>
    %c0_3 = arith.constant 0 : index
    %c0_4 = arith.constant 0 : index
    %3 = vector.load %arg4[%c0_3, %c0_4] : memref<1x32xf32, #tpu.memory_space<vmem>>, vector<1x32xf32>
    %4 = vector.broadcast %3 : vector<1x32xf32> to vector<16x32xf32>
    %5 = arith.addf %2, %4 : vector<16x32xf32>
    %6 = arith.truncf %5 : vector<16x32xf32> to vector<16x32xbf16>
    %c0_5 = arith.constant 0 : index
    %c0_6 = arith.constant 0 : index
    %7 = vector.load %arg5[%c0_5, %c0_6] : memref<16x32xbf16, #tpu.memory_space<vmem>>, vector<16x32xbf16>
    tpu.vector_store %arg5[%c0_5, %c0_6], %6 {strides = array<i32>} : memref<16x32xbf16, #tpu.memory_space<vmem>>, vector<16x32xbf16>,
    return
  }
  func.func @transform_0(%arg0: i32, %arg1: i32) -> (i32, i32) {
    %c0_i32 = arith.constant 0 : i32
    %c0_i32_0 = arith.constant 0 : i32
    return %arg1, %c0_i32 : i32, i32
  }
  func.func @transform_1(%arg0: i32, %arg1: i32) -> (i32, i32) {
    %c0_i32 = arith.constant 0 : i32
    %c0_i32_0 = arith.constant 0 : i32
    return %c0_i32, %arg0 : i32, i32
  }
  func.func @transform_2(%arg0: i32, %arg1: i32) -> (i32, i32) {
    %c0_i32 = arith.constant 0 : i32
    %c0_i32_0 = arith.constant 0 : i32
    return %c0_i32, %arg0 : i32, i32
  }
  func.func @transform_3(%arg0: i32, %arg1: i32) -> (i32, i32) {
    %c0_i32 = arith.constant 0 : i32
    return %arg1, %arg0 : i32, i32
  }
}

module attributes {stable_mosaic.version = 11 : i64} {
  func.func @_linear_kernel(%arg0: i32, %arg1: i32, %arg2: memref<16x32xbf16, #tpu.memory_space<vmem>>, %arg3: memref<32x16xbf16, #tpu.memory_space<vmem>>, %arg4: memref<1x16xf32, #tpu.memory_space<vmem>>, %arg5: memref<16x16xf32, #tpu.memory_space<vmem>>) attributes {dimension_semantics = [#tpu.dimension_semantics<parallel>, #tpu.dimension_semantics<parallel>], iteration_bounds = array<i64: 1, 1>, scalar_prefetch = 0 : i64, scratch_operands = 0 : i64, tpu.core_type = #tpu.core_type<tc>, window_params = [{transform_indices = @transform_0, window_bounds = array<i64: 16, 32>}, {transform_indices = @transform_1, window_bounds = array<i64: 32, 16>}, {transform_indices = @transform_2, window_bounds = array<i64: 1, 16>}, {transform_indices = @transform_3, window_bounds = array<i64: 16, 16>}]} {
    %c0 = arith.constant 0 : index
    %c0_0 = arith.constant 0 : index
    %0 = vector.load %arg2[%c0, %c0_0] : memref<16x32xbf16, #tpu.memory_space<vmem>>, vector<16x32xbf16>
    %c0_1 = arith.constant 0 : index
    %c0_2 = arith.constant 0 : index
    %1 = vector.load %arg3[%c0_1, %c0_2] : memref<32x16xbf16, #tpu.memory_space<vmem>>, vector<32x16xbf16>
    %cst = arith.constant dense<0.000000e+00> : vector<16x16xf32>
    %2 = tpu.matmul %0, %1, %cst {dimension_numbers = #tpu.dot_dimension_numbers<[1], [0], [0], [1], [0, 0, 1, 1], [], []>} : vector<16x32xbf16>, vector<32x16xbf16>, vector<16x16xf32> -> vector<16x16xf32>
    %c0_3 = arith.constant 0 : index
    %c0_4 = arith.constant 0 : index
    %3 = vector.load %arg4[%c0_3, %c0_4] : memref<1x16xf32, #tpu.memory_space<vmem>>, vector<1x16xf32>
    %4 = vector.broadcast %3 : vector<1x16xf32> to vector<16x16xf32>
    %5 = arith.addf %2, %4 : vector<16x16xf32>
    %c0_5 = arith.constant 0 : index
    %c0_6 = arith.constant 0 : index
    %6 = vector.load %arg5[%c0_5, %c0_6] : memref<16x16xf32, #tpu.memory_space<vmem>>, vector<16x16xf32>
    tpu.vector_store %arg5[%c0_5, %c0_6], %5 {strides = array<i32>} : memref<16x16xf32, #tpu.memory_space<vmem>>, vector<16x16xf32>,
    return
  }
  func.func @transform_0(%arg0: i32, %arg1: i32) -> (i32, i32) {
    %c0_i32 = arith.constant 0 : i32
    %c0_i32_0 = arith.constant 0 : i32
    return %arg1, %c0_i32 : i32, i32
  }
  func.func @transform_1(%arg0: i32, %arg1: i32) -> (i32, i32) {
    %c0_i32 = arith.constant 0 : i32
    %c0_i32_0 = arith.constant 0 : i32
    return %c0_i32, %arg0 : i32, i32
  }
  func.func @transform_2(%arg0: i32, %arg1: i32) -> (i32, i32) {
    %c0_i32 = arith.constant 0 : i32
    %c0_i32_0 = arith.constant 0 : i32
    return %c0_i32, %arg0 : i32, i32
  }
  func.func @transform_3(%arg0: i32, %arg1: i32) -> (i32, i32) {
    %c0_i32 = arith.constant 0 : i32
    return %arg1, %arg0 : i32, i32
  }
}

</mosaic_0001>

<bundles_post_ra>
// kernel: transformer_forward.29
= control target key start
LH: loop header
LB: loop body
LE: loop exit
PB: predicated region body
PF: predicated region fallthrough
CT: control target
= control target key end

     0   :  { %v159_v0 = vmov 0.0   ;;  %vm160_vm0 = vmmov 0   ;;  %vm48_vm1 = vcmask 261120   ;;  %vm101_vm2 = vcmask 257024   ;;  %s162_s27 = smov 96   ;;  %s229_s1 = inlined_call_operand.vmem [shape: bf16[32,96], index: 1, kind: input, shape index: {}]   ;;  %s230_s0 = inlined_call_operand.vmem [shape: bf16[16,32], index: 0, kind: input, shape index: {}]   ;;  %s231_s2 = inlined_call_operand.vmem [shape: f32[1,96], index: 2, kind: input, shape index: {}]   ;;  %s232_s3 = inlined_call_operand.vmem [shape: bf16[16,32], index: 3, kind: output, shape index: {0}]   ;;  %s233_s5 = inlined_call_operand.vmem [shape: bf16[16,32], index: 5, kind: output, shape index: {2}]   ;;  %s234_s4 = inlined_call_operand.vmem [shape: bf16[16,32], index: 4, kind: output, shape index: {1}]  }
   0x1   :  { %144 = vmatprep.subr.bf16.mxu0 %v159_v0  ;;  %v156_v1 = vld [vmem:[%s229_s1 + $0x8] sm:$0xff]   ;;  %148 = vmatprep.mubr.msk.bf16.mxu0 %vm160_vm0, %v159_v0  ;;  %v157_v2 = vld [vmem:[%s229_s1] sm:$0xff]  }
   0x2   :  { %145 = vmatpush3.bf16.msra.mxu0 %v156_v1  ;;  %v158_v3 = vld [vmem:[%s230_s0] sm:$0xff]   ;;  %s161_s0 = smov 64  }
   0x3   :  { %146 = vmatprep.subr.bf16.mxu0 %v159_v0  ;;  %v132_v4 = vld [vmem:[%s231_s2] ss:$0 sm:$0xff] }
   0x6   :  { %147 = vmatpush3.bf16.msra.mxu0 %v157_v2 }
   0x9   :  { %149 = vmatmul.mubr.msk.bf16.vlgmr.msra.gmra.mxu0 %vm48_vm1, %v158_v3 }
  0xc9   :  { %v86_v5 = vpop.f32.mrf.mxu0 }
  0xca   :  { %v87_v6 = vadd.f32 %v132_v4, %v86_v5 }
  0xcb   :  { %v150_v7 = vpop.f32.mrf.mxu0 }
  0xcc   :  { %v139_v8 = vpack.c.bf16 %v87_v6, %v87_v6 }
  0xcd   :  { %v89_v9 = vpop.f32.mrf.mxu0 }
  0xce   :  { %102 = vst.msk [vmem:[%s232_s3] sm:$0xf] %vm101_vm2, %v139_v8  ;;  %v90_v10 = vadd.f32 %v132_v4, %v89_v9  ;;  %112 = vrot.lane.b32.xlu1 %v139_v8, %s161_s0  ;;  %104 = vrot.lane.b32.xlu0 %v139_v8, %s162_s27 }
  0xcf   :  { %v151_v11 = vpop.f32.mrf.mxu0 }
  0xd0   :  { %v140_v12 = vpack.c.bf16 %v90_v10, %v90_v10 }
  0xd2   :  { %103 = vst.msk [vmem:[%s232_s3 + $0x4] sm:$0xf] %vm101_vm2, %v140_v12  ;;  %114 = vrot.lane.b32.xlu1 %v140_v12, %s161_s0  ;;  %106 = vrot.lane.b32.xlu0 %v140_v12, %s162_s27 }
 0x140   :  { %v113_v13 = vpop.permute.xlu1 %112  ;;  %v105_v14 = vpop.permute.xlu0 %104 }
 0x141   :  { %118 = vst.msk [vmem:[%s233_s5] sm:$0xf] %vm101_vm2, %v113_v13  ;;  %110 = vst.msk [vmem:[%s234_s4] sm:$0xf] %vm101_vm2, %v105_v14 }
 0x144   :  { %v115_v15 = vpop.permute.xlu1 %114  ;;  %v107_v16 = vpop.permute.xlu0 %106 }
 0x145   :  { %119 = vst.msk [vmem:[%s233_s5 + $0x4] sm:$0xf] %vm101_vm2, %v115_v15  ;;  %111 = vst.msk [vmem:[%s234_s4 + $0x4] sm:$0xf] %vm101_vm2, %v107_v16 }

// kernel: transformer_forward.31
= control target key start
LH: loop header
LB: loop body
LE: loop exit
PB: predicated region body
PF: predicated region fallthrough
CT: control target
= control target key end

     0   :  { %vm27_vm0 = vcmask 261120   ;;  %vm81_vm1 = vcmask 257024   ;;  %s153_s0 = inlined_call_operand.vmem [shape: bf16[16,32], index: 0, kind: input, shape index: {}]   ;;  %s154_s1 = inlined_call_operand.vmem [shape: bf16[16,32], index: 1, kind: input, shape index: {}]   ;;  %s155_s2 = inlined_call_operand.vmem [shape: f32[1,32], index: 2, kind: input, shape index: {}]   ;;  %s156_s3 = inlined_call_operand.vmem [shape: f32[1,32], index: 3, kind: input, shape index: {}]   ;;  %s157_s4 = inlined_call_operand.vmem [shape: bf16[16,32], index: 4, kind: output, shape index: {}]  }
   0x1   :  { %v95_v0 = vld [vmem:[%s153_s0] sm:$0xff]  }
   0x2   :  { %v99_v1 = vld [vmem:[%s154_s1] sm:$0xff]   ;;  %v96_v2 = vunpack.c.l.bf16 %v95_v0  ;;  %v97_v4 = vunpack.c.h.bf16 %v95_v0 }
   0x3   :  { %v100_v3 = vunpack.c.l.bf16 %v99_v1  ;;  %v101_v5 = vunpack.c.h.bf16 %v99_v1  ;;  %v88_v27 = vld [vmem:[%s155_s2] ss:$0 sm:$0xff] }
   0x4   :  { %v89_v29 = vld [vmem:[%s156_s3] ss:$0 sm:$0xff] }
   0x5   :  { %v25_v6 = vadd.f32 %v100_v3, %v96_v2  ;;  %v26_v7 = vadd.f32 %v101_v5, %v97_v4 }
   0x7   :  { %v28_v8 = vsel %vm27_vm0, %v25_v6, 0.0  ;;  %v31_v9 = vsel %vm27_vm0, %v26_v7, 0.0 }
   0x8   :  { %29 = vadd.xlane.f32.xlu0 %v28_v8 }
   0xc   :  { %32 = vadd.xlane.f32.xlu0 %v31_v9 }
  0x91   :  { %v30_v10 = vpop.xlane.xlu0 %29 }
  0x92   :  { %v35_v11 = vmul.f32 0.03125, %v30_v10 }
  0x94   :  { %v37_v12 = vsub.f32 %v25_v6, %v35_v11 }
  0x95   :  { %v33_v13 = vpop.xlane.xlu0 %32 }
  0x96   :  { %v36_v14 = vmul.f32 0.03125, %v33_v13  ;;  %v39_v15 = vmul.f32 %v37_v12, %v37_v12 }
  0x98   :  { %v38_v16 = vsub.f32 %v26_v7, %v36_v14  ;;  %v41_v17 = vsel %vm27_vm0, %v39_v15, 0.0 }
  0x99   :  { %42 = vadd.xlane.f32.xlu1 %v41_v17 }
  0x9a   :  { %v40_v18 = vmul.f32 %v38_v16, %v38_v16 }
  0x9c   :  { %v44_v19 = vsel %vm27_vm0, %v40_v18, 0.0 }
  0x9d   :  { %45 = vadd.xlane.f32.xlu1 %v44_v19 }
 0x122   :  { %v43_v20 = vpop.xlane.xlu1 %42 }
 0x123   :  { %v47_v21 = vmul.f32 0.03125, %v43_v20 }
 0x125   :  { %v49_v22 = vadd.f32 1e-12, %v47_v21 }
 0x126   :  { %v46_v23 = vpop.xlane.xlu1 %45 }
 0x127   :  { %102 = vrsqrt.f32 %v49_v22  ;;  %v48_v24 = vmul.f32 0.03125, %v46_v23 }
 0x129   :  { %v50_v25 = vadd.f32 1e-12, %v48_v24 }
 0x12b   :  { %104 = vrsqrt.f32 %v50_v25 }
 0x134   :  { %v103_v26 = vpop.eup %102 }
 0x135   :  { %v53_v28 = vmul.f32 %v103_v26, %v37_v12 }
 0x137   :  { %v62_v30 = vmul.f32 %v88_v27, %v53_v28 }
 0x138   :  { %v105_v31 = vpop.eup %104 }
 0x139   :  { %v71_v32 = vadd.f32 %v89_v29, %v62_v30  ;;  %v54_v33 = vmul.f32 %v105_v31, %v38_v16 }
 0x13b   :  { %v92_v34 = vpack.c.bf16 %v71_v32, %v71_v32  ;;  %v63_v35 = vmul.f32 %v88_v27, %v54_v33 }
 0x13d   :  { %82 = vst.msk [vmem:[%s157_s4] sm:$0xf] %vm81_vm1, %v92_v34  ;;  %v72_v36 = vadd.f32 %v89_v29, %v63_v35 }
 0x13f   :  { %v93_v37 = vpack.c.bf16 %v72_v36, %v72_v36 }
 0x141   :  { %83 = vst.msk [vmem:[%s157_s4 + $0x4] sm:$0xf] %vm81_vm1, %v93_v37 }

// kernel: transformer_forward.32
= control target key start
LH: loop header
LB: loop body
LE: loop exit
PB: predicated region body
PF: predicated region fallthrough
CT: control target
= control target key end

     0   :  { %v250_v0 = vmov 0.0   ;;  %vm251_vm0 = vmmov 0   ;;  %vm51_vm1 = vcmask 261120   ;;  %vm138_vm2 = vcmask 523264   ;;  %s315_s1 = inlined_call_operand.vmem [shape: bf16[32,64], index: 1, kind: input, shape index: {}]   ;;  %s316_s3 = inlined_call_operand.vmem [shape: bf16[64,32], index: 3, kind: input, shape index: {}]   ;;  %s317_s0 = inlined_call_operand.vmem [shape: bf16[16,32], index: 0, kind: input, shape index: {}]   ;;  %s318_s2 = inlined_call_operand.vmem [shape: f32[1,64], index: 2, kind: input, shape index: {}]   ;;  %s319_s4 = inlined_call_operand.vmem [shape: f32[1,32], index: 4, kind: input, shape index: {}]   ;;  %s320_s5 = inlined_call_operand.vmem [shape: bf16[16,32], index: 5, kind: output, shape index: {}]  }
   0x1   :  { %221 = vmatprep.subr.bf16.mxu0 %v250_v0  ;;  %v243_v1 = vld [vmem:[%s315_s1 + $0x8] sm:$0xff]   ;;  %225 = vmatprep.mubr.msk.bf16.mxu0 %vm251_vm0, %v250_v0  ;;  %v244_v2 = vld [vmem:[%s315_s1] sm:$0xff]   ;;  %v246_v3 = vld [vmem:[%s316_s3 + $0x18] sm:$0xff]   ;;  %vm191_vm3 = vcmask 257024  }
   0x2   :  { %229 = vmatprep.subr.bf16.mxu1 %v250_v0  ;;  %237 = vmatprep.mubr.msk.bf16.mxu1 %vm251_vm0, %v250_v0  ;;  %v245_v4 = vld [vmem:[%s317_s0] sm:$0xff]   ;;  %v247_v5 = vld [vmem:[%s316_s3 + $0x10] sm:$0xff]   ;;  %v248_v6 = vld [vmem:[%s316_s3 + $0x8] sm:$0xff]  }
   0x3   :  { %222 = vmatpush3.bf16.msra.mxu0 %v243_v1  ;;  %230 = vmatpush3.bf16.msra.mxu1 %v246_v3  ;;  %v249_v7 = vld [vmem:[%s316_s3] sm:$0xff]  }
   0x4   :  { %223 = vmatprep.subr.bf16.mxu0 %v250_v0  ;;  %231 = vmatprep.subr.bf16.mxu1 %v250_v0  ;;  %v198_v8 = vld [vmem:[%s318_s2] ss:$0 sm:$0xff] }
   0x5   :  { %v203_v18 = vld [vmem:[%s319_s4] ss:$0 sm:$0xff] }
   0x7   :  { %224 = vmatpush3.bf16.msra.mxu0 %v244_v2  ;;  %232 = vmatpush3.bf16.msra.mxu1 %v247_v5 }
   0x8   :  { %233 = vmatprep.subr.bf16.mxu1 %v250_v0 }
   0xa   :  { %226 = vmatmul.mubr.msk.bf16.vlgmr.msra.gmra.mxu0 %vm51_vm1, %v245_v4 }
   0xb   :  { %234 = vmatpush3.bf16.msra.mxu1 %v248_v6 }
   0xc   :  { %235 = vmatprep.subr.bf16.mxu1 %v250_v0 }
   0xf   :  { %236 = vmatpush3.bf16.msra.mxu1 %v249_v7 }
  0xca   :  { %v89_v9 = vpop.f32.mrf.mxu0 }
  0xcb   :  { %v90_v11 = vadd.f32 %v198_v8, %v89_v9 }
  0xcc   :  { %v227_v10 = vpop.f32.mrf.mxu0 }
  0xcd   :  { %v96_v15 = vmax.f32 %v90_v11, 0.0 }
  0xce   :  { %v92_v12 = vpop.f32.mrf.mxu0 }
  0xcf   :  { %v93_v13 = vadd.f32 %v198_v8, %v92_v12 }
  0xd0   :  { %v228_v14 = vpop.f32.mrf.mxu0 }
  0xd1   :  { %v97_v16 = vmax.f32 %v93_v13, 0.0 }
  0xd3   :  { %v98_v17 = vpack.c.bf16 %v97_v16, %v96_v15 }
  0xd5   :  { %238 = vmatmul.mubr.msk.bf16.vlgmr.msra.gmra.mxu1 %vm138_vm2, %v98_v17 }
 0x195   :  { %v176_v19 = vpop.f32.mrf.mxu1 }
 0x196   :  { %v177_v20 = vadd.f32 %v203_v18, %v176_v19 }
 0x197   :  { %v239_v21 = vpop.f32.mrf.mxu1 }
 0x198   :  { %v211_v22 = vpack.c.bf16 %v177_v20, %v177_v20 }
 0x199   :  { %v179_v23 = vpop.f32.mrf.mxu1 }
 0x19a   :  { %192 = vst.msk [vmem:[%s320_s5] sm:$0xf] %vm191_vm3, %v211_v22  ;;  %v180_v24 = vadd.f32 %v203_v18, %v179_v23 }
 0x19b   :  { %v240_v25 = vpop.f32.mrf.mxu1 }
 0x19c   :  { %v212_v26 = vpack.c.bf16 %v180_v24, %v180_v24 }
 0x19e   :  { %193 = vst.msk [vmem:[%s320_s5 + $0x4] sm:$0xf] %vm191_vm3, %v212_v26 }

// kernel: transformer_forward.30
= control target key start
LH: loop header
LB: loop body
LE: loop exit
PB: predicated region body
PF: predicated region fallthrough
CT: control target
= control target key end

     0   :  { %s1508_s24 = smov 0   ;;  %s1510_s25 = smov 0   ;;  %s1733_s0 = inlined_call_operand.vmem [shape: bf16[2,8,32], index: 0, kind: input, shape index: {}]   ;;  %s1734_s1 = inlined_call_operand.vmem [shape: bf16[2,8,32], index: 1, kind: input, shape index: {}]   ;;  %s1735_s2 = inlined_call_operand.vmem [shape: bf16[2,8,32], index: 2, kind: input, shape index: {}]   ;;  %s1736_s3 = inlined_call_operand.vmem [shape: f32[2,8,1], index: 3, kind: input, shape index: {}]   ;;  %s1737_s4 = inlined_call_operand.vmem [shape: f32[2,1,8], index: 4, kind: input, shape index: {}]   ;;  %s1738_s5 = inlined_call_operand.vmem [shape: bf16[32,32], index: 5, kind: input, shape index: {}]   ;;  %s1739_s6 = inlined_call_operand.vmem [shape: f32[1,32], index: 6, kind: input, shape index: {}]   ;;  %s1740_s7 = inlined_call_operand.vmem [shape: bf16[2,8,32], index: 7, kind: output, shape index: {}]  }
   0x1   :  { %s1512_s26 = smov 0  }
   0x2 LB: > { %s36_s27 = sadd.s32 1, %s1452_s25  ;;  %p1272_p0 = scmp.ge.s32.totalorder %s1456_s26, 1  ;;  %s1456_s26 = sphi %s1512_s26, %s17_s26   ;;  %s1452_s25 = sphi %s1510_s25, %s1744_s25   ;;  %s1448_s24 = sphi %s1508_s24, %s1743_s24  }
   0x3   : > { %p38_p1 = scmp.ge.s32.totalorder %s36_s27, 2  ;;  %p317_p2 = scmp.lt.s32.totalorder %s1456_s26, 3 }
   0x5   : > { %s1746_s27 = smov (%p38_p1, %s36_s27), 0  ;;  %p318_p3 = pnand %p1272_p0, %p317_p2 }
   0x6   : > { %p380_p4 = scmp.lt.s32.totalorder (!%p318_p3), %s1448_s24, 1  ;;  %s1462_s22 = smov (!%p318_p3), 120  }
   0x7   : > { %321 = sbr.rel (%p318_p3) target bundleno = 1580 (0x62c), region = 48  ;;  %s1463_s23 = smov (!%p318_p3), 112  }
   0x8   : > { %s1466_s30 = smov (!%p318_p3), 16   ;;  %s1467_s8 = smov (!%p318_p3), 24  }
   0xc   : > { %v1458_v0 = vmov 0.0   ;;  %vm1459_vm0 = vmmov 0   ;;  %s1748_s24 = smov (!%p380_p4, %s1448_s24), 1  ;;  %v1460_v1 = vmov 0   ;;  %vm456_vm1 = vcmask 64512  }
   0xd   : > { %1314 = vmatprep.subr.bf16.mxu0 %v1458_v0  ;;  %1316 = vmatprep.mubr.msk.bf16.mxu0 %vm1459_vm0, %v1458_v0  ;;  %s1532_s28 = sshll.u32 %s1748_s24, 2  ;;  %s1276_s29 = sshll.u32 %s1748_s24, 3  ;;  %vm426_vm4 = vcmask 7168   ;;  %v1461_v9 = vmov -inf   ;;  %v450_v10 = vlaneseq  ;;  %vm540_vm8 = vcmask 1043456  }
   0xe   : > { %1404 = vset.pattern.permute.xlu0 %v1460_v1  ;;  %1405 = vset.pattern.permute.xlu1 %v1460_v1  ;;  %s393_s9 = scalar_lea.vmem %s1734_s1, %s1532_s28  ;;  %s407_s12 = scalar_lea.vmem %s1736_s3, %s1276_s29  ;;  %427 = vst.msk [vmem:[#allocation2] sm:$0xff] %vm426_vm4, %v1461_v9  ;;  %428 = vst.msk [vmem:[#allocation2 + $0x8] sm:$0xff] %vm426_vm4, %v1461_v9  ;;  %vm435_vm9 = vcmask 261120   ;;  %vm734_vm10 = vcmask 130112   ;;  %vm875_vm11 = vcmask 195712   ;;  %vm1016_vm12 = vcmask 261312  }
   0xf   : > { %1320 = vmatprep.subr.bf16.mxu1 %v1458_v0  ;;  %1322 = vmatprep.mubr.msk.bf16.mxu1 %vm1459_vm0, %v1458_v0  ;;  %v438_v2 = vld [vmem:[%s393_s9] sm:$0xf]  ;;  %s413_s15 = scalar_lea.vmem %s1737_s4, %s1748_s24  ;;  %s386_s18 = scalar_lea.vmem %s1733_s0, %s1532_s28  ;;  %429 = vst.msk [vmem:[#allocation2 + $0x10] sm:$0xff] %vm426_vm4, %v1461_v9  ;;  %430 = vst.msk [vmem:[#allocation2 + $0x18] sm:$0xff] %vm426_vm4, %v1461_v9  ;;  %v451_v11 = vshrl.u32 %v450_v10, 7  ;;  %vm1132_vm13 = vcmask 257024  }
  0x10   : > { %v461_v3 = vsel %vm456_vm1, %v438_v2, 0  ;;  %v440_v4 = vld [vmem:[%s407_s12] sm:$0xff]  ;;  %431 = vst.msk [vmem:[#allocation3] sm:$0xff] %vm426_vm4, %v1458_v0  ;;  %432 = vst.msk [vmem:[#allocation3 + $0x8] sm:$0xff] %vm426_vm4, %v1458_v0  ;;  %v1281_v26 = vcombine.low %v438_v2, %v438_v2  ;;  %s400_s21 = scalar_lea.vmem %s1735_s2, %s1532_s28  ;;  %s1464_s24 = smov 104  }
  0x11   : > { %v442_v5 = vld [vmem:[%s413_s15] sm:$0x1]  ;;  %1315 = vmatpush3.bf16.xpose.msra.mxu0 %v461_v3  ;;  %vm441_vm2 = vcmp.gt.f32.partialorder %v440_v4, 0.5  ;;  %433 = vst.msk [vmem:[#allocation3 + $0x10] sm:$0xff] %vm426_vm4, %v1458_v0  ;;  %434 = vst.msk [vmem:[#allocation3 + $0x18] sm:$0xff] %vm426_vm4, %v1458_v0  ;;  %v452_v12 = vsub.s32 0, %v451_v11  ;;  %s420_s17 = scalar_lea.vmem %s1740_s7, %s1532_s28 }
  0x12   : > { %vm443_vm3 = vcmp.gt.f32.partialorder %v442_v5, 0.5  ;;  %v444_v6 = vsel %vm441_vm2, 1, %v1460_v1  ;;  %1332 = vmatprep.subr.bf16.mxu0 %v1458_v0  ;;  %v437_v8 = vld [vmem:[%s386_s18] sm:$0xf]  ;;  %436 = vst.msk [vmem:[#allocation4] sm:$0xff] %vm435_vm9, %v1458_v0  ;;  %s1465_s29 = smov 8  }
  0x13   : > { %v449_v7 = vsel %vm443_vm3, 1, %v1460_v1  ;;  %446 = vperm.xlu0 %1404, %v444_v6   ;;  %v1586_v28 = vld [vmem:[%s400_s21] sm:$0xf]  ;;  %v1280_v30 = vcombine.low %v437_v8, %v437_v8 }
  0x14   : > { %v453_v13 = vrot.slane %v449_v7, %v452_v12  ;;  %v542_v29 = vsel %vm540_vm8, %v1586_v28, 0  ;;  %v1283_v10 = vcombine.low %v1586_v28, %v1586_v28 }
  0x15   : > { %v1572_v23 = vld [vmem:[#allocation2] sm:$0xff]  ;;  %1321 = vmatpush3.bf16.msra.mxu1 %v542_v29  ;;  %v1630_v7 = vld [vmem:[#allocation2 + $0x8] sm:$0xff] }
  0x16   : > { %vm454_vm5 = vcmp.eq.s32.totalorder %v453_v13, 1  ;;  %1326 = vmatprep.subr.bf16.mxu1 %v1458_v0  ;;  %v1642_v12 = vld [vmem:[#allocation2 + $0x10] sm:$0xff] }
  0x18   : > { %1317 = vmatmul.mubr.msk.bf16.vlgmr.msra.gmra.mxu0 %vm456_vm1, %v437_v8 }
  0x19   : > { %1334 = vmatprep.mubr.msk.bf16.mxu0 %vm1459_vm0, %v1458_v0 }
  0x8e   : > { %v447_v14 = vpop.permute.xlu0 %446 }
  0x8f   : > { %vm448_vm6 = vcmp.eq.s32.totalorder %v447_v14, 1 }
  0x90   : > { %vm1565_vm7 = vmand %vm448_vm6, %vm454_vm5 }
  0xd8   : > { %v497_v16 = vpop.f32.mrf.mxu0 }
  0xd9   : > { %v503_v17 = vmul.f32 0.35355338, %v497_v16  ;;  %v1653_v16 = vld [vmem:[#allocation2 + $0x18] sm:$0xff] }
  0xda   : > { %v1318_v18 = vpop.f32.mrf.mxu0 }
  0xdb   : > { %v504_v19 = vsel %vm1565_vm7, %v503_v17, -1e+09 }
  0xdc   : > { %v500_v20 = vpop.f32.mrf.mxu0  ;;  %v506_v21 = vsel %vm456_vm1, %v504_v19, -inf }
  0xdd   : > { %507 = vmax.xlane.f32.xlu0 %v506_v21 }
  0xde   : > { %v1319_v22 = vpop.f32.mrf.mxu0 }
 0x166   : > { %v508_v24 = vpop.xlane.xlu0 %507 }
 0x167   : > { %v1575_v25 = vmax.f32 %v1572_v23, %v508_v24 }
 0x169   : > { %v510_v27 = vsub.f32 %v1572_v23, %v1575_v25  ;;  %586 = vst.msk [vmem:[#allocation2] sm:$0xff] %vm426_vm4, %v1575_v25  ;;  %515 = vperm.xlu1 %1405, %v1575_v25  }
 0x16d   : > { %595 = vrot.lane.b32.xlu1 %v1281_v26, %s1462_s22 }
 0x171   : > { %590 = vrot.lane.b32.xlu1 %v1280_v30, %s1462_s22 }
 0x175   : > { %739 = vrot.lane.b32.xlu1 %v1281_v26, %s1463_s23 }
 0x179   : > { %737 = vrot.lane.b32.xlu1 %v1280_v30, %s1463_s23 }
 0x17d   : > { %880 = vrot.lane.b32.xlu1 %v1281_v26, %s1464_s24 }
 0x181   : > { %878 = vrot.lane.b32.xlu1 %v1280_v30, %s1464_s24 }
 0x1e4   : > { %v516_v31 = vpop.permute.xlu1 %515 }
 0x1e5   : > { %v518_v32 = vsub.f32 %v504_v19, %v516_v31 }
 0x1e7   : > { %v519_v33 = vmul.f32 1.442695, %v518_v32 }
 0x1e8   : > { %v596_v34 = vpop.permute.xlu1 %595 }
 0x1e9   : > { %1410 = vpow2.f32 %v519_v33  ;;  %v601_v37 = vsel %vm456_vm1, %v596_v34, 0 }
 0x1ec   : > { %v591_v35 = vpop.permute.xlu1 %590 }
 0x1f0   : > { %v740_v39 = vpop.permute.xlu1 %739 }
 0x1f1   : > { %v745_v41 = vsel %vm456_vm1, %v740_v39, 0 }
 0x1f4   : > { %v738_v40 = vpop.permute.xlu1 %737 }
 0x1f6   : > { %v1597_v36 = vpop.eup %1410 }
 0x1f7   : > { %v536_v38 = vpack.c.bf16 %v1597_v36, %v1597_v36  ;;  %v523_v20 = vsel %vm456_vm1, %v1597_v36, 0.0 }
 0x1f8   : > { %v881_v42 = vpop.permute.xlu1 %880 }
 0x1f9   : > { %1323 = vmatmul.mubr.msk.bf16.vlgmr.msra.gmra.mxu1 %vm456_vm1, %v536_v38  ;;  %v886_v43 = vsel %vm456_vm1, %v881_v42, 0 }
 0x1fa   : > { %1327 = vmatpush3.bf16.xpose.msra.mxu1 %v601_v37  ;;  %1328 = vmatprep.mubr.msk.bf16.mxu1 %vm1459_vm0, %v1458_v0 }
 0x1fb   : > { %1338 = vmatprep.subr.bf16.mxu1 %v1458_v0 }
 0x1fc   : > { %v879_v44 = vpop.permute.xlu1 %878 }
 0x201   : > { %1329 = vmatmul.mubr.msk.bf16.vlgmr.msra.gmra.mxu1 %vm456_vm1, %v591_v35  ;;  %v511_v35 = vmul.f32 1.442695, %v510_v27 }
 0x202   : > { %1339 = vmatpush3.bf16.xpose.msra.mxu1 %v745_v41  ;;  %1340 = vmatprep.mubr.msk.bf16.mxu1 %vm1459_vm0, %v1458_v0 }
 0x203   : > { %1350 = vmatprep.subr.bf16.mxu1 %v1458_v0 }
 0x209   : > { %1341 = vmatmul.mubr.msk.bf16.vlgmr.msra.gmra.mxu1 %vm456_vm1, %v738_v40 }
 0x20a   : > { %1351 = vmatpush3.bf16.xpose.msra.mxu1 %v886_v43  ;;  %1352 = vmatprep.mubr.msk.bf16.mxu1 %vm1459_vm0, %v1458_v0 }
 0x20b   : > { %1362 = vmatprep.subr.bf16.mxu1 %v1458_v0 }
 0x211   : > { %1353 = vmatmul.mubr.msk.bf16.vlgmr.msra.gmra.mxu1 %vm456_vm1, %v879_v44 }
 0x212   : > { %1366 = vmatprep.mubr.msk.bf16.mxu1 %vm1459_vm0, %v1458_v0 }
 0x2b9   : > { %v1619_v45 = vpop.f32.mrf.mxu1 }
 0x2bb   : > { %v1324_v46 = vpop.f32.mrf.mxu1 }
 0x2bd   : > { %v581_v47 = vpop.f32.mrf.mxu1 }
 0x2bf   : > { %v1325_v48 = vpop.f32.mrf.mxu1 }
 0x2c1   : > { %v637_v49 = vpop.f32.mrf.mxu1 }
 0x2c2   : > { %v643_v50 = vmul.f32 0.35355338, %v637_v49 }
 0x2c3   : > { %v1330_v51 = vpop.f32.mrf.mxu1 }
 0x2c4   : > { %v644_v52 = vsel %vm1565_vm7, %v643_v50, -1e+09  ;;  %v521_v50 = vld [vmem:[#allocation3] sm:$0xff] }
 0x2c5   : > { %v640_v53 = vpop.f32.mrf.mxu1  ;;  %v647_v54 = vsel %vm456_vm1, %v644_v52, -inf }
 0x2c6   : > { %648 = vmax.xlane.f32.xlu1 %v647_v54 }
 0x2c7   : > { %v1331_v55 = vpop.f32.mrf.mxu1 }
 0x2c9   : > { %v781_v56 = vpop.f32.mrf.mxu1 }
 0x2ca   : > { %v787_v57 = vmul.f32 0.35355338, %v781_v56  ;;  %v663_v56 = vld [vmem:[#allocation3 + $0x8] sm:$0xff] }
 0x2cb   : > { %v1342_v58 = vpop.f32.mrf.mxu1 }
 0x2cc   : > { %v788_v59 = vsel %vm1565_vm7, %v787_v57, -1e+09 }
 0x2cd   : > { %v784_v60 = vpop.f32.mrf.mxu1  ;;  %v791_v61 = vsel %vm456_vm1, %v788_v59, -inf }
 0x2ce   : > { %792 = vmax.xlane.f32.xlu0 %v791_v61  ;;  %v529_v60 = vld [vmem:[#allocation4] sm:$0xff] }
 0x2cf   : > { %v1343_v62 = vpop.f32.mrf.mxu1 }
 0x2d1   : > { %v922_v63 = vpop.f32.mrf.mxu1 }
 0x2d2   : > { %v928_v1 = vmul.f32 0.35355338, %v922_v63  ;;  %v807_v63 = vld [vmem:[#allocation3 + $0x10] sm:$0xff] }
 0x2d3   : > { %v1354_v2 = vpop.f32.mrf.mxu1 }
 0x2d4   : > { %v929_v3 = vsel %vm1565_vm7, %v928_v1, -1e+09 }
 0x2d5   : > { %v925_v4 = vpop.f32.mrf.mxu1  ;;  %v932_v5 = vsel %vm456_vm1, %v929_v3, -inf }
 0x2d6   : > { %933 = vmax.xlane.f32.xlu0 %v932_v5 }
 0x2d7   : > { %v1355_v6 = vpop.f32.mrf.mxu1 }
 0x34f   : > { %v649_v8 = vpop.xlane.xlu1 %648 }
 0x350   : > { %v1633_v9 = vmax.f32 %v1630_v7, %v649_v8 }
 0x352   : > { %v651_v11 = vsub.f32 %v1630_v7, %v1633_v9  ;;  %736 = vst.msk [vmem:[#allocation2 + $0x8] sm:$0xff] %vm426_vm4, %v1633_v9  ;;  %656 = vperm.xlu0 %1404, %v1633_v9   ;;  %v948_v7 = vld [vmem:[#allocation3 + $0x18] sm:$0xff] }
 0x354   : > { %v652_v48 = vmul.f32 1.442695, %v651_v11 }
 0x356   : > { %681 = vrot.lane.b32.xlu0 %v1283_v10, %s1462_s22 }
 0x357   : > { %v793_v13 = vpop.xlane.xlu0 %792 }
 0x358   : > { %v1646_v14 = vmax.f32 %v1642_v12, %v793_v13 }
 0x35a   : > { %v795_v15 = vsub.f32 %v1642_v12, %v1646_v14  ;;  %877 = vst.msk [vmem:[#allocation2 + $0x10] sm:$0xff] %vm426_vm4, %v1646_v14  ;;  %800 = vperm.xlu1 %1405, %v1646_v14  }
 0x35c   : > { %v796_v54 = vmul.f32 1.442695, %v795_v15 }
 0x35f   : > { %v934_v17 = vpop.xlane.xlu0 %933 }
 0x360   : > { %v1656_v18 = vmax.f32 %v1653_v16, %v934_v17 }
 0x362   : > { %v936_v19 = vsub.f32 %v1653_v16, %v1656_v18  ;;  %1018 = vst.msk [vmem:[#allocation2 + $0x18] sm:$0xff] %vm426_vm4, %v1656_v18  ;;  %941 = vperm.xlu0 %1404, %v1656_v18  }
 0x364   : > { %v937_v55 = vmul.f32 1.442695, %v936_v19 }
 0x366   : > { %822 = vrot.lane.b32.xlu0 %v1283_v10, %s1463_s23 }
 0x36a   : > { %963 = vrot.lane.b32.xlu0 %v1283_v10, %s1464_s24 }
 0x389   : > { %524 = vadd.xlane.f32.xlu0 %v523_v20 }
 0x3cd   : > { %v657_v21 = vpop.permute.xlu0 %656 }
 0x3ce   : > { %v659_v22 = vsub.f32 %v644_v52, %v657_v21 }
 0x3d0   : > { %v660_v24 = vmul.f32 1.442695, %v659_v22 }
 0x3d1   : > { %v682_v26 = vpop.permute.xlu0 %681 }
 0x3d2   : > { %1412 = vpow2.f32 %v660_v24  ;;  %v687_v28 = vsel %vm540_vm8, %v682_v26, 0 }
 0x3d3   : > { %1333 = vmatpush3.bf16.msra.mxu0 %v687_v28 }
 0x3d4   : > { %1344 = vmatprep.subr.bf16.mxu0 %v1458_v0 }
 0x3d5   : > { %v801_v29 = vpop.permute.xlu1 %800 }
 0x3d6   : > { %v803_v30 = vsub.f32 %v788_v59, %v801_v29  ;;  %v1408_v29 = vld [vmem:[%s1738_s5 + $0x8] sm:$0xff]  }
 0x3d7   : > { %1363 = vmatpush3.bf16.msra.mxu1 %v1408_v29 }
 0x3d8   : > { %v804_v31 = vmul.f32 1.442695, %v803_v30  ;;  %v1409_v30 = vld [vmem:[%s1738_s5] sm:$0xff]   ;;  %1364 = vmatprep.subr.bf16.mxu1 %v1458_v0 }
 0x3da   : > { %1414 = vpow2.f32 %v804_v31 }
 0x3db   : > { %1365 = vmatpush3.bf16.msra.mxu1 %v1409_v30 }
 0x3dd   : > { %v942_v32 = vpop.permute.xlu0 %941 }
 0x3de   : > { %v944_v33 = vsub.f32 %v929_v3, %v942_v32 }
 0x3df   : > { %v1413_v34 = vpop.eup %1412 }
 0x3e0   : > { %v945_v36 = vmul.f32 1.442695, %v944_v33  ;;  %v665_v37 = vsel %vm456_vm1, %v1413_v34, 0.0  ;;  %v677_v38 = vpack.c.bf16 %v1413_v34, %v1413_v34 }
 0x3e1   : > { %666 = vadd.xlane.f32.xlu1 %v665_v37  ;;  %v823_v39 = vpop.permute.xlu0 %822 }
 0x3e2   : > { %1416 = vpow2.f32 %v945_v36  ;;  %1335 = vmatmul.mubr.msk.bf16.vlgmr.msra.gmra.mxu0 %vm456_vm1, %v677_v38  ;;  %v828_v40 = vsel %vm540_vm8, %v823_v39, 0 }
 0x3e3   : > { %1345 = vmatpush3.bf16.msra.mxu0 %v828_v40  ;;  %1346 = vmatprep.mubr.msk.bf16.mxu0 %vm1459_vm0, %v1458_v0  ;;  %1418 = vpow2.f32 %v511_v35 }
 0x3e4   : > { %1356 = vmatprep.subr.bf16.mxu0 %v1458_v0  ;;  %1420 = vpow2.f32 %v652_v48 }
 0x3e5   : > { %v964_v23 = vpop.permute.xlu0 %963  ;;  %1422 = vpow2.f32 %v796_v54 }
 0x3e6   : > { %v969_v42 = vsel %vm540_vm8, %v964_v23, 0  ;;  %1424 = vpow2.f32 %v937_v55 }
 0x3e7   : > { %v1415_v25 = vpop.eup %1414 }
 0x3e8   : > { %v809_v27 = vsel %vm456_vm1, %v1415_v25, 0.0  ;;  %v821_v41 = vpack.c.bf16 %v1415_v25, %v1415_v25 }
 0x3e9   : > { %810 = vadd.xlane.f32.xlu0 %v809_v27 }
 0x3ea   : > { %1347 = vmatmul.mubr.msk.bf16.vlgmr.msra.gmra.mxu0 %vm456_vm1, %v821_v41 }
 0x3eb   : > { %1357 = vmatpush3.bf16.msra.mxu0 %v969_v42  ;;  %1358 = vmatprep.mubr.msk.bf16.mxu0 %vm1459_vm0, %v1458_v0 }
 0x3ef   : > { %v1417_v43 = vpop.eup %1416 }
 0x3f0   : > { %v950_v44 = vsel %vm456_vm1, %v1417_v43, 0.0  ;;  %v962_v46 = vpack.c.bf16 %v1417_v43, %v1417_v43  ;;  %v1419_v47 = vpop.eup %1418 }
 0x3f1   : > { %951 = vadd.xlane.f32.xlu0 %v950_v44  ;;  %v1421_v49 = vpop.eup %1420  ;;  %v522_v51 = vmul.f32 %v1419_v47, %v521_v50 }
 0x3f2   : > { %1359 = vmatmul.mubr.msk.bf16.vlgmr.msra.gmra.mxu0 %vm456_vm1, %v962_v46  ;;  %532 = vperm.xlu1 %1405, %v1419_v47   ;;  %v664_v57 = vmul.f32 %v1421_v49, %v663_v56  ;;  %v1423_v61 = vpop.eup %1422 }
 0x3f3   : > { %v808_v3 = vmul.f32 %v1423_v61, %v807_v63  ;;  %v1425_v6 = vpop.eup %1424 }
 0x3f4   : > { %v949_v8 = vmul.f32 %v1425_v6, %v948_v7 }
 0x407   : > { %673 = vperm.xlu0 %1404, %v1421_v49  }
 0x412   : > { %v525_v52 = vpop.xlane.xlu0 %524 }
 0x413   : > { %v526_v53 = vadd.f32 %v525_v52, %v522_v51 }
 0x415   : > { %528 = vst.msk [vmem:[#allocation3] sm:$0xff] %vm426_vm4, %v526_v53 }
 0x41c   : > { %v1023_v15 = vld [vmem:[#allocation3] sm:$0xff] }
 0x46a   : > { %v667_v58 = vpop.xlane.xlu1 %666 }
 0x46b   : > { %v668_v59 = vadd.f32 %v667_v58, %v664_v57 }
 0x46d   : > { %669 = vst.msk [vmem:[#allocation3 + $0x8] sm:$0xff] %vm426_vm4, %v668_v59 }
 0x46e   : > { %v533_v62 = vpop.permute.xlu1 %532 }
 0x46f   : > { %v535_v1 = vmul.f32 %v533_v62, %v529_v60 }
 0x471   : > { %v584_v2 = vadd.f32 %v1619_v45, %v535_v1 }
 0x472   : > { %v811_v4 = vpop.xlane.xlu0 %810 }
 0x473   : > { %585 = vst.msk [vmem:[#allocation4] sm:$0xff] %vm456_vm1, %v584_v2  ;;  %v812_v5 = vadd.f32 %v811_v4, %v808_v3 }
 0x474   : > { %v1033_v20 = vld [vmem:[#allocation3 + $0x8] sm:$0xff] }
 0x475   : > { %813 = vst.msk [vmem:[#allocation3 + $0x10] sm:$0xff] %vm426_vm4, %v812_v5 }
 0x47a   : > { %v952_v9 = vpop.xlane.xlu0 %951  ;;  %v670_v32 = vld [vmem:[#allocation4] sm:$0xff] }
 0x47b   : > { %v953_v10 = vadd.f32 %v952_v9, %v949_v8 }
 0x47c   : > { %v1043_v26 = vld [vmem:[#allocation3 + $0x10] sm:$0xff] }
 0x47d   : > { %954 = vst.msk [vmem:[#allocation3 + $0x18] sm:$0xff] %vm426_vm4, %v953_v10 }
 0x482   : > { %v674_v31 = vpop.permute.xlu0 %673 }
 0x483   : > { %v676_v33 = vmul.f32 %v674_v31, %v670_v32 }
 0x484   : > { %v1053_v24 = vld [vmem:[#allocation3 + $0x18] sm:$0xff] }
 0x4a2   : > { %v723_v11 = vpop.f32.mrf.mxu0 }
 0x4a3   : > { %730 = vrot.lane.b32.xlu1 %v723_v11, %s1465_s29 }
 0x4a4   : > { %v1336_v12 = vpop.f32.mrf.mxu0 }
 0x4a6   : > { %v726_v13 = vpop.f32.mrf.mxu0 }
 0x4a7   : > { %817 = vperm.xlu1 %1405, %v1423_v61   ;;  %v1289_v61 = vld [vmem:[%s1739_s6] ss:$0 sm:$0xff] }
 0x4a8   : > { %v1337_v45 = vpop.f32.mrf.mxu0 }
 0x4aa   : > { %v864_v14 = vpop.f32.mrf.mxu0 }
 0x4ab   : > { %1026 = vperm.xlu1 %1405, %v1023_v15   ;;  %871 = vrot.lane.b32.xlu0 %v864_v14, %s1466_s30 }
 0x4ac   : > { %v1348_v16 = vpop.f32.mrf.mxu0 }
 0x4ae   : > { %v867_v17 = vpop.f32.mrf.mxu0 }
 0x4af   : > { %958 = vperm.xlu0 %1404, %v1425_v6  }
 0x4b0   : > { %v1349_v18 = vpop.f32.mrf.mxu0 }
 0x4b2   : > { %v1005_v19 = vpop.f32.mrf.mxu0 }
 0x4b3   : > { %1036 = vperm.xlu0 %1404, %v1033_v20   ;;  %1012 = vrot.lane.b32.xlu1 %v1005_v19, %s1467_s8 }
 0x4b4   : > { %v1360_v21 = vpop.f32.mrf.mxu0 }
 0x4b6   : > { %v1008_v22 = vpop.f32.mrf.mxu0 }
 0x4b7   : > { %1056 = vperm.xlu0 %1404, %v1053_v24   ;;  %1046 = vperm.xlu1 %1405, %v1043_v26  }
 0x4b8   : > { %v1361_v28 = vpop.f32.mrf.mxu0 }
 0x515   : > { %v731_v34 = vpop.permute.xlu1 %730 }
 0x516   : > { %v733_v35 = vadd.f32 %v731_v34, %v676_v33 }
 0x518   : > { %735 = vst.msk [vmem:[#allocation4] sm:$0xff] %vm734_vm10, %v733_v35 }
 0x51d   : > { %v872_v39 = vpop.permute.xlu0 %871 }
 0x51f   : > { %v814_v36 = vld [vmem:[#allocation4] sm:$0xff] }
 0x522   : > { %v818_v37 = vpop.permute.xlu1 %817 }
 0x523   : > { %v820_v38 = vmul.f32 %v818_v37, %v814_v36 }
 0x525   : > { %v874_v40 = vadd.f32 %v872_v39, %v820_v38 }
 0x526   : > { %v1027_v23 = vpop.permute.xlu1 %1026 }
 0x527   : > { %876 = vst.msk [vmem:[#allocation4] sm:$0xff] %vm875_vm11, %v874_v40  ;;  %1426 = vrcp.f32 %v1027_v23 }
 0x52a   : > { %v959_v25 = vpop.permute.xlu0 %958  ;;  %v1013_v41 = vpop.permute.xlu1 %1012 }
 0x52e   : > { %v955_v0 = vld [vmem:[#allocation4] sm:$0xff]  ;;  %v1037_v43 = vpop.permute.xlu0 %1036 }
 0x52f   : > { %v961_v27 = vmul.f32 %v959_v25, %v955_v0  ;;  %1428 = vrcp.f32 %v1037_v43 }
 0x531   : > { %v1015_v42 = vadd.f32 %v1013_v41, %v961_v27 }
 0x532   : > { %v1047_v48 = vpop.permute.xlu1 %1046  ;;  %v1057_v52 = vpop.permute.xlu0 %1056 }
 0x533   : > { %1017 = vst.msk [vmem:[#allocation4] sm:$0xff] %vm1016_vm12, %v1015_v42  ;;  %1430 = vrcp.f32 %v1047_v48 }
 0x534   : > { %v1427_v44 = vpop.eup %1426  ;;  %1432 = vrcp.f32 %v1057_v52 }
 0x53a   : > { %v1022_v46 = vld [vmem:[#allocation4] sm:$0xff] }
 0x53b   : > { %v1030_v47 = vmul.f32 %v1427_v44, %v1022_v46 }
 0x53c   : > { %v1429_v49 = vpop.eup %1428 }
 0x53d   : > { %1031 = vst.msk [vmem:[#allocation4] sm:$0xff] %vm456_vm1, %v1030_v47 }
 0x540   : > { %v1431_v53 = vpop.eup %1430 }
 0x541   : > { %v1433_v56 = vpop.eup %1432 }
 0x544   : > { %v1032_v50 = vld [vmem:[#allocation4] sm:$0xff] }
 0x545   : > { %v1040_v51 = vmul.f32 %v1429_v49, %v1032_v50 }
 0x547   : > { %1041 = vst.msk [vmem:[#allocation4] sm:$0xff] %vm734_vm10, %v1040_v51 }
 0x54e   : > { %v1042_v54 = vld [vmem:[#allocation4] sm:$0xff] }
 0x54f   : > { %v1050_v55 = vmul.f32 %v1431_v53, %v1042_v54 }
 0x551   : > { %1051 = vst.msk [vmem:[#allocation4] sm:$0xff] %vm875_vm11, %v1050_v55 }
 0x558   : > { %v1052_v57 = vld [vmem:[#allocation4] sm:$0xff] }
 0x559   : > { %v1060_v58 = vmul.f32 %v1433_v56, %v1052_v57 }
 0x55b   : > { %1061 = vst.msk [vmem:[#allocation4] sm:$0xff] %vm1016_vm12, %v1060_v58 }
 0x562   : > { %v1062_v59 = vld [vmem:[#allocation4] sm:$0xff] }
 0x563   : > { %v1063_v60 = vpack.c.bf16 %v1062_v59, %v1062_v59 }
 0x565   : > { %1367 = vmatmul.mubr.msk.bf16.vlgmr.msra.gmra.mxu1 %vm435_vm9, %v1063_v60 }
 0x625   : > { %v1125_v62 = vpop.f32.mrf.mxu1 }
 0x626   : > { %v1126_v63 = vadd.f32 %v1289_v61, %v1125_v62 }
 0x627   : > { %v1368_v1 = vpop.f32.mrf.mxu1 }
 0x628   : > { %v1131_v2 = vpack.c.bf16 %v1126_v63, %v1126_v63 }
 0x629   : > { %v1128_v3 = vpop.f32.mrf.mxu1 }
 0x62a   : > { %1133 = vst.msk [vmem:[%s420_s17] sm:$0xf] %vm1132_vm13, %v1131_v2 }
 0x62b   : > { %v1369_v4 = vpop.f32.mrf.mxu1 }
 0x62c PF: > { %s17_s26 = sadd.s32 1, %s1456_s26   ;;  %s1743_s24 = smov %s1452_s25 }
 0x62d   : > { %p14_p5 = scmp.ge.s32.totalorder %s17_s26, 4   ;;  %s1744_s25 = smov %s1746_s27 }
 0x62f   :  { %16 = sbr.rel (!%p14_p5) target bundleno = 2 (0x2), region = 104 }

// kernel: transformer_forward.43
= control target key start
LH: loop header
LB: loop body
LE: loop exit
PB: predicated region body
PF: predicated region fallthrough
CT: control target
= control target key end

     0   :  { %v145_v0 = vmov 0.0   ;;  %vm146_vm0 = vmmov 0   ;;  %vm47_vm1 = vcmask 261120   ;;  %vm100_vm2 = vcmask 257024   ;;  %s201_s1 = inlined_call_operand.vmem [shape: bf16[32,64], index: 1, kind: input, shape index: {}]   ;;  %s202_s0 = inlined_call_operand.vmem [shape: bf16[16,32], index: 0, kind: input, shape index: {}]   ;;  %s203_s2 = inlined_call_operand.vmem [shape: f32[1,64], index: 2, kind: input, shape index: {}]   ;;  %s204_s3 = inlined_call_operand.vmem [shape: bf16[16,32], index: 3, kind: output, shape index: {0}]   ;;  %s205_s4 = inlined_call_operand.vmem [shape: bf16[16,32], index: 4, kind: output, shape index: {1}]  }
   0x1   :  { %131 = vmatprep.subr.bf16.mxu0 %v145_v0  ;;  %v142_v1 = vld [vmem:[%s201_s1 + $0x8] sm:$0xff]   ;;  %135 = vmatprep.mubr.msk.bf16.mxu0 %vm146_vm0, %v145_v0  ;;  %v143_v2 = vld [vmem:[%s201_s1] sm:$0xff]  }
   0x2   :  { %132 = vmatpush3.bf16.msra.mxu0 %v142_v1  ;;  %v144_v3 = vld [vmem:[%s202_s0] sm:$0xff]   ;;  %s147_s0 = smov 96  }
   0x3   :  { %133 = vmatprep.subr.bf16.mxu0 %v145_v0  ;;  %v119_v4 = vld [vmem:[%s203_s2] ss:$0 sm:$0xff] }
   0x6   :  { %134 = vmatpush3.bf16.msra.mxu0 %v143_v2 }
   0x9   :  { %136 = vmatmul.mubr.msk.bf16.vlgmr.msra.gmra.mxu0 %vm47_vm1, %v144_v3 }
  0xc9   :  { %v85_v5 = vpop.f32.mrf.mxu0 }
  0xca   :  { %v86_v6 = vadd.f32 %v119_v4, %v85_v5 }
  0xcb   :  { %v137_v7 = vpop.f32.mrf.mxu0 }
  0xcc   :  { %v126_v8 = vpack.c.bf16 %v86_v6, %v86_v6 }
  0xcd   :  { %v88_v9 = vpop.f32.mrf.mxu0 }
  0xce   :  { %101 = vst.msk [vmem:[%s204_s3] sm:$0xf] %vm100_vm2, %v126_v8  ;;  %v89_v10 = vadd.f32 %v119_v4, %v88_v9  ;;  %103 = vrot.lane.b32.xlu0 %v126_v8, %s147_s0 }
  0xcf   :  { %v138_v11 = vpop.f32.mrf.mxu0 }
  0xd0   :  { %v127_v12 = vpack.c.bf16 %v89_v10, %v89_v10 }
  0xd2   :  { %102 = vst.msk [vmem:[%s204_s3 + $0x4] sm:$0xf] %vm100_vm2, %v127_v12  ;;  %105 = vrot.lane.b32.xlu0 %v127_v12, %s147_s0 }
 0x140   :  { %v104_v13 = vpop.permute.xlu0 %103 }
 0x141   :  { %109 = vst.msk [vmem:[%s205_s4] sm:$0xf] %vm100_vm2, %v104_v13 }
 0x144   :  { %v106_v14 = vpop.permute.xlu0 %105 }
 0x145   :  { %110 = vst.msk [vmem:[%s205_s4 + $0x4] sm:$0xf] %vm100_vm2, %v106_v14 }

// kernel: transformer_forward.42
= control target key start
LH: loop header
LB: loop body
LE: loop exit
PB: predicated region body
PF: predicated region fallthrough
CT: control target
= control target key end

     0   :  { %v130_v0 = vmov 0.0   ;;  %vm131_vm0 = vmmov 0   ;;  %vm45_vm1 = vcmask 261120   ;;  %vm98_vm2 = vcmask 257024   ;;  %s170_s1 = inlined_call_operand.vmem [shape: bf16[32,32], index: 1, kind: input, shape index: {}]   ;;  %s171_s0 = inlined_call_operand.vmem [shape: bf16[16,32], index: 0, kind: input, shape index: {}]   ;;  %s172_s2 = inlined_call_operand.vmem [shape: f32[1,32], index: 2, kind: input, shape index: {}]   ;;  %s173_s3 = inlined_call_operand.vmem [shape: bf16[16,32], index: 3, kind: output, shape index: {}]  }
   0x1   :  { %117 = vmatprep.subr.bf16.mxu0 %v130_v0  ;;  %v127_v1 = vld [vmem:[%s170_s1 + $0x8] sm:$0xff]   ;;  %121 = vmatprep.mubr.msk.bf16.mxu0 %vm131_vm0, %v130_v0  ;;  %v128_v2 = vld [vmem:[%s170_s1] sm:$0xff]  }
   0x2   :  { %118 = vmatpush3.bf16.msra.mxu0 %v127_v1  ;;  %v129_v3 = vld [vmem:[%s171_s0] sm:$0xff]  }
   0x3   :  { %119 = vmatprep.subr.bf16.mxu0 %v130_v0  ;;  %v105_v4 = vld [vmem:[%s172_s2] ss:$0 sm:$0xff] }
   0x6   :  { %120 = vmatpush3.bf16.msra.mxu0 %v128_v2 }
   0x9   :  { %122 = vmatmul.mubr.msk.bf16.vlgmr.msra.gmra.mxu0 %vm45_vm1, %v129_v3 }
  0xc9   :  { %v83_v5 = vpop.f32.mrf.mxu0 }
  0xca   :  { %v84_v6 = vadd.f32 %v105_v4, %v83_v5 }
  0xcb   :  { %v123_v7 = vpop.f32.mrf.mxu0 }
  0xcc   :  { %v112_v8 = vpack.c.bf16 %v84_v6, %v84_v6 }
  0xcd   :  { %v86_v9 = vpop.f32.mrf.mxu0 }
  0xce   :  { %99 = vst.msk [vmem:[%s173_s3] sm:$0xf] %vm98_vm2, %v112_v8  ;;  %v87_v10 = vadd.f32 %v105_v4, %v86_v9 }
  0xcf   :  { %v124_v11 = vpop.f32.mrf.mxu0 }
  0xd0   :  { %v113_v12 = vpack.c.bf16 %v87_v10, %v87_v10 }
  0xd2   :  { %100 = vst.msk [vmem:[%s173_s3 + $0x4] sm:$0xf] %vm98_vm2, %v113_v12 }

// kernel: transformer_forward.57
= control target key start
LH: loop header
LB: loop body
LE: loop exit
PB: predicated region body
PF: predicated region fallthrough
CT: control target
= control target key end

     0   :  { %v156_v1 = vmov 0.0   ;;  %vm157_vm0 = vmmov 0   ;;  %s196_s0 = inlined_call_operand.vmem [shape: bf16[16,32], index: 0, kind: input, shape index: {}]   ;;  %s197_s1 = inlined_call_operand.vmem [shape: bf16[32,16], index: 1, kind: input, shape index: {}]   ;;  %s198_s2 = inlined_call_operand.vmem [shape: f32[1,16], index: 2, kind: input, shape index: {}]   ;;  %s199_s3 = inlined_call_operand.hbm [shape: f32[16,16], index: 3, kind: output, shape index: {}]  }
   0x1   :  { %v131_v0 = vld [vmem:[%s197_s1 + $0x8] sm:$0xff]   ;;  %118 = vmatprep.subr.bf16.mxu0 %v156_v1  ;;  %v132_v2 = vld [vmem:[%s197_s1] sm:$0xff]   ;;  %122 = vmatprep.mubr.msk.bf16.mxu0 %vm157_vm0, %v156_v1 }
   0x2   :  { %119 = vmatpush3.bf16.msra.mxu0 %v131_v0 }
   0x3   :  { %120 = vmatprep.subr.bf16.mxu0 %v156_v1 }
   0x4   :  { %8 = vsyncpa [#allocation3], 0  ;;  %v133_v3 = vld [vmem:[%s196_s0] sm:$0xff]   ;;  %vm46_vm1 = vcmask 261120   ;;  %vm91_vm2 = vcmask 130048   ;;  %s158_s20 = smov [#allocation2]  }
   0x5   :  { %v110_v4 = vld [vmem:[%s198_s2] ss:$0 sm:$0xff]  ;;  %s99_s1 = sshll.u32 %s158_s20, 4  ;;  %s100_s1 = int_to_ptr.vmem [resolvable:$true] %s99_s1 }
   0x6   :  { %121 = vmatpush3.bf16.msra.mxu0 %v132_v2  ;;  %s134_s0 = scalar_lea.vmem %s100_s1, 256  ;;  %p139_p1 = scmp.lt.s32.totalorder %s100_s1, %s100_s1 }
   0x7   :  { %p135_p0 = scmp.ne.s32.totalorder %s100_s1, %s134_s0  ;;  %p140_p2 = scmp.lt.s32.totalorder %s134_s0, %s134_s0 }
   0x9   :  { %123 = vmatmul.mubr.msk.bf16.vlgmr.msra.gmra.mxu0 %vm46_vm1, %v133_v3  ;;  %p141_p3 = por %p140_p2, %p139_p1 }
   0xb   :  { %p142_p4 = pnand %p141_p3, %p135_p0 }
  0xc9   :  { %v84_v5 = vpop.f32.mrf.mxu0 }
  0xca   :  { %v85_v6 = vadd.f32 %v110_v4, %v84_v5 }
  0xcb   :  { %v124_v7 = vpop.f32.mrf.mxu0 }
  0xcc   :  { %92 = vst.msk [vmem:[#allocation2] sm:$0xff] %vm91_vm2, %v85_v6 }
  0xcd   :  { %v87_v8 = vpop.f32.mrf.mxu0 }
  0xce   :  { %v88_v9 = vadd.f32 %v110_v4, %v87_v8 }
  0xcf   :  { %v125_v10 = vpop.f32.mrf.mxu0 }
  0xd0   :  { %93 = vst.msk [vmem:[#allocation2 + $0x8] sm:$0xff] %vm91_vm2, %v88_v9 }
  0xd1   :  { %145 = shalt.err (!%p142_p4)
}
  0xd2   :  { %s159_s2 = smov 128   ;;  %s160_s21 = smov 8  }
  0xd3   :  { %105 = dma.vmem_to_hbm [thread:$0]  %s100_s1, 256, %s199_s3, [#allocation3], %s159_s2, %s159_s2, %s160_s21  }
  0xd4   :  { %154 = dma.done.wait [#allocation3], 256  }
  0xd5   :  { %155 = vsyncadd [#allocation3], 4294967040 }
  0xd6   :  { %109 = vsyncpa [#allocation3], 1 }

// kernel: transformer_forward.40
= control target key start
LH: loop header
LB: loop body
LE: loop exit
PB: predicated region body
PF: predicated region fallthrough
CT: control target
= control target key end

     0   :  { %s1520_s24 = smov 0   ;;  %s1522_s25 = smov 0   ;;  %s1745_s0 = inlined_call_operand.vmem [shape: bf16[2,8,32], index: 0, kind: input, shape index: {}]   ;;  %s1746_s1 = inlined_call_operand.vmem [shape: bf16[2,8,32], index: 1, kind: input, shape index: {}]   ;;  %s1747_s2 = inlined_call_operand.vmem [shape: bf16[2,8,32], index: 2, kind: input, shape index: {}]   ;;  %s1748_s3 = inlined_call_operand.vmem [shape: f32[2,8,1], index: 3, kind: input, shape index: {}]   ;;  %s1749_s4 = inlined_call_operand.vmem [shape: f32[2,1,8], index: 4, kind: input, shape index: {}]   ;;  %s1750_s5 = inlined_call_operand.vmem [shape: bf16[32,32], index: 5, kind: input, shape index: {}]   ;;  %s1751_s6 = inlined_call_operand.vmem [shape: f32[1,32], index: 6, kind: input, shape index: {}]   ;;  %s1752_s7 = inlined_call_operand.vmem [shape: bf16[2,8,32], index: 7, kind: output, shape index: {}]  }
   0x1   :  { %s1524_s26 = smov 0  }
   0x2 LB: > { %s36_s27 = sadd.s32 1, %s1464_s25  ;;  %p1284_p0 = scmp.ge.s32.totalorder %s1468_s26, 1  ;;  %s1468_s26 = sphi %s1524_s26, %s17_s26   ;;  %s1464_s25 = sphi %s1522_s25, %s1756_s25   ;;  %s1460_s24 = sphi %s1520_s24, %s1755_s24  }
   0x3   : > { %p38_p1 = scmp.ge.s32.totalorder %s36_s27, 2  ;;  %p317_p2 = scmp.lt.s32.totalorder %s1468_s26, 3 }
   0x5   : > { %s1758_s27 = smov (%p38_p1, %s36_s27), 0  ;;  %p318_p3 = pnand %p1284_p0, %p317_p2 }
   0x6   : > { %p380_p4 = scmp.lt.s32.totalorder (!%p318_p3), %s1460_s24, 1  ;;  %s1474_s22 = smov (!%p318_p3), 120  }
   0x7   : > { %321 = sbr.rel (%p318_p3) target bundleno = 1580 (0x62c), region = 48  ;;  %s1475_s23 = smov (!%p318_p3), 112  }
   0x8   : > { %s1478_s30 = smov (!%p318_p3), 16   ;;  %s1479_s8 = smov (!%p318_p3), 24  }
   0xc   : > { %v1470_v0 = vmov 0.0   ;;  %vm1471_vm0 = vmmov 0   ;;  %s1760_s24 = smov (!%p380_p4, %s1460_s24), 1  ;;  %v1472_v1 = vmov 0   ;;  %vm468_vm1 = vcmask 64512  }
   0xd   : > { %1326 = vmatprep.subr.bf16.mxu0 %v1470_v0  ;;  %1328 = vmatprep.mubr.msk.bf16.mxu0 %vm1471_vm0, %v1470_v0  ;;  %s1544_s28 = sshll.u32 %s1760_s24, 2  ;;  %s1288_s29 = sshll.u32 %s1760_s24, 3  ;;  %vm426_vm4 = vcmask 7168   ;;  %v1473_v9 = vmov -inf   ;;  %v450_v10 = vlaneseq  ;;  %vm552_vm10 = vcmask 1043456  }
   0xe   : > { %1416 = vset.pattern.permute.xlu0 %v1472_v1  ;;  %1417 = vset.pattern.permute.xlu1 %v1472_v1  ;;  %s393_s9 = scalar_lea.vmem %s1746_s1, %s1544_s28  ;;  %s407_s12 = scalar_lea.vmem %s1748_s3, %s1288_s29  ;;  %427 = vst.msk [vmem:[#allocation2] sm:$0xff] %vm426_vm4, %v1473_v9  ;;  %428 = vst.msk [vmem:[#allocation2 + $0x8] sm:$0xff] %vm426_vm4, %v1473_v9  ;;  %vm435_vm11 = vcmask 261120   ;;  %vm746_vm12 = vcmask 130112   ;;  %vm887_vm13 = vcmask 195712   ;;  %vm1028_vm14 = vcmask 261312  }
   0xf   : > { %1332 = vmatprep.subr.bf16.mxu1 %v1470_v0  ;;  %1334 = vmatprep.mubr.msk.bf16.mxu1 %vm1471_vm0, %v1470_v0  ;;  %v438_v2 = vld [vmem:[%s393_s9] sm:$0xf]  ;;  %s413_s15 = scalar_lea.vmem %s1749_s4, %s1760_s24  ;;  %s386_s18 = scalar_lea.vmem %s1745_s0, %s1544_s28  ;;  %429 = vst.msk [vmem:[#allocation2 + $0x10] sm:$0xff] %vm426_vm4, %v1473_v9  ;;  %430 = vst.msk [vmem:[#allocation2 + $0x18] sm:$0xff] %vm426_vm4, %v1473_v9  ;;  %v451_v11 = vshrl.u32 %v450_v10, 7  ;;  %v463_v15 = vand.u32 127, %v450_v10 }
  0x10   : > { %v473_v3 = vsel %vm468_vm1, %v438_v2, 0  ;;  %v440_v4 = vld [vmem:[%s407_s12] sm:$0xff]  ;;  %431 = vst.msk [vmem:[#allocation3] sm:$0xff] %vm426_vm4, %v1470_v0  ;;  %432 = vst.msk [vmem:[#allocation3 + $0x8] sm:$0xff] %vm426_vm4, %v1470_v0  ;;  %v1293_v27 = vcombine.low %v438_v2, %v438_v2  ;;  %s400_s21 = scalar_lea.vmem %s1747_s2, %s1544_s28  ;;  %s1476_s24 = smov 104   ;;  %vm1144_vm15 = vcmask 257024  }
  0x11   : > { %v442_v5 = vld [vmem:[%s413_s15] sm:$0x1]  ;;  %1327 = vmatpush3.bf16.xpose.msra.mxu0 %v473_v3  ;;  %vm441_vm2 = vcmp.gt.f32.partialorder %v440_v4, 0.5  ;;  %433 = vst.msk [vmem:[#allocation3 + $0x10] sm:$0xff] %vm426_vm4, %v1470_v0  ;;  %434 = vst.msk [vmem:[#allocation3 + $0x18] sm:$0xff] %vm426_vm4, %v1470_v0  ;;  %v452_v12 = vsub.s32 0, %v451_v11  ;;  %vm466_vm7 = vcmp.ge.s32.totalorder %v451_v11, %v463_v15  ;;  %s420_s17 = scalar_lea.vmem %s1752_s7, %s1544_s28 }
  0x12   : > { %vm443_vm3 = vcmp.gt.f32.partialorder %v442_v5, 0.5  ;;  %v444_v6 = vsel %vm441_vm2, 1, %v1472_v1  ;;  %1344 = vmatprep.subr.bf16.mxu0 %v1470_v0  ;;  %v437_v8 = vld [vmem:[%s386_s18] sm:$0xf]  ;;  %436 = vst.msk [vmem:[#allocation4] sm:$0xff] %vm435_vm11, %v1470_v0  ;;  %s1477_s29 = smov 8  }
  0x13   : > { %v449_v7 = vsel %vm443_vm3, 1, %v1472_v1  ;;  %446 = vperm.xlu0 %1416, %v444_v6   ;;  %v1598_v29 = vld [vmem:[%s400_s21] sm:$0xf]  ;;  %v1292_v31 = vcombine.low %v437_v8, %v437_v8 }
  0x14   : > { %v453_v13 = vrot.slane %v449_v7, %v452_v12  ;;  %v554_v30 = vsel %vm552_vm10, %v1598_v29, 0  ;;  %v1295_v11 = vcombine.low %v1598_v29, %v1598_v29 }
  0x15   : > { %v1584_v24 = vld [vmem:[#allocation2] sm:$0xff]  ;;  %1333 = vmatpush3.bf16.msra.mxu1 %v554_v30 }
  0x16   : > { %vm454_vm5 = vcmp.eq.s32.totalorder %v453_v13, 1  ;;  %1338 = vmatprep.subr.bf16.mxu1 %v1470_v0  ;;  %v1654_v13 = vld [vmem:[#allocation2 + $0x10] sm:$0xff] }
  0x18   : > { %1329 = vmatmul.mubr.msk.bf16.vlgmr.msra.gmra.mxu0 %vm468_vm1, %v437_v8  ;;  %v1642_v8 = vld [vmem:[#allocation2 + $0x8] sm:$0xff] }
  0x19   : > { %1346 = vmatprep.mubr.msk.bf16.mxu0 %vm1471_vm0, %v1470_v0 }
  0x8e   : > { %v447_v14 = vpop.permute.xlu0 %446 }
  0x8f   : > { %vm448_vm6 = vcmp.eq.s32.totalorder %v447_v14, 1 }
  0x90   : > { %vm455_vm8 = vmand %vm448_vm6, %vm454_vm5 }
  0x91   : > { %vm1577_vm9 = vmand %vm455_vm8, %vm466_vm7 }
  0xd8   : > { %v509_v17 = vpop.f32.mrf.mxu0 }
  0xd9   : > { %v515_v18 = vmul.f32 0.35355338, %v509_v17  ;;  %v1665_v17 = vld [vmem:[#allocation2 + $0x18] sm:$0xff] }
  0xda   : > { %v1330_v19 = vpop.f32.mrf.mxu0 }
  0xdb   : > { %v516_v20 = vsel %vm1577_vm9, %v515_v18, -1e+09 }
  0xdc   : > { %v512_v21 = vpop.f32.mrf.mxu0  ;;  %v518_v22 = vsel %vm468_vm1, %v516_v20, -inf }
  0xdd   : > { %519 = vmax.xlane.f32.xlu0 %v518_v22 }
  0xde   : > { %v1331_v23 = vpop.f32.mrf.mxu0 }
 0x166   : > { %v520_v25 = vpop.xlane.xlu0 %519 }
 0x167   : > { %v1587_v26 = vmax.f32 %v1584_v24, %v520_v25 }
 0x169   : > { %v522_v28 = vsub.f32 %v1584_v24, %v1587_v26  ;;  %598 = vst.msk [vmem:[#allocation2] sm:$0xff] %vm426_vm4, %v1587_v26  ;;  %527 = vperm.xlu1 %1417, %v1587_v26  }
 0x16d   : > { %607 = vrot.lane.b32.xlu1 %v1293_v27, %s1474_s22 }
 0x171   : > { %602 = vrot.lane.b32.xlu1 %v1292_v31, %s1474_s22 }
 0x175   : > { %751 = vrot.lane.b32.xlu1 %v1293_v27, %s1475_s23 }
 0x179   : > { %749 = vrot.lane.b32.xlu1 %v1292_v31, %s1475_s23 }
 0x17d   : > { %892 = vrot.lane.b32.xlu1 %v1293_v27, %s1476_s24 }
 0x181   : > { %890 = vrot.lane.b32.xlu1 %v1292_v31, %s1476_s24 }
 0x1e4   : > { %v528_v32 = vpop.permute.xlu1 %527 }
 0x1e5   : > { %v530_v33 = vsub.f32 %v516_v20, %v528_v32 }
 0x1e7   : > { %v531_v34 = vmul.f32 1.442695, %v530_v33 }
 0x1e8   : > { %v608_v35 = vpop.permute.xlu1 %607 }
 0x1e9   : > { %1422 = vpow2.f32 %v531_v34  ;;  %v613_v38 = vsel %vm468_vm1, %v608_v35, 0 }
 0x1ec   : > { %v603_v36 = vpop.permute.xlu1 %602 }
 0x1f0   : > { %v752_v40 = vpop.permute.xlu1 %751 }
 0x1f1   : > { %v757_v42 = vsel %vm468_vm1, %v752_v40, 0 }
 0x1f4   : > { %v750_v41 = vpop.permute.xlu1 %749 }
 0x1f6   : > { %v1609_v37 = vpop.eup %1422 }
 0x1f7   : > { %v548_v39 = vpack.c.bf16 %v1609_v37, %v1609_v37  ;;  %v535_v21 = vsel %vm468_vm1, %v1609_v37, 0.0 }
 0x1f8   : > { %v893_v43 = vpop.permute.xlu1 %892 }
 0x1f9   : > { %1335 = vmatmul.mubr.msk.bf16.vlgmr.msra.gmra.mxu1 %vm468_vm1, %v548_v39  ;;  %v898_v44 = vsel %vm468_vm1, %v893_v43, 0 }
 0x1fa   : > { %1339 = vmatpush3.bf16.xpose.msra.mxu1 %v613_v38  ;;  %1340 = vmatprep.mubr.msk.bf16.mxu1 %vm1471_vm0, %v1470_v0 }
 0x1fb   : > { %1350 = vmatprep.subr.bf16.mxu1 %v1470_v0 }
 0x1fc   : > { %v891_v45 = vpop.permute.xlu1 %890 }
 0x201   : > { %1341 = vmatmul.mubr.msk.bf16.vlgmr.msra.gmra.mxu1 %vm468_vm1, %v603_v36  ;;  %v523_v36 = vmul.f32 1.442695, %v522_v28 }
 0x202   : > { %1351 = vmatpush3.bf16.xpose.msra.mxu1 %v757_v42  ;;  %1352 = vmatprep.mubr.msk.bf16.mxu1 %vm1471_vm0, %v1470_v0 }
 0x203   : > { %1362 = vmatprep.subr.bf16.mxu1 %v1470_v0 }
 0x209   : > { %1353 = vmatmul.mubr.msk.bf16.vlgmr.msra.gmra.mxu1 %vm468_vm1, %v750_v41 }
 0x20a   : > { %1363 = vmatpush3.bf16.xpose.msra.mxu1 %v898_v44  ;;  %1364 = vmatprep.mubr.msk.bf16.mxu1 %vm1471_vm0, %v1470_v0 }
 0x20b   : > { %1374 = vmatprep.subr.bf16.mxu1 %v1470_v0 }
 0x211   : > { %1365 = vmatmul.mubr.msk.bf16.vlgmr.msra.gmra.mxu1 %vm468_vm1, %v891_v45 }
 0x212   : > { %1378 = vmatprep.mubr.msk.bf16.mxu1 %vm1471_vm0, %v1470_v0 }
 0x2b9   : > { %v1631_v46 = vpop.f32.mrf.mxu1 }
 0x2bb   : > { %v1336_v47 = vpop.f32.mrf.mxu1 }
 0x2bd   : > { %v593_v48 = vpop.f32.mrf.mxu1 }
 0x2bf   : > { %v1337_v49 = vpop.f32.mrf.mxu1 }
 0x2c1   : > { %v649_v50 = vpop.f32.mrf.mxu1 }
 0x2c2   : > { %v655_v51 = vmul.f32 0.35355338, %v649_v50 }
 0x2c3   : > { %v1342_v52 = vpop.f32.mrf.mxu1 }
 0x2c4   : > { %v656_v53 = vsel %vm1577_vm9, %v655_v51, -1e+09  ;;  %v533_v51 = vld [vmem:[#allocation3] sm:$0xff] }
 0x2c5   : > { %v652_v54 = vpop.f32.mrf.mxu1  ;;  %v659_v55 = vsel %vm468_vm1, %v656_v53, -inf }
 0x2c6   : > { %660 = vmax.xlane.f32.xlu1 %v659_v55 }
 0x2c7   : > { %v1343_v56 = vpop.f32.mrf.mxu1 }
 0x2c9   : > { %v793_v57 = vpop.f32.mrf.mxu1 }
 0x2ca   : > { %v799_v58 = vmul.f32 0.35355338, %v793_v57  ;;  %v675_v57 = vld [vmem:[#allocation3 + $0x8] sm:$0xff] }
 0x2cb   : > { %v1354_v59 = vpop.f32.mrf.mxu1 }
 0x2cc   : > { %v800_v60 = vsel %vm1577_vm9, %v799_v58, -1e+09 }
 0x2cd   : > { %v796_v61 = vpop.f32.mrf.mxu1  ;;  %v803_v62 = vsel %vm468_vm1, %v800_v60, -inf }
 0x2ce   : > { %804 = vmax.xlane.f32.xlu0 %v803_v62  ;;  %v541_v61 = vld [vmem:[#allocation4] sm:$0xff] }
 0x2cf   : > { %v1355_v63 = vpop.f32.mrf.mxu1 }
 0x2d1   : > { %v934_v1 = vpop.f32.mrf.mxu1 }
 0x2d2   : > { %v940_v2 = vmul.f32 0.35355338, %v934_v1  ;;  %v819_v1 = vld [vmem:[#allocation3 + $0x10] sm:$0xff] }
 0x2d3   : > { %v1366_v3 = vpop.f32.mrf.mxu1 }
 0x2d4   : > { %v941_v4 = vsel %vm1577_vm9, %v940_v2, -1e+09 }
 0x2d5   : > { %v937_v5 = vpop.f32.mrf.mxu1  ;;  %v944_v6 = vsel %vm468_vm1, %v941_v4, -inf }
 0x2d6   : > { %945 = vmax.xlane.f32.xlu0 %v944_v6 }
 0x2d7   : > { %v1367_v7 = vpop.f32.mrf.mxu1 }
 0x34f   : > { %v661_v9 = vpop.xlane.xlu1 %660 }
 0x350   : > { %v1645_v10 = vmax.f32 %v1642_v8, %v661_v9 }
 0x352   : > { %v663_v12 = vsub.f32 %v1642_v8, %v1645_v10  ;;  %748 = vst.msk [vmem:[#allocation2 + $0x8] sm:$0xff] %vm426_vm4, %v1645_v10  ;;  %668 = vperm.xlu0 %1416, %v1645_v10   ;;  %v960_v8 = vld [vmem:[#allocation3 + $0x18] sm:$0xff] }
 0x354   : > { %v664_v49 = vmul.f32 1.442695, %v663_v12 }
 0x356   : > { %693 = vrot.lane.b32.xlu0 %v1295_v11, %s1474_s22 }
 0x357   : > { %v805_v14 = vpop.xlane.xlu0 %804 }
 0x358   : > { %v1658_v15 = vmax.f32 %v1654_v13, %v805_v14 }
 0x35a   : > { %v807_v16 = vsub.f32 %v1654_v13, %v1658_v15  ;;  %889 = vst.msk [vmem:[#allocation2 + $0x10] sm:$0xff] %vm426_vm4, %v1658_v15  ;;  %812 = vperm.xlu1 %1417, %v1658_v15  }
 0x35c   : > { %v808_v55 = vmul.f32 1.442695, %v807_v16 }
 0x35f   : > { %v946_v18 = vpop.xlane.xlu0 %945 }
 0x360   : > { %v1668_v19 = vmax.f32 %v1665_v17, %v946_v18 }
 0x362   : > { %v948_v20 = vsub.f32 %v1665_v17, %v1668_v19  ;;  %1030 = vst.msk [vmem:[#allocation2 + $0x18] sm:$0xff] %vm426_vm4, %v1668_v19  ;;  %953 = vperm.xlu0 %1416, %v1668_v19  }
 0x364   : > { %v949_v56 = vmul.f32 1.442695, %v948_v20 }
 0x366   : > { %834 = vrot.lane.b32.xlu0 %v1295_v11, %s1475_s23 }
 0x36a   : > { %975 = vrot.lane.b32.xlu0 %v1295_v11, %s1476_s24 }
 0x389   : > { %536 = vadd.xlane.f32.xlu0 %v535_v21 }
 0x3cd   : > { %v669_v22 = vpop.permute.xlu0 %668 }
 0x3ce   : > { %v671_v23 = vsub.f32 %v656_v53, %v669_v22 }
 0x3d0   : > { %v672_v25 = vmul.f32 1.442695, %v671_v23 }
 0x3d1   : > { %v694_v27 = vpop.permute.xlu0 %693 }
 0x3d2   : > { %1424 = vpow2.f32 %v672_v25  ;;  %v699_v29 = vsel %vm552_vm10, %v694_v27, 0 }
 0x3d3   : > { %1345 = vmatpush3.bf16.msra.mxu0 %v699_v29 }
 0x3d4   : > { %1356 = vmatprep.subr.bf16.mxu0 %v1470_v0 }
 0x3d5   : > { %v813_v30 = vpop.permute.xlu1 %812 }
 0x3d6   : > { %v815_v31 = vsub.f32 %v800_v60, %v813_v30  ;;  %v1420_v30 = vld [vmem:[%s1750_s5 + $0x8] sm:$0xff]  }
 0x3d7   : > { %1375 = vmatpush3.bf16.msra.mxu1 %v1420_v30 }
 0x3d8   : > { %v816_v32 = vmul.f32 1.442695, %v815_v31  ;;  %v1421_v31 = vld [vmem:[%s1750_s5] sm:$0xff]   ;;  %1376 = vmatprep.subr.bf16.mxu1 %v1470_v0 }
 0x3da   : > { %1426 = vpow2.f32 %v816_v32 }
 0x3db   : > { %1377 = vmatpush3.bf16.msra.mxu1 %v1421_v31 }
 0x3dd   : > { %v954_v33 = vpop.permute.xlu0 %953 }
 0x3de   : > { %v956_v34 = vsub.f32 %v941_v4, %v954_v33 }
 0x3df   : > { %v1425_v35 = vpop.eup %1424 }
 0x3e0   : > { %v957_v37 = vmul.f32 1.442695, %v956_v34  ;;  %v677_v38 = vsel %vm468_vm1, %v1425_v35, 0.0  ;;  %v689_v39 = vpack.c.bf16 %v1425_v35, %v1425_v35 }
 0x3e1   : > { %678 = vadd.xlane.f32.xlu1 %v677_v38  ;;  %v835_v40 = vpop.permute.xlu0 %834 }
 0x3e2   : > { %1428 = vpow2.f32 %v957_v37  ;;  %1347 = vmatmul.mubr.msk.bf16.vlgmr.msra.gmra.mxu0 %vm468_vm1, %v689_v39  ;;  %v840_v41 = vsel %vm552_vm10, %v835_v40, 0 }
 0x3e3   : > { %1357 = vmatpush3.bf16.msra.mxu0 %v840_v41  ;;  %1358 = vmatprep.mubr.msk.bf16.mxu0 %vm1471_vm0, %v1470_v0  ;;  %1430 = vpow2.f32 %v523_v36 }
 0x3e4   : > { %1368 = vmatprep.subr.bf16.mxu0 %v1470_v0  ;;  %1432 = vpow2.f32 %v664_v49 }
 0x3e5   : > { %v976_v24 = vpop.permute.xlu0 %975  ;;  %1434 = vpow2.f32 %v808_v55 }
 0x3e6   : > { %v981_v43 = vsel %vm552_vm10, %v976_v24, 0  ;;  %1436 = vpow2.f32 %v949_v56 }
 0x3e7   : > { %v1427_v26 = vpop.eup %1426 }
 0x3e8   : > { %v821_v28 = vsel %vm468_vm1, %v1427_v26, 0.0  ;;  %v833_v42 = vpack.c.bf16 %v1427_v26, %v1427_v26 }
 0x3e9   : > { %822 = vadd.xlane.f32.xlu0 %v821_v28 }
 0x3ea   : > { %1359 = vmatmul.mubr.msk.bf16.vlgmr.msra.gmra.mxu0 %vm468_vm1, %v833_v42 }
 0x3eb   : > { %1369 = vmatpush3.bf16.msra.mxu0 %v981_v43  ;;  %1370 = vmatprep.mubr.msk.bf16.mxu0 %vm1471_vm0, %v1470_v0 }
 0x3ef   : > { %v1429_v44 = vpop.eup %1428 }
 0x3f0   : > { %v962_v45 = vsel %vm468_vm1, %v1429_v44, 0.0  ;;  %v974_v47 = vpack.c.bf16 %v1429_v44, %v1429_v44  ;;  %v1431_v48 = vpop.eup %1430 }
 0x3f1   : > { %963 = vadd.xlane.f32.xlu0 %v962_v45  ;;  %v1433_v50 = vpop.eup %1432  ;;  %v534_v52 = vmul.f32 %v1431_v48, %v533_v51 }
 0x3f2   : > { %1371 = vmatmul.mubr.msk.bf16.vlgmr.msra.gmra.mxu0 %vm468_vm1, %v974_v47  ;;  %544 = vperm.xlu1 %1417, %v1431_v48   ;;  %v676_v58 = vmul.f32 %v1433_v50, %v675_v57  ;;  %v1435_v62 = vpop.eup %1434 }
 0x3f3   : > { %v820_v4 = vmul.f32 %v1435_v62, %v819_v1  ;;  %v1437_v7 = vpop.eup %1436 }
 0x3f4   : > { %v961_v9 = vmul.f32 %v1437_v7, %v960_v8 }
 0x407   : > { %685 = vperm.xlu0 %1416, %v1433_v50  }
 0x412   : > { %v537_v53 = vpop.xlane.xlu0 %536 }
 0x413   : > { %v538_v54 = vadd.f32 %v537_v53, %v534_v52 }
 0x415   : > { %540 = vst.msk [vmem:[#allocation3] sm:$0xff] %vm426_vm4, %v538_v54 }
 0x41c   : > { %v1035_v16 = vld [vmem:[#allocation3] sm:$0xff] }
 0x46a   : > { %v679_v59 = vpop.xlane.xlu1 %678 }
 0x46b   : > { %v680_v60 = vadd.f32 %v679_v59, %v676_v58 }
 0x46d   : > { %681 = vst.msk [vmem:[#allocation3 + $0x8] sm:$0xff] %vm426_vm4, %v680_v60 }
 0x46e   : > { %v545_v63 = vpop.permute.xlu1 %544 }
 0x46f   : > { %v547_v2 = vmul.f32 %v545_v63, %v541_v61 }
 0x471   : > { %v596_v3 = vadd.f32 %v1631_v46, %v547_v2 }
 0x472   : > { %v823_v5 = vpop.xlane.xlu0 %822 }
 0x473   : > { %597 = vst.msk [vmem:[#allocation4] sm:$0xff] %vm468_vm1, %v596_v3  ;;  %v824_v6 = vadd.f32 %v823_v5, %v820_v4 }
 0x474   : > { %v1045_v21 = vld [vmem:[#allocation3 + $0x8] sm:$0xff] }
 0x475   : > { %825 = vst.msk [vmem:[#allocation3 + $0x10] sm:$0xff] %vm426_vm4, %v824_v6 }
 0x47a   : > { %v964_v10 = vpop.xlane.xlu0 %963  ;;  %v682_v33 = vld [vmem:[#allocation4] sm:$0xff] }
 0x47b   : > { %v965_v11 = vadd.f32 %v964_v10, %v961_v9 }
 0x47c   : > { %v1055_v27 = vld [vmem:[#allocation3 + $0x10] sm:$0xff] }
 0x47d   : > { %966 = vst.msk [vmem:[#allocation3 + $0x18] sm:$0xff] %vm426_vm4, %v965_v11 }
 0x482   : > { %v686_v32 = vpop.permute.xlu0 %685 }
 0x483   : > { %v688_v34 = vmul.f32 %v686_v32, %v682_v33 }
 0x484   : > { %v1065_v25 = vld [vmem:[#allocation3 + $0x18] sm:$0xff] }
 0x4a2   : > { %v735_v12 = vpop.f32.mrf.mxu0 }
 0x4a3   : > { %742 = vrot.lane.b32.xlu1 %v735_v12, %s1477_s29 }
 0x4a4   : > { %v1348_v13 = vpop.f32.mrf.mxu0 }
 0x4a6   : > { %v738_v14 = vpop.f32.mrf.mxu0 }
 0x4a7   : > { %829 = vperm.xlu1 %1417, %v1435_v62   ;;  %v1301_v62 = vld [vmem:[%s1751_s6] ss:$0 sm:$0xff] }
 0x4a8   : > { %v1349_v46 = vpop.f32.mrf.mxu0 }
 0x4aa   : > { %v876_v15 = vpop.f32.mrf.mxu0 }
 0x4ab   : > { %1038 = vperm.xlu1 %1417, %v1035_v16   ;;  %883 = vrot.lane.b32.xlu0 %v876_v15, %s1478_s30 }
 0x4ac   : > { %v1360_v17 = vpop.f32.mrf.mxu0 }
 0x4ae   : > { %v879_v18 = vpop.f32.mrf.mxu0 }
 0x4af   : > { %970 = vperm.xlu0 %1416, %v1437_v7  }
 0x4b0   : > { %v1361_v19 = vpop.f32.mrf.mxu0 }
 0x4b2   : > { %v1017_v20 = vpop.f32.mrf.mxu0 }
 0x4b3   : > { %1048 = vperm.xlu0 %1416, %v1045_v21   ;;  %1024 = vrot.lane.b32.xlu1 %v1017_v20, %s1479_s8 }
 0x4b4   : > { %v1372_v22 = vpop.f32.mrf.mxu0 }
 0x4b6   : > { %v1020_v23 = vpop.f32.mrf.mxu0 }
 0x4b7   : > { %1068 = vperm.xlu0 %1416, %v1065_v25   ;;  %1058 = vperm.xlu1 %1417, %v1055_v27  }
 0x4b8   : > { %v1373_v29 = vpop.f32.mrf.mxu0 }
 0x515   : > { %v743_v35 = vpop.permute.xlu1 %742 }
 0x516   : > { %v745_v36 = vadd.f32 %v743_v35, %v688_v34 }
 0x518   : > { %747 = vst.msk [vmem:[#allocation4] sm:$0xff] %vm746_vm12, %v745_v36 }
 0x51d   : > { %v884_v40 = vpop.permute.xlu0 %883 }
 0x51f   : > { %v826_v37 = vld [vmem:[#allocation4] sm:$0xff] }
 0x522   : > { %v830_v38 = vpop.permute.xlu1 %829 }
 0x523   : > { %v832_v39 = vmul.f32 %v830_v38, %v826_v37 }
 0x525   : > { %v886_v41 = vadd.f32 %v884_v40, %v832_v39 }
 0x526   : > { %v1039_v24 = vpop.permute.xlu1 %1038 }
 0x527   : > { %888 = vst.msk [vmem:[#allocation4] sm:$0xff] %vm887_vm13, %v886_v41  ;;  %1438 = vrcp.f32 %v1039_v24 }
 0x52a   : > { %v971_v26 = vpop.permute.xlu0 %970  ;;  %v1025_v42 = vpop.permute.xlu1 %1024 }
 0x52e   : > { %v967_v0 = vld [vmem:[#allocation4] sm:$0xff]  ;;  %v1049_v44 = vpop.permute.xlu0 %1048 }
 0x52f   : > { %v973_v28 = vmul.f32 %v971_v26, %v967_v0  ;;  %1440 = vrcp.f32 %v1049_v44 }
 0x531   : > { %v1027_v43 = vadd.f32 %v1025_v42, %v973_v28 }
 0x532   : > { %v1059_v49 = vpop.permute.xlu1 %1058  ;;  %v1069_v53 = vpop.permute.xlu0 %1068 }
 0x533   : > { %1029 = vst.msk [vmem:[#allocation4] sm:$0xff] %vm1028_vm14, %v1027_v43  ;;  %1442 = vrcp.f32 %v1059_v49 }
 0x534   : > { %v1439_v45 = vpop.eup %1438  ;;  %1444 = vrcp.f32 %v1069_v53 }
 0x53a   : > { %v1034_v47 = vld [vmem:[#allocation4] sm:$0xff] }
 0x53b   : > { %v1042_v48 = vmul.f32 %v1439_v45, %v1034_v47 }
 0x53c   : > { %v1441_v50 = vpop.eup %1440 }
 0x53d   : > { %1043 = vst.msk [vmem:[#allocation4] sm:$0xff] %vm468_vm1, %v1042_v48 }
 0x540   : > { %v1443_v54 = vpop.eup %1442 }
 0x541   : > { %v1445_v57 = vpop.eup %1444 }
 0x544   : > { %v1044_v51 = vld [vmem:[#allocation4] sm:$0xff] }
 0x545   : > { %v1052_v52 = vmul.f32 %v1441_v50, %v1044_v51 }
 0x547   : > { %1053 = vst.msk [vmem:[#allocation4] sm:$0xff] %vm746_vm12, %v1052_v52 }
 0x54e   : > { %v1054_v55 = vld [vmem:[#allocation4] sm:$0xff] }
 0x54f   : > { %v1062_v56 = vmul.f32 %v1443_v54, %v1054_v55 }
 0x551   : > { %1063 = vst.msk [vmem:[#allocation4] sm:$0xff] %vm887_vm13, %v1062_v56 }
 0x558   : > { %v1064_v58 = vld [vmem:[#allocation4] sm:$0xff] }
 0x559   : > { %v1072_v59 = vmul.f32 %v1445_v57, %v1064_v58 }
 0x55b   : > { %1073 = vst.msk [vmem:[#allocation4] sm:$0xff] %vm1028_vm14, %v1072_v59 }
 0x562   : > { %v1074_v60 = vld [vmem:[#allocation4] sm:$0xff] }
 0x563   : > { %v1075_v61 = vpack.c.bf16 %v1074_v60, %v1074_v60 }
 0x565   : > { %1379 = vmatmul.mubr.msk.bf16.vlgmr.msra.gmra.mxu1 %vm435_vm11, %v1075_v61 }
 0x625   : > { %v1137_v63 = vpop.f32.mrf.mxu1 }
 0x626   : > { %v1138_v1 = vadd.f32 %v1301_v62, %v1137_v63 }
 0x627   : > { %v1380_v2 = vpop.f32.mrf.mxu1 }
 0x628   : > { %v1143_v3 = vpack.c.bf16 %v1138_v1, %v1138_v1 }
 0x629   : > { %v1140_v4 = vpop.f32.mrf.mxu1 }
 0x62a   : > { %1145 = vst.msk [vmem:[%s420_s17] sm:$0xf] %vm1144_vm15, %v1143_v3 }
 0x62b   : > { %v1381_v5 = vpop.f32.mrf.mxu1 }
 0x62c PF: > { %s17_s26 = sadd.s32 1, %s1468_s26   ;;  %s1755_s24 = smov %s1464_s25 }
 0x62d   : > { %p14_p5 = scmp.ge.s32.totalorder %s17_s26, 4   ;;  %s1756_s25 = smov %s1758_s27 }
 0x62f   :  { %16 = sbr.rel (!%p14_p5) target bundleno = 2 (0x2), region = 104 }

</bundles_post_ra>
